<compile_context>
chip_gen: v7x
topology: tpu7x:2x2x1
jax: 0.10.0
libtpu: 0.0.40
codegen_flags: <defaults>
</compile_context>

<pallas_src>
import functools

import jax
import jax.numpy as jnp
import numpy as np
from jax.experimental import pallas as pl
from jax.experimental.pallas import tpu as pltpu


# --------------------------------------------------------------------------
# Kernel
# --------------------------------------------------------------------------
def _eqv_ln_kernel(x_ref, red_ref, scat_ref, mask_ref, bias_ref, meanred_ref,
                   o_ref, *, eps, inv_c, use_mxu_mean):
    # x_ref       : (TN, SCP)   input tile (lane-dense, zero-padded lanes)
    # red_ref     : (SCP, LP)   per-l variance-reduction weights (LP = padded L)
    # scat_ref    : (LP, SCP)   per-l -> lane scatter matrix, pre-multiplied by
    #                           the affine weight (zeros in padded rows/lanes)
    # mask_ref    : (1, SCP)    1.0 on the l=0 lanes (first C), 0 elsewhere
    # bias_ref    : (1, SCP)    affine bias on the l=0 lanes, 0 elsewhere
    # meanred_ref : (SCP, 8)    column 0 holds 1/C on the first C rows
    # o_ref       : (TN, SCP)
    x = x_ref[...].astype(jnp.float32)
    mask = mask_ref[...]

    # l = 0 channel mean.
    if use_mxu_mean:
        # v7x: do the reduction on the (idle) MXU instead of VPU+XLU.
        mean0 = jnp.dot(x, meanred_ref[...],
                        preferred_element_type=jnp.float32,
                        precision=jax.lax.Precision.HIGHEST)[:, 0:1]  # (TN, 1)
    else:
        # v5e/v6e: exact f32 masked lane reduction (hidden under HBM).
        mean0 = jnp.sum(x * mask, axis=1, keepdims=True) * inv_c      # (TN, 1)

    xc = x - mean0 * mask                                             # (TN, SCP)

    # Per-l sum/mean of squares via one segment-reduction matmul (idle MXU).
    var = jnp.dot(xc * xc, red_ref[...],
                  preferred_element_type=jnp.float32,
                  precision=jax.lax.Precision.HIGHEST)                # (TN, LP)
    inv = jax.lax.rsqrt(var + eps)                                    # EUP slot

    # Scatter the per-l inverse norm back to every lane of its segment,
    # affine weight folded into the scatter matrix (second MXU matmul).
    scale = jnp.dot(inv, scat_ref[...],
                    preferred_element_type=jnp.float32,
                    precision=jax.lax.Precision.HIGHEST)              # (TN, SCP)

    # Single full-tile, lane-dense store.
    o_ref[...] = (xc * scale + bias_ref[...]).astype(o_ref.dtype)


# --------------------------------------------------------------------------
# Tiling policy (generation-aware)
# --------------------------------------------------------------------------
def _ceil_to(x, m):
    return ((x + m - 1) // m) * m


def _tpu_generation():
    """Best-effort TPU generation (5/6/7/...) or None if unknown."""
    try:
        kind = jax.devices()[0].device_kind.lower()
    except Exception:
        return None
    for g in (7, 6, 5, 4):
        if (f"v{g}" in kind) or (f"tpu{g}" in kind):
            return g
    return None


def _pick_tiling(N, SCP, itemsize, gen):
    """Return (tile_n, padded_N).  tile_n is a multiple of 8."""
    # Working set per row of tile: double-buffered in+out tiles plus ~4x f32
    # in-kernel intermediates (x_f32, xc, xc*xc, scale).
    per_row = 2 * 2 * SCP * itemsize + 4 * SCP * 4
    if gen is not None and gen >= 7:
        budget = 16 << 20          # v7x: 64 MiB VMEM total -> stay modest
    elif gen in (5, 6):
        budget = 24 << 20          # v5e/v6e: 128 MiB physical VMEM
    else:
        budget = 12 << 20          # unknown chip: be conservative
    cap = max(8, (budget // per_row) // 8 * 8)

    if gen is not None and gen >= 7 and N > 8:
        # v7x megacore: even (>=2) number of grid steps, sharded across 2 TCs.
        steps = max(2, pl.cdiv(N, cap))
        if steps % 2:
            steps += 1
        tile_n = max(8, _ceil_to(pl.cdiv(N, steps), 8))
        n_pad = steps * tile_n
    else:
        # Single TensorCore: biggest tile that fits the budget (grid may be 1).
        tile_n = min(cap, _ceil_to(N, 8))
        n_pad = _ceil_to(N, tile_n)
    return tile_n, n_pad


# --------------------------------------------------------------------------
# Wrapper
# --------------------------------------------------------------------------
def equivariant_layer_norm_array(node_input, affine_weight=None,
                                 affine_bias=None, *, lmax, eps=1e-5,
                                 affine=True, normalization="component",
                                 tile_n=None):
    """node_input: [N, (lmax+1)**2, C]; returns same shape & dtype."""
    assert normalization in ("norm", "component")
    N, S, C = node_input.shape
    L = lmax + 1
    assert S == L * L
    SC = S * C
    SCP = _ceil_to(SC, 128)                    # lane-dense padded width
    LP = max(8, _ceil_to(L, 8))                # pad l-axis to a sublane multiple

    gen = _tpu_generation()
    use_mxu_mean = gen is not None and gen >= 7

    # ---- static constants (numpy) ---------------------------------------
    red = np.zeros((SCP, LP), np.float32)      # segment reduction weights
    onehot = np.zeros((L, S), np.float32)      # l -> sphere-basis rows
    for l in range(L):
        start, length = l * l, 2 * l + 1
        onehot[l, start:start + length] = 1.0
        w = 1.0 / (length * C) if normalization == "component" else 1.0 / C
        red[start * C:(start + length) * C, l] = w

    mask_row = np.zeros((1, SCP), np.float32)
    mask_row[0, :C] = 1.0
    meanred = np.zeros((SCP, 8), np.float32)   # MXU mean reduction (col 0)
    meanred[:C, 0] = 1.0 / C

    # ---- parameter-dependent constants (jnp, traceable) -----------------
    if affine:
        aw = jnp.asarray(affine_weight, jnp.float32)             # (L, C)
        ab = jnp.asarray(affine_bias, jnp.float32)               # (C,)
    else:
        aw = jnp.ones((L, C), jnp.float32)
        ab = jnp.zeros((C,), jnp.float32)
    scat_l = (jnp.asarray(onehot)[:, :, None] * aw[:, None, :]).reshape(L, SC)
    scat = jnp.zeros((LP, SCP), jnp.float32).at[:L, :SC].set(scat_l)
    bias_row = jnp.zeros((1, SCP), jnp.float32)
    if affine:
        bias_row = bias_row.at[0, :C].set(ab)

    # ---- tiling ----------------------------------------------------------
    itemsize = np.dtype(node_input.dtype).itemsize
    if tile_n is None:
        tile_n, n_pad = _pick_tiling(N, SCP, itemsize, gen)
    else:
        tile_n = _ceil_to(tile_n, 8)
        n_pad = _ceil_to(N, tile_n)

    x2d = node_input.reshape(N, SC)            # lane-dense view
    if n_pad != N or SCP != SC:
        x2d = jnp.pad(x2d, ((0, n_pad - N), (0, SCP - SC)))

    kernel = functools.partial(_eqv_ln_kernel, eps=float(eps), inv_c=1.0 / C,
                               use_mxu_mean=use_mxu_mean)

    grid_spec = pltpu.PrefetchScalarGridSpec(
        num_scalar_prefetch=0,
        grid=(n_pad // tile_n,),
        in_specs=[
            pl.BlockSpec((tile_n, SCP), lambda i: (i, 0)),
            pl.BlockSpec((SCP, LP), lambda i: (0, 0)),
            pl.BlockSpec((LP, SCP), lambda i: (0, 0)),
            pl.BlockSpec((1, SCP), lambda i: (0, 0)),
            pl.BlockSpec((1, SCP), lambda i: (0, 0)),
            pl.BlockSpec((SCP, 8), lambda i: (0, 0)),
        ],
        out_specs=pl.BlockSpec((tile_n, SCP), lambda i: (i, 0)),
    )

    vmem_limit = (48 << 20) if (gen is not None and gen >= 7) else \
                 ((64 << 20) if gen in (5, 6) else (32 << 20))

    out2d = pl.pallas_call(
        kernel,
        out_shape=jax.ShapeDtypeStruct((n_pad, SCP), node_input.dtype),
        grid_spec=grid_spec,
        compiler_params=pltpu.CompilerParams(
            dimension_semantics=("parallel",),
            vmem_limit_bytes=vmem_limit),
    )(x2d, jnp.asarray(red), scat, jnp.asarray(mask_row), bias_row,
      jnp.asarray(meanred))

    return out2d[:N, :SC].reshape(N, S, C)


# --------------------------------------------------------------------------
# Pure-JAX reference (mirrors the PyTorch module)
# --------------------------------------------------------------------------
def _reference(node_input, affine_weight, affine_bias, *, lmax, eps,
               affine=True, normalization="component"):
    out = []
    for l in range(lmax + 1):
        start = l * l
        length = 2 * l + 1
        feat = node_input[:, start:start + length, :]
        if l == 0:
            feat = feat - jnp.mean(feat, axis=2, keepdims=True)
        if normalization == "norm":
            fn = jnp.sum(feat ** 2, axis=1, keepdims=True)
        else:
            fn = jnp.mean(feat ** 2, axis=1, keepdims=True)
        fn = jnp.mean(fn, axis=2, keepdims=True)
        fn = (fn + eps) ** -0.5
        if affine:
            fn = fn * affine_weight[l].reshape(1, 1, -1)
        feat = feat * fn
        if affine and l == 0:
            feat = feat + affine_bias.reshape(1, 1, -1)
        out.append(feat)
    return jnp.concatenate(out, axis=1)


if __name__ == "__main__":
    eps = 1e-5
    key = jax.random.PRNGKey(0)

    # ---- main config: lmax=3, C=32, N=64  (S*C = 512, aligned) ----------
    lmax, C, N = 3, 32, 64
    S = (lmax + 1) ** 2
    kx, kw, kb, kx2, kw2, kb2 = jax.random.split(key, 6)
    x = jax.random.normal(kx, (N, S, C), dtype=jnp.float32)
    aw = (jnp.ones((lmax + 1, C), jnp.float32)
          + 0.1 * jax.random.normal(kw, (lmax + 1, C), jnp.float32))
    ab = 0.1 * jax.random.normal(kb, (C,), jnp.float32)

    # f32 path, both normalization modes.  precision=HIGHEST on the MXU
    # matmuls -> near-f32 accuracy, so tolerances are tight.
    for norm_mode in ("component", "norm"):
        out = equivariant_layer_norm_array(
            x, aw, ab, lmax=lmax, eps=eps, affine=True,
            normalization=norm_mode)
        out = jax.block_until_ready(out)
        ref = _reference(x, aw, ab, lmax=lmax, eps=eps, affine=True,
                         normalization=norm_mode)
        np.testing.assert_allclose(np.asarray(out), np.asarray(ref),
                                   rtol=1e-4, atol=1e-5)

    # ---- ragged config: N not a multiple of 8, S*C not a multiple of 128 -
    lmax2, C2, N2 = 2, 20, 30          # S=9, S*C=180 -> padded to 256
    S2 = (lmax2 + 1) ** 2
    x2 = jax.random.normal(kx2, (N2, S2, C2), dtype=jnp.float32)
    aw2 = (jnp.ones((lmax2 + 1, C2), jnp.float32)
           + 0.1 * jax.random.normal(kw2, (lmax2 + 1, C2), jnp.float32))
    ab2 = 0.1 * jax.random.normal(kb2, (C2,), jnp.float32)
    out2 = equivariant_layer_norm_array(
        x2, aw2, ab2, lmax=lmax2, eps=eps, affine=True,
        normalization="component")
    out2 = jax.block_until_ready(out2)
    ref2 = _reference(x2, aw2, ab2, lmax=lmax2, eps=eps, affine=True,
                      normalization="component")
    np.testing.assert_allclose(np.asarray(out2), np.asarray(ref2),
                               rtol=1e-4, atol=1e-5)

    # ---- bf16 I/O path (halves HBM bytes; in-kernel math stays f32) ------
    x_bf16 = x.astype(jnp.bfloat16)
    out_bf16 = equivariant_layer_norm_array(
        x_bf16, aw, ab, lmax=lmax, eps=eps, affine=True,
        normalization="component")
    out_bf16 = jax.block_until_ready(out_bf16)
    ref_bf16 = _reference(x_bf16.astype(jnp.float32), aw, ab,
                          lmax=lmax, eps=eps, affine=True,
                          normalization="component")
    np.testing.assert_allclose(np.asarray(out_bf16).astype(np.float32),
                               np.asarray(ref_bf16), rtol=5e-2, atol=5e-2)

    print("KERNEL_OK")
</pallas_src>

<mosaic_0001>
module attributes {stable_mosaic.version = 11 : i64} {
  func.func @_eqv_ln_kernel(%arg0: i32, %arg1: memref<64x512xf32, #tpu.memory_space<vmem>>, %arg2: memref<512x8xf32, #tpu.memory_space<vmem>>, %arg3: memref<8x512xf32, #tpu.memory_space<vmem>>, %arg4: memref<1x512xf32, #tpu.memory_space<vmem>>, %arg5: memref<1x512xf32, #tpu.memory_space<vmem>>, %arg6: memref<512x8xf32, #tpu.memory_space<vmem>>, %arg7: memref<64x512xf32, #tpu.memory_space<vmem>>) attributes {dimension_semantics = [#tpu.dimension_semantics<parallel>], iteration_bounds = array<i64: 1>, scalar_prefetch = 0 : i64, scratch_operands = 0 : i64, tpu.core_type = #tpu.core_type<tc>, window_params = [{transform_indices = @transform_0, window_bounds = array<i64: 64, 512>}, {pipeline_mode = #tpu.pipeline_mode<synchronous>, transform_indices = @transform_1, window_bounds = array<i64: 512, 8>}, {pipeline_mode = #tpu.pipeline_mode<synchronous>, transform_indices = @transform_2, window_bounds = array<i64: 8, 512>}, {pipeline_mode = #tpu.pipeline_mode<synchronous>, transform_indices = @transform_3, window_bounds = array<i64: 1, 512>}, {pipeline_mode = #tpu.pipeline_mode<synchronous>, transform_indices = @transform_4, window_bounds = array<i64: 1, 512>}, {pipeline_mode = #tpu.pipeline_mode<synchronous>, transform_indices = @transform_5, window_bounds = array<i64: 512, 8>}, {transform_indices = @transform_6, window_bounds = array<i64: 64, 512>}]} {
    %c0 = arith.constant 0 : index
    %c0_0 = arith.constant 0 : index
    %0 = vector.load %arg1[%c0, %c0_0] : memref<64x512xf32, #tpu.memory_space<vmem>>, vector<64x512xf32>
    %c0_1 = arith.constant 0 : index
    %c0_2 = arith.constant 0 : index
    %1 = vector.load %arg4[%c0_1, %c0_2] : memref<1x512xf32, #tpu.memory_space<vmem>>, vector<1x512xf32>
    %2 = vector.broadcast %1 : vector<1x512xf32> to vector<64x512xf32>
    %3 = arith.mulf %0, %2 : vector<64x512xf32>
    %cst = arith.constant dense<0.000000e+00> : vector<64xf32>
    %4 = vector.multi_reduction <add>, %3, %cst [1] : vector<64x512xf32> to vector<64xf32>
    %5 = vector.shape_cast %4 : vector<64xf32> to vector<64x1xf32>
    %cst_3 = arith.constant 3.125000e-02 : f32
    %6 = vector.broadcast %cst_3 : f32 to vector<64x1xf32>
    %7 = arith.mulf %5, %6 : vector<64x1xf32>
    %8 = vector.broadcast %7 : vector<64x1xf32> to vector<64x512xf32>
    %9 = vector.broadcast %1 : vector<1x512xf32> to vector<64x512xf32>
    %10 = arith.mulf %8, %9 : vector<64x512xf32>
    %11 = arith.subf %0, %10 : vector<64x512xf32>
    %12 = arith.mulf %11, %11 : vector<64x512xf32>
    %c0_4 = arith.constant 0 : index
    %c0_5 = arith.constant 0 : index
    %13 = vector.load %arg2[%c0_4, %c0_5] : memref<512x8xf32, #tpu.memory_space<vmem>>, vector<512x8xf32>
    %cst_6 = arith.constant dense<0.000000e+00> : vector<64x8xf32>
    %14 = tpu.matmul %12, %13, %cst_6 {dimension_numbers = #tpu.dot_dimension_numbers<[1], [0], [0], [1], [0, 0, 1, 1], [], []>, precision = #tpu.contract_precision<fp32>} : vector<64x512xf32>, vector<512x8xf32>, vector<64x8xf32> -> vector<64x8xf32>
    %cst_7 = arith.constant 9.99999974E-6 : f32
    %15 = vector.broadcast %cst_7 : f32 to vector<64x8xf32>
    %16 = arith.addf %14, %15 : vector<64x8xf32>
    %17 = math.rsqrt %16 : vector<64x8xf32>
    %c0_8 = arith.constant 0 : index
    %c0_9 = arith.constant 0 : index
    %18 = vector.load %arg3[%c0_8, %c0_9] : memref<8x512xf32, #tpu.memory_space<vmem>>, vector<8x512xf32>
    %cst_10 = arith.constant dense<0.000000e+00> : vector<64x512xf32>
    %19 = tpu.matmul %17, %18, %cst_10 {dimension_numbers = #tpu.dot_dimension_numbers<[1], [0], [0], [1], [0, 0, 1, 1], [], []>, precision = #tpu.contract_precision<fp32>} : vector<64x8xf32>, vector<8x512xf32>, vector<64x512xf32> -> vector<64x512xf32>
    %20 = arith.mulf %11, %19 : vector<64x512xf32>
    %c0_11 = arith.constant 0 : index
    %c0_12 = arith.constant 0 : index
    %21 = vector.load %arg5[%c0_11, %c0_12] : memref<1x512xf32, #tpu.memory_space<vmem>>, vector<1x512xf32>
    %22 = vector.broadcast %21 : vector<1x512xf32> to vector<64x512xf32>
    %23 = arith.addf %20, %22 : vector<64x512xf32>
    %c0_13 = arith.constant 0 : index
    %c0_14 = arith.constant 0 : index
    %24 = vector.load %arg7[%c0_13, %c0_14] : memref<64x512xf32, #tpu.memory_space<vmem>>, vector<64x512xf32>
    tpu.vector_store %arg7[%c0_13, %c0_14], %23 {strides = array<i32>} : memref<64x512xf32, #tpu.memory_space<vmem>>, vector<64x512xf32>,
    return
  }
  func.func @transform_0(%arg0: i32) -> (i32, i32) {
    %c0_i32 = arith.constant 0 : i32
    %c0_i32_0 = arith.constant 0 : i32
    return %arg0, %c0_i32 : i32, i32
  }
  func.func @transform_1(%arg0: i32) -> (i32, i32) {
    %c0_i32 = arith.constant 0 : i32
    %c0_i32_0 = arith.constant 0 : i32
    %c0_i32_1 = arith.constant 0 : i32
    return %c0_i32, %c0_i32_0 : i32, i32
  }
  func.func @transform_2(%arg0: i32) -> (i32, i32) {
    %c0_i32 = arith.constant 0 : i32
    %c0_i32_0 = arith.constant 0 : i32
    %c0_i32_1 = arith.constant 0 : i32
    return %c0_i32, %c0_i32_0 : i32, i32
  }
  func.func @transform_3(%arg0: i32) -> (i32, i32) {
    %c0_i32 = arith.constant 0 : i32
    %c0_i32_0 = arith.constant 0 : i32
    %c0_i32_1 = arith.constant 0 : i32
    return %c0_i32, %c0_i32_0 : i32, i32
  }
  func.func @transform_4(%arg0: i32) -> (i32, i32) {
    %c0_i32 = arith.constant 0 : i32
    %c0_i32_0 = arith.constant 0 : i32
    %c0_i32_1 = arith.constant 0 : i32
    return %c0_i32, %c0_i32_0 : i32, i32
  }
  func.func @transform_5(%arg0: i32) -> (i32, i32) {
    %c0_i32 = arith.constant 0 : i32
    %c0_i32_0 = arith.constant 0 : i32
    %c0_i32_1 = arith.constant 0 : i32
    return %c0_i32, %c0_i32_0 : i32, i32
  }
  func.func @transform_6(%arg0: i32) -> (i32, i32) {
    %c0_i32 = arith.constant 0 : i32
    %c0_i32_0 = arith.constant 0 : i32
    return %arg0, %c0_i32 : i32, i32
  }
}

</mosaic_0001>

<bundles_post_ra>
// kernel: tpu_custom_call.1
= control target key start
LH: loop header
LB: loop body
LE: loop exit
PB: predicated region body
PF: predicated region fallthrough
CT: control target
= control target key end

     0   :  { %v58_v0 = vlaneseq  ;;  %s8783_s0 = inlined_call_operand.vmem [shape: f32[64,512], index: 0, kind: input, shape index: {}]   ;;  %s8784_s1 = inlined_call_operand.vmem [shape: f32[512,8], index: 1, kind: input, shape index: {}]   ;;  %s8785_s2 = inlined_call_operand.vmem [shape: f32[8,512], index: 2, kind: input, shape index: {}]   ;;  %s8786_s3 = inlined_call_operand.vmem [shape: f32[1,512], index: 3, kind: input, shape index: {}]   ;;  %s8787_s4 = inlined_call_operand.vmem [shape: f32[1,512], index: 4, kind: input, shape index: {}]   ;;  %s8788_s5 = inlined_call_operand.vmem [shape: f32[512,8], index: 5, kind: input, shape index: {}]   ;;  %s8789_s6 = inlined_call_operand.hbm [shape: f32[64,512], index: 6, kind: output, shape index: {}]  }
   0x1   :  { %v56_v2 = vld [vmem:[%s8786_s3] sm:$0xf]  ;;  %v5941_v4 = vld [vmem:[%s8783_s0 + $0x8] sm:$0xff]  ;;  %v26_v9 = vld [vmem:[%s8783_s0 + $0x10] sm:$0xff] }
   0x2   :  { %v5928_v1 = vshrl.u32 %v58_v0, 7  ;;  %v5936_v3 = vld [vmem:[%s8783_s0] sm:$0xff]  ;;  %v27_v10 = vld [vmem:[%s8783_s0 + $0x18] sm:$0xff]  ;;  %v5977_v16 = vld [vmem:[%s8783_s0 + $0x48] sm:$0xff] }
   0x3   :  { %v5956_v11 = vld [vmem:[%s8783_s0 + $0x40] sm:$0xff]  ;;  %v34_v17 = vld [vmem:[%s8783_s0 + $0x50] sm:$0xff]  ;;  %v35_v18 = vld [vmem:[%s8783_s0 + $0x58] sm:$0xff] }
   0x4   :  { %9050 = vst [vmem:[#allocation5_spill] sm:$0xff] %v5928_v1  ;;  %v8793_v5 = vsub.s32 0, %v5928_v1  ;;  %v8791_v6 = vsub.s32 1, %v5928_v1  ;;  %v8792_v7 = vsub.s32 2, %v5928_v1  ;;  %v8790_v8 = vsub.s32 3, %v5928_v1  ;;  %9051 = vst [vmem:[#allocation6_spill] sm:$0xff] %v5956_v11 }
   0x5   :  { %v5988_v19 = vld [vmem:[%s8783_s0 + $0x20] sm:$0xff]  ;;  %v5993_v20 = vld [vmem:[%s8783_s0 + $0x28] sm:$0xff]  ;;  %v30_v21 = vld [vmem:[%s8783_s0 + $0x30] sm:$0xff] }
   0x6   :  { %v5960_v12 = vrot.slane %v56_v2, %v8793_v5  ;;  %v5964_v13 = vrot.slane %v56_v2, %v8791_v6  ;;  %v5968_v14 = vrot.slane %v56_v2, %v8792_v7  ;;  %v5972_v15 = vrot.slane %v56_v2, %v8790_v8  ;;  %9054 = vst [vmem:[#allocation9_spill] sm:$0xff] %v5988_v19  ;;  %v31_v26 = vld [vmem:[%s8783_s0 + $0x38] sm:$0xff]  ;;  %v6010_v27 = vld [vmem:[%s8783_s0 + $0x60] sm:$0xff]  ;;  %v6015_v28 = vld [vmem:[%s8783_s0 + $0x68] sm:$0xff] }
   0x7   :  { %9055 = vst [vmem:[#allocation10_spill] sm:$0xff] %v5993_v20  ;;  %9056 = vst [vmem:[#allocation11_spill] sm:$0xff] %v6010_v27  ;;  %v38_v33 = vld [vmem:[%s8783_s0 + $0x70] sm:$0xff]  ;;  %v39_v34 = vld [vmem:[%s8783_s0 + $0x78] sm:$0xff] }
   0x8   :  { %9052 = vst [vmem:[#allocation7_spill] sm:$0xff] %v5968_v14  ;;  %9053 = vst [vmem:[#allocation8_spill] sm:$0xff] %v5972_v15  ;;  %v78_v22 = vmul.f32 %v5960_v12, %v5936_v3  ;;  %v79_v23 = vmul.f32 %v5964_v13, %v5941_v4  ;;  %v80_v24 = vmul.f32 %v5968_v14, %v26_v9  ;;  %v6037_v39 = vld [vmem:[%s8783_s0 + $0x80] sm:$0xff]  ;;  %v6042_v40 = vld [vmem:[%s8783_s0 + $0x88] sm:$0xff] }
   0x9   :  { %v81_v25 = vmul.f32 %v5972_v15, %v27_v10  ;;  %9057 = vst [vmem:[#allocation12_spill] sm:$0xff] %v6015_v28  ;;  %v86_v29 = vmul.f32 %v5960_v12, %v5956_v11  ;;  %v87_v30 = vmul.f32 %v5964_v13, %v5977_v16  ;;  %v88_v31 = vmul.f32 %v5968_v14, %v34_v17  ;;  %v42_v45 = vld [vmem:[%s8783_s0 + $0x90] sm:$0xff]  ;;  %v43_v46 = vld [vmem:[%s8783_s0 + $0x98] sm:$0xff]  ;;  %v6060_v51 = vld [vmem:[%s8783_s0 + $0xa0] sm:$0xff] }
   0xa   :  { %v89_v32 = vmul.f32 %v5972_v15, %v35_v18  ;;  %v110_v35 = vadd.f32 %v79_v23, %v78_v22  ;;  %v82_v36 = vmul.f32 %v5960_v12, %v5988_v19  ;;  %v83_v37 = vmul.f32 %v5964_v13, %v5993_v20  ;;  %9058 = vst [vmem:[#allocation13_spill] sm:$0xff] %v6037_v39  ;;  %v6069_v56 = vld [vmem:[%s8783_s0 + $0xa8] sm:$0xff]  ;;  %v46_v57 = vld [vmem:[%s8783_s0 + $0xb0] sm:$0xff]  ;;  %v47_v58 = vld [vmem:[%s8783_s0 + $0xb8] sm:$0xff] }
   0xb   :  { %v84_v38 = vmul.f32 %v5968_v14, %v30_v21  ;;  %9059 = vst [vmem:[#allocation14_spill] sm:$0xff] %v6042_v40  ;;  %v120_v41 = vadd.f32 %v87_v30, %v86_v29  ;;  %v85_v42 = vmul.f32 %v5972_v15, %v31_v26  ;;  %v90_v43 = vmul.f32 %v5960_v12, %v6010_v27  ;;  %v6082_v63 = vld [vmem:[%s8783_s0 + $0xc0] sm:$0xff]  ;;  %v6087_v0 = vld [vmem:[%s8783_s0 + $0xc8] sm:$0xff]  ;;  %v50_v18 = vld [vmem:[%s8783_s0 + $0xd0] sm:$0xff] }
   0xc   :  { %v91_v44 = vmul.f32 %v5964_v13, %v6015_v28  ;;  %v111_v47 = vadd.f32 %v110_v35, %v80_v24  ;;  %v115_v48 = vadd.f32 %v83_v37, %v82_v36  ;;  %v92_v49 = vmul.f32 %v5968_v14, %v38_v33  ;;  %9060 = vst [vmem:[#allocation15_spill] sm:$0xff] %v6060_v51  ;;  %v51_v21 = vld [vmem:[%s8783_s0 + $0xd8] sm:$0xff]  ;;  %v6100_v22 = vld [vmem:[%s8783_s0 + $0xe0] sm:$0xff]  ;;  %v6109_v29 = vld [vmem:[%s8783_s0 + $0xe8] sm:$0xff] }
   0xd   :  { %v93_v50 = vmul.f32 %v5972_v15, %v39_v34  ;;  %v121_v52 = vadd.f32 %v120_v41, %v88_v31  ;;  %v94_v54 = vmul.f32 %v5960_v12, %v6037_v39  ;;  %v95_v55 = vmul.f32 %v5964_v13, %v6042_v40  ;;  %9061 = vst [vmem:[#allocation16_spill] sm:$0xff] %v6069_v56  ;;  %v54_v30 = vld [vmem:[%s8783_s0 + $0xf0] sm:$0xff]  ;;  %v55_v35 = vld [vmem:[%s8783_s0 + $0xf8] sm:$0xff]  ;;  %v6124_v36 = vld [vmem:[%s8784_s1 + $0x80] sm:$0xff] }
   0xe   :  { %v125_v53 = vadd.f32 %v91_v44, %v90_v43  ;;  %v112_v59 = vadd.f32 %v111_v47, %v81_v25  ;;  %v116_v60 = vadd.f32 %v115_v48, %v84_v38  ;;  %v96_v61 = vmul.f32 %v5968_v14, %v42_v45  ;;  %9062 = vst [vmem:[#allocation17_spill] sm:$0xff] %v6082_v63  ;;  %v6129_v37 = vld [vmem:[%s8784_s1 + $0x88] sm:$0xff]  ;;  %v6138_v44 = vld [vmem:[%s8784_s1] sm:$0xff] }
   0xf   :  { %v97_v62 = vmul.f32 %v5972_v15, %v43_v46  ;;  %9063 = vst [vmem:[#allocation18_spill] sm:$0xff] %v6087_v0  ;;  %v122_v2 = vadd.f32 %v121_v52, %v89_v32  ;;  %v130_v10 = vadd.f32 %v95_v55, %v94_v54  ;;  %v98_v17 = vmul.f32 %v5960_v12, %v6060_v51  ;;  %v6143_v45 = vld [vmem:[%s8784_s1 + $0x8] sm:$0xff] }
  0x10   :  { %v126_v9 = vadd.f32 %v125_v53, %v92_v49  ;;  %9064 = vst [vmem:[#allocation19_spill] sm:$0xff] %v6100_v22  ;;  %113 = vadd.xlane.f32.xlu0 %v112_v59  ;;  %v117_v23 = vadd.f32 %v116_v60, %v85_v42  ;;  %v99_v24 = vmul.f32 %v5964_v13, %v6069_v56  ;;  %9065 = vst [vmem:[#allocation20_spill] sm:$0xff] %v6109_v29 }
  0x11   :  { %v100_v25 = vmul.f32 %v5968_v14, %v46_v57  ;;  %v101_v26 = vmul.f32 %v5972_v15, %v47_v58  ;;  %123 = vadd.xlane.f32.xlu1 %v122_v2  ;;  %v131_v32 = vadd.f32 %v130_v10, %v96_v61  ;;  %v102_v33 = vmul.f32 %v5960_v12, %v6082_v63 }
  0x12   :  { %v127_v31 = vadd.f32 %v126_v9, %v93_v50  ;;  %v103_v34 = vmul.f32 %v5964_v13, %v6087_v0  ;;  %v135_v38 = vadd.f32 %v99_v24, %v98_v17  ;;  %v104_v41 = vmul.f32 %v5968_v14, %v50_v18  ;;  %v6151_v50 = vld [vmem:[%s8784_s1 + $0x90] sm:$0xff] }
  0x13   :  { %v105_v42 = vmul.f32 %v5972_v15, %v51_v21  ;;  %v106_v43 = vmul.f32 %v5960_v12, %v6100_v22  ;;  %v132_v46 = vadd.f32 %v131_v32, %v97_v62  ;;  %v107_v48 = vmul.f32 %v5964_v13, %v6109_v29 }
  0x14   :  { %v140_v47 = vadd.f32 %v103_v34, %v102_v33  ;;  %v108_v49 = vmul.f32 %v5968_v14, %v54_v30 }
  0x15   :  { %11 = vsyncpa [#allocation3], 0  ;;  %118 = vadd.xlane.f32.xlu0 %v117_v23  ;;  %v136_v52 = vadd.f32 %v135_v38, %v100_v25  ;;  %v109_v53 = vmul.f32 %v5972_v15, %v55_v35  ;;  %v367_v54 = vand.u32 4294901760, %v6124_v36  ;;  %v370_v55 = vand.u32 4294901760, %v6129_v37  ;;  %128 = vadd.xlane.f32.xlu1 %v127_v31  ;;  %v6161_v61 = vld [vmem:[%s8784_s1 + $0x98] sm:$0xff]  ;;  %v6173_v17 = vld [vmem:[%s8784_s1 + $0x10] sm:$0xff] }
  0x16   :  { %v141_v57 = vadd.f32 %v140_v47, %v104_v41  ;;  %v145_v58 = vadd.f32 %v107_v48, %v106_v43  ;;  %v319_v59 = vand.u32 4294901760, %v6138_v44  ;;  %v322_v60 = vand.u32 4294901760, %v6143_v45  ;;  %v257_v32 = vld [vmem:[%s8784_s1 + $0x18] sm:$0xff] }
  0x17   :  { %v137_v62 = vadd.f32 %v136_v52, %v101_v26  ;;  %v6164_v2 = vsub.f32 %v6124_v36, %v367_v54  ;;  %v6167_v9 = vsub.f32 %v6129_v37, %v370_v55  ;;  %v373_v10 = vand.u32 4294901760, %v6151_v50 }
  0x18   :  { %v142_v18 = vadd.f32 %v141_v57, %v105_v42  ;;  %v146_v21 = vadd.f32 %v145_v58, %v108_v49  ;;  %v6176_v23 = vsub.f32 %v6138_v44, %v319_v59  ;;  %v6179_v24 = vsub.f32 %v6143_v45, %v322_v60 }
  0x19   :  { %133 = vadd.xlane.f32.xlu0 %v132_v46  ;;  %v8804_v25 = vand.u32 4294901760, %v6164_v2  ;;  %v8802_v26 = vand.u32 4294901760, %v6167_v9  ;;  %v376_v30 = vand.u32 4294901760, %v6161_v61  ;;  %v6185_v31 = vsub.f32 %v6151_v50, %v373_v10  ;;  %138 = vadd.xlane.f32.xlu1 %v137_v62  ;;  %v6227_v62 = vld [vmem:[%s8784_s1 + $0xa8] sm:$0xff] }
  0x1a   :  { %v147_v33 = vadd.f32 %v146_v21, %v109_v53  ;;  %v8801_v34 = vand.u32 4294901760, %v6176_v23  ;;  %v8799_v35 = vand.u32 4294901760, %v6179_v24  ;;  %v325_v36 = vand.u32 4294901760, %v6173_v17 }
  0x1b   :  { %v651_v37 = vsub.f32 %v6164_v2, %v8804_v25  ;;  %v658_v38 = vsub.f32 %v6167_v9, %v8802_v26  ;;  %v8797_v41 = vand.u32 4294901760, %v6185_v31  ;;  %v6201_v42 = vsub.f32 %v6161_v61, %v376_v30  ;;  %v6222_v61 = vld [vmem:[%s8784_s1 + $0xa0] sm:$0xff] }
  0x1c   :  { %v539_v43 = vsub.f32 %v6176_v23, %v8801_v34  ;;  %v546_v44 = vsub.f32 %v6179_v24, %v8799_v35  ;;  %v328_v45 = vand.u32 4294901760, %v257_v32  ;;  %v6210_v46 = vsub.f32 %v6173_v17, %v325_v36  ;;  %v6232_v17 = vld [vmem:[%s8784_s1 + $0x20] sm:$0xff] }
  0x1d   :  { %143 = vadd.xlane.f32.xlu0 %v142_v18  ;;  %v652_v47 = vand.u32 4294901760, %v651_v37  ;;  %v659_v48 = vand.u32 4294901760, %v658_v38  ;;  %v665_v49 = vsub.f32 %v6185_v31, %v8797_v41  ;;  %v8796_v50 = vand.u32 4294901760, %v6201_v42  ;;  %148 = vadd.xlane.f32.xlu1 %v147_v33  ;;  %v6242_v37 = vld [vmem:[%s8784_s1 + $0x28] sm:$0xff] }
  0x1e   :  { %v540_v52 = vand.u32 4294901760, %v539_v43  ;;  %v547_v53 = vand.u32 4294901760, %v546_v44  ;;  %v8795_v57 = vand.u32 4294901760, %v6210_v46  ;;  %v6217_v58 = vsub.f32 %v257_v32, %v328_v45 }
  0x1f   :  { %v5317_v18 = vpack.c.bf16 %v659_v48, %v652_v47  ;;  %v666_v21 = vand.u32 4294901760, %v665_v49  ;;  %v672_v32 = vsub.f32 %v6201_v42, %v8796_v50  ;;  %v6237_v33 = vpack.c.bf16 %v370_v55, %v367_v54 }
  0x20   :  { %v5319_v38 = vpack.c.bf16 %v547_v53, %v540_v52  ;;  %v553_v43 = vsub.f32 %v6210_v46, %v8795_v57  ;;  %v8794_v44 = vand.u32 4294901760, %v6217_v58  ;;  %v6248_v47 = vpack.c.bf16 %v322_v60, %v319_v59  ;;  %v6257_v52 = vld [vmem:[%s8784_s1 + $0xb0] sm:$0xff] }
  0x21   :  { %5318 = vmatprep.subr.bf16.mxu1 %v5317_v18  ;;  %v673_v48 = vand.u32 4294901760, %v672_v32  ;;  %5286 = vmatprep.subr.bf16.mxu0 %v6237_v33  ;;  %v379_v54 = vand.u32 4294901760, %v6222_v61  ;;  %v382_v55 = vand.u32 4294901760, %v6227_v62  ;;  %v331_v49 = vand.u32 4294901760, %v6232_v17  ;;  %v6269_v32 = vld [vmem:[%s8784_s1 + $0xb8] sm:$0xff] }
  0x22   :  { %9066 = vst [vmem:[#allocation21_spill] sm:$0xff] %v6248_v47  ;;  %5320 = vmatpush3.bf16.msra.mxu1 %v5319_v38  ;;  %v554_v53 = vand.u32 4294901760, %v553_v43  ;;  %v560_v59 = vsub.f32 %v6217_v58, %v8794_v44  ;;  %5288 = vmatpush3.bf16.msra.mxu0 %v6248_v47  ;;  %v334_v60 = vand.u32 4294901760, %v6242_v37  ;;  %v6264_v18 = vpack.c.bf16 %v376_v30, %v373_v10  ;;  %v6283_v10 = vld [vmem:[%s8784_s1 + $0x30] sm:$0xff] }
  0x23   :  { %v5321_v8 = vpack.c.bf16 %v673_v48, %v666_v21  ;;  %v6272_v6 = vsub.f32 %v6222_v61, %v379_v54  ;;  %v6275_v38 = vsub.f32 %v6227_v62, %v382_v55  ;;  %v6278_v43 = vsub.f32 %v6232_v17, %v331_v49 }
  0x24   :  { %9067 = vst [vmem:[#allocation22_spill] sm:$0xff] %v6264_v18  ;;  %v561_v30 = vand.u32 4294901760, %v560_v59  ;;  %v6286_v7 = vsub.f32 %v6242_v37, %v334_v60  ;;  %5290 = vmatprep.subr.bf16.mxu0 %v6264_v18  ;;  %v6289_v21 = vpack.c.bf16 %v328_v45, %v325_v36  ;;  %v385_v61 = vand.u32 4294901760, %v6257_v52  ;;  %v261_v37 = vld [vmem:[%s8784_s1 + $0x38] sm:$0xff] }
  0x25   :  { %5322 = vmatprep.subr.bf16.mxu1 %v5321_v8  ;;  %v8798_v62 = vand.u32 4294901760, %v6272_v6  ;;  %v8800_v17 = vand.u32 4294901760, %v6275_v38  ;;  %v8803_v48 = vand.u32 4294901760, %v6278_v43  ;;  %v388_v5 = vand.u32 4294901760, %v6269_v32 }
  0x26   :  { %9068 = vst [vmem:[#allocation23_spill] sm:$0xff] %v6289_v21  ;;  %v5323_v59 = vpack.c.bf16 %v561_v30, %v554_v53  ;;  %v8805_v44 = vand.u32 4294901760, %v6286_v7  ;;  %5292 = vmatpush3.bf16.msra.mxu0 %v6289_v21  ;;  %v6302_v36 = vsub.f32 %v6257_v52, %v385_v61  ;;  %v337_v8 = vand.u32 4294901760, %v6283_v10 }
  0x27   :  { %v679_v45 = vsub.f32 %v6272_v6, %v8798_v62  ;;  %v686_v57 = vsub.f32 %v6275_v38, %v8800_v17  ;;  %v567_v53 = vsub.f32 %v6278_v43, %v8803_v48  ;;  %v6315_v30 = vsub.f32 %v6269_v32, %v388_v5 }
  0x28   :  { %5324 = vmatpush3.bf16.msra.mxu1 %v5323_v59  ;;  %v574_v52 = vsub.f32 %v6286_v7, %v8805_v44  ;;  %v8806_v50 = vand.u32 4294901760, %v6302_v36  ;;  %v340_v41 = vand.u32 4294901760, %v261_v37  ;;  %v6322_v62 = vsub.f32 %v6283_v10, %v337_v8  ;;  %v6334_v44 = vld [vmem:[%s8784_s1 + $0xc0] sm:$0xff] }
  0x29   :  { %v680_v35 = vand.u32 4294901760, %v679_v45  ;;  %v687_v17 = vand.u32 4294901760, %v686_v57  ;;  %v568_v34 = vand.u32 4294901760, %v567_v53  ;;  %v8813_v26 = vand.u32 4294901760, %v6315_v30  ;;  %v6339_v57 = vld [vmem:[%s8784_s1 + $0xc8] sm:$0xff]  ;;  %v6344_v10 = vld [vmem:[%s8784_s1 + $0x40] sm:$0xff] }
  0x2a   :  { %v575_v48 = vand.u32 4294901760, %v574_v52  ;;  %v693_v32 = vsub.f32 %v6302_v36, %v8806_v50  ;;  %v6329_v25 = vsub.f32 %v261_v37, %v340_v41  ;;  %v6349_v53 = vpack.c.bf16 %v382_v55, %v379_v54  ;;  %v6356_v50 = vld [vmem:[%s8784_s1 + $0x48] sm:$0xff] }
  0x2b   :  { %v5325_v45 = vpack.c.bf16 %v687_v17, %v680_v35  ;;  %v700_v37 = vsub.f32 %v6315_v30, %v8813_v26  ;;  %v6351_v52 = vpack.c.bf16 %v334_v60, %v331_v49  ;;  %v9071_v14 = vand.u32 4294901760, %v6322_v62 }
  0x2c   :  { %9069 = vst [vmem:[#allocation24_spill] sm:$0xff] %v6349_v53  ;;  %v5327_v59 = vpack.c.bf16 %v575_v48, %v568_v34  ;;  %v694_v1 = vand.u32 4294901760, %v693_v32  ;;  %v8814_v35 = vand.u32 4294901760, %v6329_v25  ;;  %5294 = vmatprep.subr.bf16.mxu0 %v6349_v53  ;;  %v391_v54 = vand.u32 4294901760, %v6334_v44  ;;  %v6369_v34 = vld [vmem:[%s8784_s1 + $0xd0] sm:$0xff] }
  0x2d   :  { %9070 = vst [vmem:[#allocation25_spill] sm:$0xff] %v6351_v52  ;;  %v581_v15 = vsub.f32 %v6322_v62, %v9071_v14  ;;  %5326 = vmatprep.subr.bf16.mxu1 %v5325_v45  ;;  %v701_v17 = vand.u32 4294901760, %v700_v37  ;;  %v394_v55 = vand.u32 4294901760, %v6339_v57  ;;  %v343_v49 = vand.u32 4294901760, %v6344_v10  ;;  %5296 = vmatpush3.bf16.msra.mxu0 %v6351_v52  ;;  %v6381_v45 = vld [vmem:[%s8784_s1 + $0xd8] sm:$0xff] }
  0x2e   :  { %5328 = vmatpush3.bf16.msra.mxu1 %v5327_v59  ;;  %v588_v14 = vsub.f32 %v6329_v25, %v8814_v35  ;;  %v346_v48 = vand.u32 4294901760, %v6356_v50  ;;  %v6376_v32 = vpack.c.bf16 %v388_v5, %v385_v61  ;;  %v6384_v26 = vsub.f32 %v6334_v44, %v391_v54  ;;  %v6395_v5 = vld [vmem:[%s8784_s1 + $0x50] sm:$0xff] }
  0x2f   :  { %v582_v60 = vand.u32 4294901760, %v581_v15  ;;  %v5329_v37 = vpack.c.bf16 %v701_v17, %v694_v1  ;;  %v6387_v15 = vsub.f32 %v6339_v57, %v394_v55  ;;  %v6390_v59 = vsub.f32 %v6344_v10, %v343_v49 }
  0x30   :  { %9072 = vst [vmem:[#allocation26_spill] sm:$0xff] %v6376_v32  ;;  %v589_v61 = vand.u32 4294901760, %v588_v14  ;;  %v6398_v35 = vsub.f32 %v6356_v50, %v346_v48  ;;  %5298 = vmatprep.subr.bf16.mxu0 %v6376_v32  ;;  %v6401_v1 = vpack.c.bf16 %v340_v41, %v337_v8  ;;  %v397_v44 = vand.u32 4294901760, %v6369_v34  ;;  %v265_v50 = vld [vmem:[%s8784_s1 + $0x58] sm:$0xff] }
  0x31   :  { %5330 = vmatprep.subr.bf16.mxu1 %v5329_v37  ;;  %v8822_v57 = vand.u32 4294901760, %v6384_v26  ;;  %v8825_v10 = vand.u32 4294901760, %v6387_v15  ;;  %v400_v29 = vand.u32 4294901760, %v6381_v45  ;;  %v349_v8 = vand.u32 4294901760, %v6395_v5 }
  0x32   :  { %9073 = vst [vmem:[#allocation27_spill] sm:$0xff] %v6401_v1  ;;  %v5331_v14 = vpack.c.bf16 %v589_v61, %v582_v60  ;;  %v8829_v32 = vand.u32 4294901760, %v6398_v35  ;;  %5300 = vmatpush3.bf16.msra.mxu0 %v6401_v1  ;;  %v6414_v41 = vsub.f32 %v6369_v34, %v397_v44  ;;  %v9074_v22 = vand.u32 4294901760, %v6390_v59 }
  0x33   :  { %v707_v37 = vsub.f32 %v6384_v26, %v8822_v57  ;;  %v714_v17 = vsub.f32 %v6387_v15, %v8825_v10  ;;  %v6427_v61 = vsub.f32 %v6381_v45, %v400_v29  ;;  %v352_v0 = vand.u32 4294901760, %v265_v50 }
  0x34   :  { %v595_v60 = vsub.f32 %v6390_v59, %v9074_v22  ;;  %5332 = vmatpush3.bf16.msra.mxu1 %v5331_v14  ;;  %v602_v34 = vsub.f32 %v6398_v35, %v8829_v32  ;;  %v8830_v1 = vand.u32 4294901760, %v6414_v41  ;;  %v6434_v57 = vsub.f32 %v6395_v5, %v349_v8  ;;  %v6446_v32 = vld [vmem:[%s8784_s1 + $0xe0] sm:$0xff]  ;;  %v6451_v5 = vld [vmem:[%s8784_s1 + $0xe8] sm:$0xff] }
  0x35   :  { %v708_v52 = vand.u32 4294901760, %v707_v37  ;;  %v715_v10 = vand.u32 4294901760, %v714_v17  ;;  %v8835_v56 = vand.u32 4294901760, %v6427_v61  ;;  %v6441_v51 = vsub.f32 %v265_v50, %v352_v0  ;;  %v6456_v17 = vld [vmem:[%s8784_s1 + $0x60] sm:$0xff] }
  0x36   :  { %v596_v63 = vand.u32 4294901760, %v595_v60  ;;  %v603_v22 = vand.u32 4294901760, %v602_v34  ;;  %v721_v45 = vsub.f32 %v6414_v41, %v8830_v1  ;;  %v6461_v60 = vpack.c.bf16 %v394_v55, %v391_v54  ;;  %v267_v1 = vld [vmem:[%s8784_s1 + $0x68] sm:$0xff] }
  0x37   :  { %v5333_v37 = vpack.c.bf16 %v715_v10, %v708_v52  ;;  %v728_v50 = vsub.f32 %v6427_v61, %v8835_v56  ;;  %v6463_v34 = vpack.c.bf16 %v346_v48, %v343_v49  ;;  %v9077_v53 = vand.u32 4294901760, %v6434_v57 }
  0x38   :  { %9075 = vst [vmem:[#allocation28_spill] sm:$0xff] %v6461_v60  ;;  %v5335_v14 = vpack.c.bf16 %v603_v22, %v596_v63  ;;  %v722_v40 = vand.u32 4294901760, %v721_v45  ;;  %v8836_v52 = vand.u32 4294901760, %v6441_v51  ;;  %5302 = vmatprep.subr.bf16.mxu0 %v6461_v60  ;;  %v403_v54 = vand.u32 4294901760, %v6446_v32  ;;  %v284_v63 = vld [vmem:[%s8784_s1 + $0xf0] sm:$0xff]  ;;  %v269_v60 = vld [vmem:[%s8784_s1 + $0x78] sm:$0xff] }
  0x39   :  { %9076 = vst [vmem:[#allocation29_spill] sm:$0xff] %v6463_v34  ;;  %v609_v39 = vsub.f32 %v6434_v57, %v9077_v53  ;;  %5334 = vmatprep.subr.bf16.mxu1 %v5333_v37  ;;  %v729_v10 = vand.u32 4294901760, %v728_v50  ;;  %v406_v55 = vand.u32 4294901760, %v6451_v5  ;;  %v355_v49 = vand.u32 4294901760, %v6456_v17  ;;  %5304 = vmatpush3.bf16.msra.mxu0 %v6463_v34  ;;  %v285_v37 = vld [vmem:[%s8784_s1 + $0xf8] sm:$0xff] }
  0x3a   :  { %5336 = vmatpush3.bf16.msra.mxu1 %v5335_v14  ;;  %v616_v53 = vsub.f32 %v6441_v51, %v8836_v52  ;;  %v358_v22 = vand.u32 4294901760, %v267_v1  ;;  %v6483_v45 = vpack.c.bf16 %v400_v29, %v397_v44  ;;  %v6489_v56 = vsub.f32 %v6446_v32, %v403_v54  ;;  %v268_v52 = vld [vmem:[%s8784_s1 + $0x70] sm:$0xff] }
  0x3b   :  { %v610_v48 = vand.u32 4294901760, %v609_v39  ;;  %v5337_v50 = vpack.c.bf16 %v729_v10, %v722_v40  ;;  %v6492_v14 = vsub.f32 %v6451_v5, %v406_v55  ;;  %v6495_v39 = vsub.f32 %v6456_v17, %v355_v49 }
  0x3c   :  { %9078 = vst [vmem:[#allocation30_spill] sm:$0xff] %v6483_v45  ;;  %v617_v29 = vand.u32 4294901760, %v616_v53  ;;  %v6500_v44 = vsub.f32 %v267_v1, %v358_v22  ;;  %5306 = vmatprep.subr.bf16.mxu0 %v6483_v45  ;;  %v6503_v34 = vpack.c.bf16 %v352_v0, %v349_v8  ;;  %v409_v40 = vand.u32 4294901760, %v284_v63 }
  0x3d   :  { %9079 = vst [vmem:[#allocation31_spill] sm:$0xff] %v6495_v39  ;;  %5338 = vmatprep.subr.bf16.mxu1 %v5337_v50  ;;  %v8848_v32 = vand.u32 4294901760, %v6489_v56  ;;  %v8853_v5 = vand.u32 4294901760, %v6492_v14  ;;  %v412_v10 = vand.u32 4294901760, %v285_v37  ;;  %v361_v8 = vand.u32 4294901760, %v268_v52 }
  0x3e   :  { %9080 = vst [vmem:[#allocation32_spill] sm:$0xff] %v6500_v44  ;;  %9081 = vst [vmem:[#allocation33_spill] sm:$0xff] %v6503_v34  ;;  %v5339_v53 = vpack.c.bf16 %v617_v29, %v610_v48  ;;  %v8855_v1 = vand.u32 4294901760, %v6500_v44  ;;  %5308 = vmatpush3.bf16.msra.mxu0 %v6503_v34  ;;  %v6513_v0 = vsub.f32 %v284_v63, %v409_v40  ;;  %v9083_v45 = vand.u32 4294901760, %v6495_v39 }
  0x3f   :  { %v735_v50 = vsub.f32 %v6489_v56, %v8848_v32  ;;  %v742_v17 = vsub.f32 %v6492_v14, %v8853_v5  ;;  %v6524_v48 = vsub.f32 %v285_v37, %v412_v10  ;;  %v364_v34 = vand.u32 4294901760, %v269_v60 }
  0x40   :  { %9082 = vst [vmem:[#allocation34_spill] sm:$0xff] %v6513_v0  ;;  %v623_v21 = vsub.f32 %v6495_v39, %v9083_v45  ;;  %5340 = vmatpush3.bf16.msra.mxu1 %v5339_v53  ;;  %v630_v63 = vsub.f32 %v6500_v44, %v8855_v1  ;;  %v8859_v29 = vand.u32 4294901760, %v6513_v0  ;;  %v6530_v27 = vsub.f32 %v268_v52, %v361_v8 }
  0x41   :  { %9084 = vst [vmem:[#allocation35_spill] sm:$0xff] %v6524_v48  ;;  %v736_v32 = vand.u32 4294901760, %v735_v50  ;;  %v743_v18 = vand.u32 4294901760, %v742_v17  ;;  %v755_v5 = vand.u32 4294901760, %v6524_v48  ;;  %v6537_v53 = vsub.f32 %v269_v60, %v364_v34 }
  0x42   :  { %9085 = vst [vmem:[#allocation36_spill] sm:$0xff] %v6530_v27  ;;  %v624_v47 = vand.u32 4294901760, %v623_v21  ;;  %v631_v28 = vand.u32 4294901760, %v630_v63  ;;  %v749_v45 = vsub.f32 %v6513_v0, %v8859_v29  ;;  %v636_v37 = vand.u32 4294901760, %v6530_v27 }
  0x43   :  { %9086 = vst [vmem:[#allocation37_spill] sm:$0xff] %v6537_v53  ;;  %v5341_v1 = vpack.c.bf16 %v743_v18, %v736_v32  ;;  %v756_v11 = vsub.f32 %v6524_v48, %v755_v5  ;;  %v6540_v20 = vpack.c.bf16 %v406_v55, %v403_v54  ;;  %v6542_v52 = vpack.c.bf16 %v358_v22, %v355_v49  ;;  %v9166_v48 = vld [vmem:[#allocation15_spill] sm:$0xff] }
  0x44   :  { %v5343_v17 = vpack.c.bf16 %v631_v28, %v624_v47  ;;  %v750_v21 = vand.u32 4294901760, %v749_v45  ;;  %v637_v50 = vsub.f32 %v6530_v27, %v636_v37  ;;  %v643_v63 = vand.u32 4294901760, %v6537_v53  ;;  %v9157_v27 = vld [vmem:[#allocation11_spill] sm:$0xff] }
  0x45   :  { %5342 = vmatprep.subr.bf16.mxu1 %v5341_v1  ;;  %v757_v19 = vand.u32 4294901760, %v756_v11  ;;  %5310 = vmatprep.subr.bf16.mxu0 %v6540_v20  ;;  %v6547_v29 = vpack.c.bf16 %v412_v10, %v409_v40  ;;  %v6549_v60 = vpack.c.bf16 %v364_v34, %v361_v8  ;;  %v5349_v18 = vpack.c.bf16 %v6167_v9, %v6164_v2 }
  0x46   :  { %5344 = vmatpush3.bf16.msra.mxu1 %v5343_v17  ;;  %v638_v54 = vand.u32 4294901760, %v637_v50  ;;  %v644_v28 = vsub.f32 %v6537_v53, %v643_v63  ;;  %5312 = vmatpush3.bf16.msra.mxu0 %v6542_v52  ;;  %v9091_v17 = vand.u32 4294901760, %v6179_v24  ;;  %v9093_v50 = vand.u32 4294901760, %v6185_v31 }
  0x47   :  { %v5345_v55 = vpack.c.bf16 %v757_v19, %v750_v21  ;;  %5314 = vmatprep.subr.bf16.mxu0 %v6547_v29  ;;  %v9094_v45 = vand.u32 4294901760, %v6201_v42  ;;  %vm2838_vm0 = vcmask 64512  }
  0x48   :  { %v645_v40 = vand.u32 4294901760, %v644_v28  ;;  %v9087_v28 = vand.u32 4294901760, %v6164_v2  ;;  %v9097_v2 = vand.u32 4294901760, %v6217_v58 }
  0x49   :  { %5346 = vmatprep.subr.bf16.mxu1 %v5345_v55  ;;  %v9088_v55 = vand.u32 4294901760, %v6167_v9  ;;  %v9099_v9 = vand.u32 4294901760, %v6272_v6 }
  0x4a   :  { %v5347_v1 = vpack.c.bf16 %v645_v40, %v638_v54  ;;  %5316 = vmatpush3.bf16.msra.mxu0 %v6549_v60  ;;  %v9096_v54 = vand.u32 4294901760, %v6210_v46 }
  0x4b   :  { %5350 = vmatprep.subr.bf16.mxu0 %v5349_v18  ;;  %v6592_v40 = vpack.c.bf16 %v9088_v55, %v9087_v28  ;;  %v6604_v18 = vpack.c.bf16 %v9094_v45, %v9093_v50  ;;  %v9100_v28 = vand.u32 4294901760, %v6275_v38  ;;  %v9105_v45 = vand.u32 4294901760, %v6302_v36 }
  0x4c   :  { %5348 = vmatpush3.bf16.msra.mxu1 %v5347_v1  ;;  %v9090_v1 = vand.u32 4294901760, %v6176_v23  ;;  %v6610_v8 = vpack.c.bf16 %v9097_v2, %v9096_v54  ;;  %v9106_v50 = vand.u32 4294901760, %v6315_v30  ;;  %v9108_v54 = vand.u32 4294901760, %v6322_v62 }
  0x4d   :  { %5382 = vmatprep.subr.bf16.mxu1 %v6237_v33  ;;  %9089 = vst [vmem:[#allocation38_spill] sm:$0xff] %v6592_v40  ;;  %9095 = vst [vmem:[#allocation40_spill] sm:$0xff] %v6604_v18  ;;  %v6616_v55 = vpack.c.bf16 %v9100_v28, %v9099_v9  ;;  %v9109_v2 = vand.u32 4294901760, %v6329_v25  ;;  %v9111_v9 = vand.u32 4294901760, %v6384_v26  ;;  %v9112_v28 = vand.u32 4294901760, %v6387_v15 }
  0x4e   :  { %v6598_v21 = vpack.c.bf16 %v9091_v17, %v9090_v1  ;;  %9098 = vst [vmem:[#allocation41_spill] sm:$0xff] %v6610_v8  ;;  %v9102_v17 = vand.u32 4294901760, %v6278_v43  ;;  %v9103_v1 = vand.u32 4294901760, %v6286_v7  ;;  %v6628_v10 = vpack.c.bf16 %v9106_v50, %v9105_v45 }
  0x4f   :  { %9101 = vst [vmem:[#allocation42_spill] sm:$0xff] %v6616_v55  ;;  %v6634_v32 = vpack.c.bf16 %v9109_v2, %v9108_v54  ;;  %v6640_v22 = vpack.c.bf16 %v9112_v28, %v9111_v9  ;;  %v9117_v45 = vand.u32 4294901760, %v6414_v41  ;;  %v9118_v50 = vand.u32 4294901760, %v6427_v61  ;;  %v9153_v55 = vld [vmem:[#allocation22_spill] sm:$0xff] }
  0x50   :  { %9092 = vst [vmem:[#allocation39_spill] sm:$0xff] %v6598_v21  ;;  %v6622_v19 = vpack.c.bf16 %v9103_v1, %v9102_v17  ;;  %9107 = vst [vmem:[#allocation44_spill] sm:$0xff] %v6628_v10  ;;  %v9114_v17 = vand.u32 4294901760, %v6390_v59  ;;  %v9115_v1 = vand.u32 4294901760, %v6398_v35  ;;  %v9120_v54 = vand.u32 4294901760, %v6434_v57 }
  0x51   :  { %9110 = vst [vmem:[#allocation45_spill] sm:$0xff] %v6634_v32  ;;  %9113 = vst [vmem:[#allocation46_spill] sm:$0xff] %v6640_v22  ;;  %v6652_v34 = vpack.c.bf16 %v9118_v50, %v9117_v45  ;;  %v9121_v2 = vand.u32 4294901760, %v6441_v51  ;;  %v9123_v9 = vand.u32 4294901760, %v6489_v56  ;;  %v9124_v28 = vand.u32 4294901760, %v6492_v14 }
  0x52   :  { %9104 = vst [vmem:[#allocation43_spill] sm:$0xff] %v6622_v19  ;;  %v6646_v49 = vpack.c.bf16 %v9115_v1, %v9114_v17  ;;  %v9126_v17 = vand.u32 4294901760, %v6495_v39  ;;  %v9127_v1 = vand.u32 4294901760, %v6500_v44  ;;  %v9129_v45 = vand.u32 4294901760, %v6513_v0  ;;  %v9170_v39 = vld [vmem:[#allocation17_spill] sm:$0xff] }
  0x53   :  { %9119 = vst [vmem:[#allocation48_spill] sm:$0xff] %v6652_v34  ;;  %v6658_v11 = vpack.c.bf16 %v9121_v2, %v9120_v54  ;;  %v6664_v47 = vpack.c.bf16 %v9124_v28, %v9123_v9  ;;  %v6676_v34 = vpack.c.bf16 %v643_v63, %v636_v37 }
  0x54   :  { %9116 = vst [vmem:[#allocation47_spill] sm:$0xff] %v6646_v49  ;;  %v6670_v49 = vpack.c.bf16 %v9127_v1, %v9126_v17  ;;  %v6674_v50 = vpack.c.bf16 %v755_v5, %v9129_v45 }
  0x55   :  { %9122 = vst [vmem:[#allocation49_spill] sm:$0xff] %v6658_v11  ;;  %9125 = vst [vmem:[#allocation50_spill] sm:$0xff] %v6664_v47 }
  0x56   :  { %9128 = vst [vmem:[#allocation51_spill] sm:$0xff] %v6670_v49  ;;  %9130 = vst [vmem:[#allocation52_spill] sm:$0xff] %v6674_v50 }
  0x57   :  { %9131 = vst [vmem:[#allocation53_spill] sm:$0xff] %v6676_v34  ;;  %v9141_v34 = vld [vmem:[#allocation10_spill] sm:$0xff] }
  0x9d   :  { %v114_v54 = vpop.xlane.xlu0 %113 }
  0x9e   :  { %v6678_v2 = vmul.f32 0.03125, %v114_v54  ;;  %v124_v11 = vpop.xlane.xlu1 %123 }
  0x9f   :  { %v6680_v22 = vmul.f32 0.03125, %v124_v11 }
  0xa0   :  { %9132 = vst [vmem:[#allocation54_spill] sm:$0xff] %v6678_v2  ;;  %v158_v9 = vmul.f32 %v6678_v2, %v5960_v12  ;;  %v159_v28 = vmul.f32 %v6678_v2, %v5964_v13 }
  0xa1   :  { %9133 = vst [vmem:[#allocation55_spill] sm:$0xff] %v6680_v22  ;;  %v167_v63 = vmul.f32 %v6680_v22, %v5964_v13 }
  0xa2   :  { %v119_v17 = vpop.xlane.xlu0 %118  ;;  %v6687_v1 = vsub.f32 %v5936_v3, %v158_v9  ;;  %v6690_v5 = vsub.f32 %v5941_v4, %v159_v28  ;;  %v129_v37 = vpop.xlane.xlu1 %128  ;;  %v166_v9 = vmul.f32 %v6680_v22, %v5960_v12 }
  0xa3   :  { %v6694_v45 = vmul.f32 0.03125, %v119_v17  ;;  %v6696_v11 = vmul.f32 0.03125, %v129_v37  ;;  %v6709_v28 = vsub.f32 %v5977_v16, %v167_v63  ;;  %v9139_v17 = vld [vmem:[#allocation9_spill] sm:$0xff]  ;;  %v9145_v16 = vld [vmem:[#allocation6_spill] sm:$0xff] }
  0xa4   :  { %9134 = vst [vmem:[#allocation56_spill] sm:$0xff] %v6687_v1  ;;  %9135 = vst [vmem:[#allocation57_spill] sm:$0xff] %v6690_v5  ;;  %v223_v3 = vmul.f32 %v6690_v5, %v6690_v5  ;;  %v222_v4 = vmul.f32 %v6687_v1, %v6687_v1  ;;  %v6726_v63 = vsub.f32 %v9145_v16, %v166_v9  ;;  %v9151_v16 = vld [vmem:[#allocation21_spill] sm:$0xff] }
  0xa5   :  { %9136 = vst [vmem:[#allocation58_spill] sm:$0xff] %v6694_v45  ;;  %9137 = vst [vmem:[#allocation59_spill] sm:$0xff] %v6696_v11  ;;  %v162_v54 = vmul.f32 %v6694_v45, %v5960_v12  ;;  %v163_v2 = vmul.f32 %v6694_v45, %v5964_v13  ;;  %v171_v45 = vmul.f32 %v6696_v11, %v5964_v13 }
  0xa6   :  { %9138 = vst [vmem:[#allocation60_spill] sm:$0xff] %v6709_v28  ;;  %v134_v49 = vpop.xlane.xlu0 %133  ;;  %v6719_v5 = vand.u32 4294901760, %v223_v3  ;;  %v6721_v47 = vand.u32 4294901760, %v222_v4  ;;  %v139_v22 = vpop.xlane.xlu1 %138  ;;  %9146 = vst [vmem:[#allocation6_spill] sm:$0xff] %v6726_v63 }
  0xa7   :  { %v6712_v37 = vsub.f32 %v9139_v17, %v162_v54  ;;  %v6715_v50 = vsub.f32 %v9141_v34, %v163_v2  ;;  %v6728_v54 = vmul.f32 0.03125, %v134_v49  ;;  %v6732_v34 = vmul.f32 %v6709_v28, %v6709_v28  ;;  %v9148_v17 = vld [vmem:[#allocation12_spill] sm:$0xff] }
  0xa8   :  { %9143 = vst [vmem:[#allocation61_spill] sm:$0xff] %v6719_v5  ;;  %9144 = vst [vmem:[#allocation62_spill] sm:$0xff] %v6721_v47  ;;  %760 = vmatprep.mubr.f32.mxu1 %v6719_v5  ;;  %v6738_v32 = vsub.f32 %v9148_v17, %v171_v45  ;;  %v170_v49 = vmul.f32 %v6696_v11, %v5960_v12  ;;  %v6746_v28 = vmul.f32 0.03125, %v139_v22 }
  0xa9   :  { %9140 = vst [vmem:[#allocation9_spill] sm:$0xff] %v6712_v37  ;;  %9142 = vst [vmem:[#allocation10_spill] sm:$0xff] %v6715_v50  ;;  %v227_v1 = vmul.f32 %v6715_v50, %v6715_v50  ;;  %v226_v2 = vmul.f32 %v6712_v37, %v6712_v37  ;;  %762 = vmatmul.mubr.f32.vlgmr.msra.gmra.mrb[0].mxu1 %v6721_v47  ;;  %v174_v19 = vmul.f32 %v6728_v54, %v5960_v12 }
  0xaa   :  { %9147 = vst [vmem:[#allocation63_spill] sm:$0xff] %v6728_v54  ;;  %9149 = vst [vmem:[#allocation12_spill] sm:$0xff] %v6738_v32  ;;  %v144_v9 = vpop.xlane.xlu0 %143  ;;  %5384 = vmatpush3.bf16.msra.mxu1 %v9151_v16  ;;  %v149_v10 = vpop.xlane.xlu1 %148  ;;  %v6752_v45 = vand.u32 4294901760, %v6732_v34  ;;  %v230_v17 = vmul.f32 %v6726_v63, %v6726_v63  ;;  %v6760_v11 = vsub.f32 %v223_v3, %v6719_v5  ;;  %v9163_v5 = vld [vmem:[#allocation24_spill] sm:$0xff] }
  0xab   :  { %v6741_v50 = vand.u32 4294901760, %v227_v1  ;;  %9152 = vst [vmem:[#allocation65_spill] sm:$0xff] %v6746_v28  ;;  %v6756_v37 = vand.u32 4294901760, %v226_v2  ;;  %5386 = vmatprep.subr.bf16.mxu1 %v9153_v55  ;;  %v6763_v22 = vsub.f32 %v222_v4, %v6721_v47  ;;  %v6765_v8 = vmul.f32 0.03125, %v144_v9  ;;  %v9164_v55 = vld [vmem:[#allocation14_spill] sm:$0xff] }
  0xac   :  { %v175_v18 = vmul.f32 %v6728_v54, %v5964_v13  ;;  %v235_v63 = vmul.f32 %v6738_v32, %v6738_v32  ;;  %v6774_v40 = vmul.f32 0.03125, %v149_v10  ;;  %v6777_v53 = vsub.f32 %v9157_v27, %v170_v49  ;;  %v9159_v54 = vld [vmem:[#allocation23_spill] sm:$0xff]  ;;  %v9160_v32 = vld [vmem:[#allocation13_spill] sm:$0xff] }
  0xad   :  { %9150 = vst [vmem:[#allocation64_spill] sm:$0xff] %v6741_v50  ;;  %767 = vmatprep.mubr.f32.mxu1 %v6741_v50  ;;  %9154 = vst [vmem:[#allocation66_spill] sm:$0xff] %v6765_v8  ;;  %v6770_v21 = vsub.f32 %v227_v1, %v6741_v50  ;;  %v178_v3 = vmul.f32 %v6746_v28, %v5960_v12  ;;  %v8888_v4 = vand.u32 4294901760, %v6760_v11  ;;  %v6788_v10 = vand.u32 4294901760, %v230_v17 }
  0xae   :  { %9156 = vst [vmem:[#allocation68_spill] sm:$0xff] %v6774_v40  ;;  %9158 = vst [vmem:[#allocation11_spill] sm:$0xff] %v6777_v53  ;;  %769 = vmatmul.mubr.f32.gmra.mrb[2].mxu1 %v6756_v37  ;;  %v179_v1 = vmul.f32 %v6746_v28, %v5964_v13  ;;  %v182_v27 = vmul.f32 %v6765_v8, %v5960_v12  ;;  %v6794_v50 = vsub.f32 %v9160_v32, %v174_v19 }
  0xaf   :  { %9155 = vst [vmem:[#allocation67_spill] sm:$0xff] %v6770_v21  ;;  %5388 = vmatpush3.bf16.msra.mxu1 %v9159_v54  ;;  %774 = vmatprep.mubr.f32.mxu1 %v6752_v45  ;;  %v8893_v49 = vand.u32 4294901760, %v6770_v21  ;;  %v417_v9 = vsub.f32 %v6760_v11, %v8888_v4  ;;  %v9162_v28 = vand.u32 4294901760, %v6763_v22  ;;  %v183_v54 = vmul.f32 %v6765_v8, %v5964_v13 }
  0xb0   :  { %9161 = vst [vmem:[#allocation13_spill] sm:$0xff] %v6794_v50  ;;  %5390 = vmatprep.subr.bf16.mxu1 %v9163_v5  ;;  %v6806_v0 = vsub.f32 %v9164_v55, %v175_v18  ;;  %v6811_v19 = vand.u32 4294901760, %v235_v63  ;;  %v186_v4 = vmul.f32 %v6774_v40, %v5960_v12  ;;  %v6816_v16 = vsub.f32 %v9166_v48, %v178_v3  ;;  %v9168_v55 = vld [vmem:[#allocation16_spill] sm:$0xff]  ;;  %v9173_v48 = vld [vmem:[#allocation18_spill] sm:$0xff]  ;;  %v9175_v3 = vld [vmem:[#allocation19_spill] sm:$0xff] }
  0xb1   :  { %v423_v47 = vsub.f32 %v6763_v22, %v9162_v28  ;;  %v432_v32 = vsub.f32 %v6770_v21, %v8893_v49  ;;  %v418_v28 = vand.u32 4294901760, %v417_v9  ;;  %v187_v18 = vmul.f32 %v6774_v40, %v5964_v13  ;;  %v9172_v21 = vld [vmem:[#allocation25_spill] sm:$0xff] }
  0xb2   :  { %9165 = vst [vmem:[#allocation14_spill] sm:$0xff] %v6806_v0  ;;  %9167 = vst [vmem:[#allocation15_spill] sm:$0xff] %v6816_v16  ;;  %776 = vmatmul.mubr.f32.gmra.mrb[4].mxu1 %v6788_v10  ;;  %v6822_v8 = vsub.f32 %v9168_v55, %v179_v1  ;;  %v6825_v49 = vsub.f32 %v9170_v39, %v182_v27  ;;  %v6830_v12 = vsub.f32 %v226_v2, %v6756_v37  ;;  %v9177_v39 = vld [vmem:[#allocation26_spill] sm:$0xff]  ;;  %v9178_v1 = vld [vmem:[#allocation20_spill] sm:$0xff] }
  0xb3   :  { %v424_v5 = vand.u32 4294901760, %v423_v47  ;;  %5392 = vmatpush3.bf16.msra.mxu1 %v9172_v21  ;;  %v433_v44 = vand.u32 4294901760, %v432_v32  ;;  %781 = vmatprep.mubr.f32.mxu1 %v6811_v19  ;;  %v6833_v47 = vsub.f32 %v9173_v48, %v183_v54  ;;  %v6836_v13 = vsub.f32 %v9175_v3, %v186_v4 }
  0xb4   :  { %9169 = vst [vmem:[#allocation16_spill] sm:$0xff] %v6822_v8  ;;  %9171 = vst [vmem:[#allocation17_spill] sm:$0xff] %v6825_v49  ;;  %419 = vmatprep.mubr.f32.mxu0 %v418_v28  ;;  %v234_v9 = vmul.f32 %v6777_v53, %v6777_v53  ;;  %5394 = vmatprep.subr.bf16.mxu1 %v9177_v39  ;;  %v6842_v27 = vsub.f32 %v9178_v1, %v187_v18  ;;  %v8897_v32 = vand.u32 4294901760, %v6830_v12 }
  0xb5   :  { %9174 = vst [vmem:[#allocation25_spill] sm:$0xff] %v6833_v47  ;;  %9176 = vst [vmem:[#allocation18_spill] sm:$0xff] %v6836_v13  ;;  %425 = vmatmul.mubr.f32.vlgmr.msra.gmra.mrb[0].mxu0 %v424_v5  ;;  %v6847_v2 = vsub.f32 %v6732_v34, %v6752_v45  ;;  %v239_v54 = vmul.f32 %v6806_v0, %v6806_v0  ;;  %v9180_v4 = vpack.c.bf16 %v6179_v24, %v6176_v23 }
  0xb6   :  { %9179 = vst [vmem:[#allocation19_spill] sm:$0xff] %v6842_v27  ;;  %434 = vmatprep.mubr.f32.mxu0 %v433_v44  ;;  %v6854_v28 = vand.u32 4294901760, %v234_v9  ;;  %v6857_v5 = vsub.f32 %v230_v17, %v6788_v10  ;;  %v238_v18 = vmul.f32 %v6794_v50, %v6794_v50  ;;  %v6862_v55 = vsub.f32 %v235_v63, %v6811_v19  ;;  %v9182_v44 = vld [vmem:[#allocation27_spill] sm:$0xff] }
  0xb7   :  { %5352 = vmatpush3.bf16.msra.mxu0 %v9180_v4  ;;  %v9181_v34 = vpack.c.bf16 %v6201_v42, %v6185_v31  ;;  %v438_v23 = vsub.f32 %v6830_v12, %v8897_v32  ;;  %v8900_v24 = vand.u32 4294901760, %v6847_v2  ;;  %5396 = vmatpush3.bf16.msra.mxu1 %v9182_v44  ;;  %v6872_v17 = vand.u32 4294901760, %v239_v54  ;;  %v9185_v31 = vld [vmem:[#allocation28_spill] sm:$0xff] }
  0xb8   :  { %v243_v48 = vmul.f32 %v6822_v8, %v6822_v8  ;;  %783 = vmatmul.mubr.f32.gmra.mrb[6].mxu1 %v6854_v28  ;;  %v6878_v3 = vand.u32 4294901760, %v238_v18  ;;  %5398 = vmatprep.subr.bf16.mxu1 %v9185_v31  ;;  %v6883_v1 = vsub.f32 %v234_v9, %v6854_v28  ;;  %v242_v63 = vmul.f32 %v6816_v16, %v6816_v16 }
  0xb9   :  { %5354 = vmatprep.subr.bf16.mxu0 %v9181_v34  ;;  %9183 = vst [vmem:[#allocation26_spill] sm:$0xff] %v6872_v17  ;;  %v439_v4 = vand.u32 4294901760, %v438_v23  ;;  %v447_v34 = vsub.f32 %v6847_v2, %v8900_v24  ;;  %788 = vmatprep.mubr.f32.mxu1 %v6872_v17  ;;  %v9187_v8 = vpack.c.bf16 %v6217_v58, %v6210_v46  ;;  %v9188_v42 = vand.u32 4294901760, %v6857_v5 }
  0xba   :  { %9184 = vst [vmem:[#allocation20_spill] sm:$0xff] %v6878_v3  ;;  %v6889_v32 = vand.u32 4294901760, %v243_v48  ;;  %v9189_v23 = vand.u32 4294901760, %v6862_v55  ;;  %v8904_v24 = vand.u32 4294901760, %v6883_v1  ;;  %v6904_v50 = vsub.f32 %v239_v54, %v6872_v17 }
  0xbb   :  { %5356 = vmatpush3.bf16.msra.mxu0 %v9187_v8  ;;  %v453_v9 = vsub.f32 %v6857_v5, %v9188_v42  ;;  %v448_v53 = vand.u32 4294901760, %v447_v34  ;;  %v9190_v16 = vpack.c.bf16 %v6275_v38, %v6272_v6  ;;  %v6909_v46 = vand.u32 4294901760, %v242_v63  ;;  %v9192_v6 = vld [vmem:[#allocation29_spill] sm:$0xff] }
  0xbc   :  { %9186 = vst [vmem:[#allocation27_spill] sm:$0xff] %v6889_v32  ;;  %v462_v0 = vsub.f32 %v6862_v55, %v9189_v23  ;;  %440 = vmatmul.mubr.f32.gmra.mrb[2].mxu0 %v439_v4  ;;  %v247_v58 = vmul.f32 %v6833_v47, %v6833_v47  ;;  %v6914_v8 = vsub.f32 %v238_v18, %v6878_v3  ;;  %v8905_v4 = vand.u32 4294901760, %v6904_v50 }
  0xbd   :  { %5358 = vmatprep.subr.bf16.mxu0 %v9190_v16  ;;  %9191 = vst [vmem:[#allocation28_spill] sm:$0xff] %v6909_v46  ;;  %v454_v42 = vand.u32 4294901760, %v453_v9  ;;  %790 = vmatmul.mubr.f32.gmra.mrb[8].mxu1 %v6878_v3  ;;  %v468_v54 = vsub.f32 %v6883_v1, %v8904_v24  ;;  %v246_v18 = vmul.f32 %v6825_v49, %v6825_v49 }
  0xbe   :  { %449 = vmatprep.mubr.f32.mxu0 %v448_v53  ;;  %5400 = vmatpush3.bf16.msra.mxu1 %v9192_v6  ;;  %v6922_v38 = vand.u32 4294901760, %v247_v58  ;;  %v6928_v34 = vsub.f32 %v243_v48, %v6889_v32  ;;  %v9194_v9 = vpack.c.bf16 %v6286_v7, %v6278_v43  ;;  %v463_v23 = vand.u32 4294901760, %v462_v0 }
  0xbf   :  { %795 = vmatprep.mubr.f32.mxu1 %v6889_v32  ;;  %v477_v53 = vsub.f32 %v6904_v50, %v8905_v4  ;;  %v251_v24 = vmul.f32 %v6842_v27, %v6842_v27  ;;  %v6940_v16 = vsub.f32 %v242_v63, %v6909_v46  ;;  %v9195_v48 = vpack.c.bf16 %v6315_v30, %v6302_v36  ;;  %v9202_v27 = vld [vmem:[#allocation33_spill] sm:$0xff] }
  0xc0   :  { %9193 = vst [vmem:[#allocation29_spill] sm:$0xff] %v6922_v38  ;;  %5360 = vmatpush3.bf16.msra.mxu0 %v9194_v9  ;;  %v6945_v7 = vand.u32 4294901760, %v246_v18  ;;  %v250_v0 = vmul.f32 %v6836_v13, %v6836_v13  ;;  %v469_v9 = vand.u32 4294901760, %v468_v54  ;;  %v6954_v63 = vsub.f32 %v247_v58, %v6922_v38 }
  0xc1   :  { %455 = vmatmul.mubr.f32.gmra.mrb[4].mxu0 %v454_v42  ;;  %5362 = vmatprep.subr.bf16.mxu0 %v9195_v48  ;;  %v6951_v4 = vand.u32 4294901760, %v251_v24  ;;  %v9198_v42 = vld [vmem:[#allocation30_spill] sm:$0xff]  ;;  %v9199_v36 = vand.u32 4294901760, %v6914_v8  ;;  %v478_v58 = vand.u32 4294901760, %v477_v53  ;;  %v9203_v13 = vand.u32 4294901760, %v6928_v34 }
  0xc2   :  { %9196 = vst [vmem:[#allocation69_spill] sm:$0xff] %v6945_v7  ;;  %464 = vmatprep.mubr.f32.mxu0 %v463_v23  ;;  %797 = vmatmul.mubr.f32.gmra.mrb[10].mxu1 %v6909_v46  ;;  %v6962_v43 = vand.u32 4294901760, %v250_v0  ;;  %v6965_v54 = vsub.f32 %v246_v18, %v6945_v7  ;;  %v9201_v23 = vpack.c.bf16 %v6329_v25, %v6322_v62  ;;  %v9205_v62 = vand.u32 4294901760, %v6940_v16 }
  0xc3   :  { %9197 = vst [vmem:[#allocation70_spill] sm:$0xff] %v6951_v4  ;;  %5402 = vmatprep.subr.bf16.mxu1 %v9198_v42  ;;  %802 = vmatprep.mubr.f32.mxu1 %v6922_v38  ;;  %v483_v30 = vsub.f32 %v6914_v8, %v9199_v36  ;;  %v492_v47 = vsub.f32 %v6928_v34, %v9203_v13  ;;  %v8913_v36 = vand.u32 4294901760, %v6954_v63 }
  0xc4   :  { %9200 = vst [vmem:[#allocation30_spill] sm:$0xff] %v6962_v43  ;;  %5364 = vmatpush3.bf16.msra.mxu0 %v9201_v23  ;;  %5404 = vmatpush3.bf16.msra.mxu1 %v9202_v27  ;;  %v6976_v48 = vsub.f32 %v251_v24, %v6951_v4  ;;  %v9204_v18 = vpack.c.bf16 %v6387_v15, %v6384_v26  ;;  %v8910_v24 = vand.u32 4294901760, %v6965_v54  ;;  %v7002_v23 = vld [vmem:[%s8784_s1 + $0x180] sm:$0xff] }
  0xc5   :  { %470 = vmatmul.mubr.f32.gmra.mrb[6].mxu0 %v469_v9  ;;  %v484_v25 = vand.u32 4294901760, %v483_v30  ;;  %5406 = vmatprep.subr.bf16.mxu1 %v6540_v20  ;;  %v498_v13 = vsub.f32 %v6940_v16, %v9205_v62  ;;  %v6989_v53 = vsub.f32 %v250_v0, %v6962_v43  ;;  %v9206_v26 = vpack.c.bf16 %v6398_v35, %v6390_v59  ;;  %v7010_v35 = vld [vmem:[%s8784_s1 + $0x188] sm:$0xff]  ;;  %v7016_v59 = vld [vmem:[%s8784_s1 + $0x100] sm:$0xff] }
  0xc6   :  { %5366 = vmatprep.subr.bf16.mxu0 %v9204_v18  ;;  %479 = vmatprep.mubr.f32.mxu0 %v478_v58  ;;  %v493_v15 = vand.u32 4294901760, %v492_v47  ;;  %v507_v9 = vsub.f32 %v6954_v63, %v8913_v36  ;;  %v8909_v30 = vand.u32 4294901760, %v6976_v48  ;;  %v9207_v0 = vpack.c.bf16 %v6427_v61, %v6414_v41  ;;  %v7080_v36 = vld [vmem:[%s8784_s1 + $0x110] sm:$0xff] }
  0xc7   :  { %804 = vmatmul.mubr.f32.gmra.mrb[12].mxu1 %v6945_v7  ;;  %v499_v47 = vand.u32 4294901760, %v498_v13  ;;  %v9208_v58 = vand.u32 4294901760, %v6760_v11  ;;  %v513_v41 = vsub.f32 %v6965_v54, %v8910_v24  ;;  %v8911_v61 = vand.u32 4294901760, %v6989_v53  ;;  %v9246_v7 = vld [vmem:[#allocation39_spill] sm:$0xff] }
  0xc8   :  { %809 = vmatprep.mubr.f32.mxu1 %v6951_v4  ;;  %5368 = vmatpush3.bf16.msra.mxu0 %v9206_v26  ;;  %v8912_v18 = vand.u32 4294901760, %v7002_v23  ;;  %v508_v62 = vand.u32 4294901760, %v507_v9  ;;  %v522_v13 = vsub.f32 %v6976_v48, %v8909_v30  ;;  %v8914_v26 = vand.u32 4294901760, %v7010_v35  ;;  %v7051_v9 = vld [vmem:[%s8784_s1 + $0x198] sm:$0xff]  ;;  %v9214_v30 = vld [vmem:[#allocation31_spill] sm:$0xff] }
  0xc9   :  { %5408 = vmatpush3.bf16.msra.mxu1 %v6542_v52  ;;  %485 = vmatmul.mubr.f32.gmra.mrb[8].mxu0 %v484_v25  ;;  %v9209_v25 = vpack.c.bf16 %v6441_v51, %v6434_v57  ;;  %v8915_v51 = vand.u32 4294901760, %v7016_v59  ;;  %v7046_v57 = vld [vmem:[%s8784_s1 + $0x190] sm:$0xff]  ;;  %v9233_v40 = vand.u32 4294901760, %v7051_v9 }
  0xca   :  { %5370 = vmatprep.subr.bf16.mxu0 %v9207_v0  ;;  %494 = vmatprep.mubr.f32.mxu0 %v493_v15  ;;  %v7037_v15 = vld [vmem:[%s8784_s1 + $0x108] sm:$0xff]  ;;  %v9210_v0 = vpack.c.bf16 %v6492_v14, %v6489_v56  ;;  %v528_v56 = vsub.f32 %v6989_v53, %v8911_v61  ;;  %v7062_v14 = vsub.f32 %v7002_v23, %v8912_v18  ;;  %v7099_v18 = vld [vmem:[%s8784_s1 + $0x1a0] sm:$0xff] }
  0xcb   :  { %811 = vmatmul.mubr.f32.gmra.mrb[14].mxu1 %v6962_v43  ;;  %5410 = vmatprep.subr.bf16.mxu1 %v6547_v29  ;;  %v7131_v43 = vsub.f32 %v7051_v9, %v9233_v40  ;;  %v7147_v40 = vld [vmem:[%s8784_s1 + $0x128] sm:$0xff]  ;;  %v9245_v32 = vand.u32 4294901760, %v7099_v18 }
  0xcc   :  { %1116 = vmatprep.mubr.f32.mxu1 %v9208_v58  ;;  %5372 = vmatpush3.bf16.msra.mxu0 %v9209_v25  ;;  %v9211_v58 = vand.u32 4294901760, %v6763_v22  ;;  %9212 = vst [vmem:[#allocation33_spill] sm:$0xff] %v7062_v14  ;;  %v8917_v25 = vand.u32 4294901760, %v7037_v15  ;;  %v529_v61 = vand.u32 4294901760, %v528_v56  ;;  %v9227_v56 = vld [vmem:[#allocation37_spill] sm:$0xff] }
  0xcd   :  { %5412 = vmatpush3.bf16.msra.mxu1 %v6549_v60  ;;  %500 = vmatmul.mubr.f32.gmra.mrb[10].mxu0 %v499_v47  ;;  %v514_v47 = vand.u32 4294901760, %v513_v41  ;;  %v9216_v41 = vld [vmem:[#allocation67_spill] sm:$0xff] }
  0xce   :  { %5374 = vmatprep.subr.bf16.mxu0 %v9210_v0  ;;  %509 = vmatprep.mubr.f32.mxu0 %v508_v62  ;;  %v9213_v0 = vld [vmem:[#allocation32_spill] sm:$0xff]  ;;  %v9217_v24 = vand.u32 4294901760, %v9216_v41 }
  0xcf   :  { %5446 = vmatprep.subr.bf16.mxu1 %v6237_v33  ;;  %v9215_v62 = vpack.c.bf16 %v9213_v0, %v9214_v30  ;;  %v523_v33 = vand.u32 4294901760, %v522_v13  ;;  %v7085_v30 = vld [vmem:[%s8784_s1 + $0x118] sm:$0xff]  ;;  %v7091_v13 = vsub.f32 %v7016_v59, %v8915_v51  ;;  %v9221_v0 = vld [vmem:[#allocation35_spill] sm:$0xff]  ;;  %v7107_v51 = vsub.f32 %v7037_v15, %v8917_v25 }
  0xd0   :  { %1120 = vmatmul.mubr.f32.vlgmr.msra.gmra.mrb[16].mxu1 %v9211_v58  ;;  %v7073_v58 = vsub.f32 %v7010_v35, %v8914_v26  ;;  %9234 = vst [vmem:[#allocation35_spill] sm:$0xff] %v7131_v43 }
  0xd1   :  { %5376 = vmatpush3.bf16.msra.mxu0 %v9215_v62  ;;  %1127 = vmatprep.mubr.f32.mxu1 %v9217_v24  ;;  %v9219_v24 = vld [vmem:[#allocation21_spill] sm:$0xff]  ;;  %9220 = vst [vmem:[#allocation31_spill] sm:$0xff] %v7091_v13  ;;  %v9222_v62 = vld [vmem:[#allocation34_spill] sm:$0xff]  ;;  %9226 = vst [vmem:[#allocation67_spill] sm:$0xff] %v7107_v51  ;;  %v9244_v46 = vand.u32 4294901760, %v7091_v13 }
  0xd2   :  { %9218 = vst [vmem:[#allocation32_spill] sm:$0xff] %v7073_v58  ;;  %515 = vmatmul.mubr.f32.gmra.mrb[12].mxu0 %v514_v47  ;;  %5448 = vmatpush3.bf16.msra.mxu1 %v9219_v24  ;;  %v9223_v26 = vpack.c.bf16 %v9221_v0, %v9222_v62  ;;  %v9224_v47 = vand.u32 4294901760, %v6830_v12  ;;  %v9225_v24 = vld [vmem:[#allocation22_spill] sm:$0xff]  ;;  %v9228_v62 = vld [vmem:[#allocation36_spill] sm:$0xff] }
  0xd3   :  { %524 = vmatprep.mubr.f32.mxu0 %v523_v33  ;;  %5450 = vmatprep.subr.bf16.mxu1 %v9225_v24  ;;  %v7114_v0 = vld [vmem:[%s8784_s1 + $0x1a8] sm:$0xff]  ;;  %v9229_v49 = vpack.c.bf16 %v9227_v56, %v9228_v62  ;;  %v9231_v33 = vand.u32 4294901760, %v7046_v57  ;;  %v9235_v56 = vld [vmem:[#allocation23_spill] sm:$0xff]  ;;  %v9240_v62 = vand.u32 4294901760, %v7085_v30 }
  0xd4   :  { %5378 = vmatprep.subr.bf16.mxu0 %v9223_v26  ;;  %1131 = vmatmul.mubr.f32.gmra.mrb[18].mxu1 %v9224_v47  ;;  %v9230_v47 = vand.u32 4294901760, %v6847_v2  ;;  %v7166_v24 = vld [vmem:[%s8784_s1 + $0x1b0] sm:$0xff] }
  0xd5   :  { %5380 = vmatpush3.bf16.msra.mxu0 %v9229_v49  ;;  %v7126_v26 = vsub.f32 %v7046_v57, %v9231_v33  ;;  %v7142_v33 = vld [vmem:[%s8784_s1 + $0x120] sm:$0xff]  ;;  %v7161_v49 = vsub.f32 %v7085_v30, %v9240_v62  ;;  %v9243_v62 = vand.u32 4294901760, %v7073_v58 }
  0xd6   :  { %1138 = vmatprep.mubr.f32.mxu1 %v9230_v47  ;;  %530 = vmatmul.mubr.f32.gmra.mrb[14].mxu0 %v529_v61  ;;  %v9236_v47 = vld [vmem:[#allocation38_spill] sm:$0xff]  ;;  %v9237_v61 = vand.u32 4294901760, %v6857_v5 }
  0xd7   :  { %9232 = vst [vmem:[#allocation21_spill] sm:$0xff] %v7126_v26  ;;  %5452 = vmatpush3.bf16.msra.mxu1 %v9235_v56  ;;  %946 = vmatprep.mubr.f32.mxu0 %v6760_v11  ;;  %v9238_v56 = vld [vmem:[#allocation24_spill] sm:$0xff]  ;;  %v1912_v4 = vsub.f32 %v7073_v58, %v9243_v62  ;;  %v9251_v62 = vand.u32 4294901760, %v7107_v51 }
  0xd8   :  { %5414 = vmatprep.subr.bf16.mxu0 %v9236_v47  ;;  %1142 = vmatmul.mubr.f32.gmra.mrb[20].mxu1 %v9237_v61  ;;  %v9239_v47 = vand.u32 4294901760, %v7080_v36  ;;  %v7171_v61 = vld [vmem:[%s8784_s1 + $0x1b8] sm:$0xff] }
  0xd9   :  { %5454 = vmatprep.subr.bf16.mxu1 %v9238_v56  ;;  %v9241_v56 = vand.u32 4294901760, %v6862_v55 }
  0xda   :  { %v7156_v25 = vsub.f32 %v7080_v36, %v9239_v47  ;;  %v9242_v47 = vand.u32 4294901760, %v7062_v14  ;;  %949 = vmatmul.mubr.f32.vlgmr.msra.gmra.mrb[16].mxu0 %v6763_v22  ;;  %v9247_v22 = vand.u32 4294901760, %v7114_v0 }
  0xdb   :  { %1149 = vmatprep.mubr.f32.mxu1 %v9241_v56  ;;  %5456 = vmatpush3.bf16.msra.mxu1 %v9172_v21  ;;  %v1793_v56 = vsub.f32 %v7091_v13, %v9244_v46  ;;  %v9249_v13 = vld [vmem:[#allocation40_spill] sm:$0xff]  ;;  %v9253_v46 = vand.u32 4294901760, %v7126_v26 }
  0xdc   :  { %v1905_v11 = vsub.f32 %v7062_v14, %v9242_v47  ;;  %v7191_v47 = vsub.f32 %v7099_v18, %v9245_v32  ;;  %5416 = vmatpush3.bf16.msra.mxu0 %v9246_v7  ;;  %955 = vmatprep.mubr.f32.mxu0 %v9216_v41  ;;  %v7200_v21 = vsub.f32 %v7114_v0, %v9247_v22  ;;  %v9250_v32 = vand.u32 4294901760, %v6883_v1  ;;  %v7215_v22 = vld [vmem:[%s8784_s1 + $0x130] sm:$0xff] }
  0xdd   :  { %5418 = vmatprep.subr.bf16.mxu0 %v9249_v13  ;;  %v1800_v7 = vsub.f32 %v7107_v51, %v9251_v62  ;;  %5458 = vmatprep.subr.bf16.mxu1 %v9177_v39  ;;  %v9252_v13 = vand.u32 4294901760, %v6904_v50  ;;  %v1919_v62 = vsub.f32 %v7126_v26, %v9253_v46  ;;  %v9254_v41 = vand.u32 4294901760, %v7131_v43  ;;  %v7229_v51 = vld [vmem:[%s8784_s1 + $0x138] sm:$0xff] }
  0xde   :  { %9248 = vst [vmem:[#allocation34_spill] sm:$0xff] %v7200_v21  ;;  %1153 = vmatmul.mubr.f32.gmra.mrb[22].mxu1 %v9250_v32  ;;  %v1906_v38 = vand.u32 4294901760, %v1905_v11  ;;  %v1913_v32 = vand.u32 4294901760, %v1912_v4  ;;  %958 = vmatmul.mubr.f32.gmra.mrb[18].mxu0 %v6830_v12  ;;  %v1794_v39 = vand.u32 4294901760, %v1793_v56  ;;  %v9255_v11 = vand.u32 4294901760, %v7142_v33 }
  0xdf   :  { %1160 = vmatprep.mubr.f32.mxu1 %v9252_v13  ;;  %v1926_v14 = vsub.f32 %v7131_v43, %v9254_v41  ;;  %5460 = vmatpush3.bf16.msra.mxu1 %v9182_v44  ;;  %v9257_v13 = vand.u32 4294901760, %v7147_v40  ;;  %v9259_v43 = vld [vmem:[#allocation41_spill] sm:$0xff]  ;;  %v9260_v44 = vand.u32 4294901760, %v7166_v24  ;;  %v9262_v4 = vand.u32 4294901760, %v7171_v61 }
  0xe0   :  { %v7237_v46 = vsub.f32 %v7142_v33, %v9255_v11  ;;  %5420 = vmatpush3.bf16.msra.mxu0 %v9259_v43  ;;  %964 = vmatprep.mubr.f32.mxu0 %v6847_v2  ;;  %v9265_v43 = vand.u32 4294901760, %v6914_v8  ;;  %v1801_v2 = vand.u32 4294901760, %v1800_v7  ;;  %v9266_v12 = vand.u32 4294901760, %v7156_v25 }
  0xe1   :  { %v7242_v41 = vsub.f32 %v7147_v40, %v9257_v13  ;;  %v7250_v56 = vsub.f32 %v7166_v24, %v9260_v44  ;;  %v7255_v11 = vsub.f32 %v7171_v61, %v9262_v4  ;;  %v9264_v13 = vld [vmem:[#allocation42_spill] sm:$0xff]  ;;  %v9267_v44 = vand.u32 4294901760, %v7161_v49  ;;  %5462 = vmatprep.subr.bf16.mxu1 %v9185_v31  ;;  %v9270_v31 = vld [vmem:[#allocation43_spill] sm:$0xff] }
  0xe2   :  { %9256 = vst [vmem:[#allocation22_spill] sm:$0xff] %v7237_v46  ;;  %5422 = vmatprep.subr.bf16.mxu0 %v9264_v13  ;;  %1164 = vmatmul.mubr.f32.gmra.mrb[24].mxu1 %v9265_v43  ;;  %v1807_v58 = vsub.f32 %v7156_v25, %v9266_v12  ;;  %v9268_v4 = vand.u32 4294901760, %v6928_v34  ;;  %v1920_v13 = vand.u32 4294901760, %v1919_v62  ;;  %v1927_v26 = vand.u32 4294901760, %v1926_v14 }
  0xe3   :  { %9258 = vst [vmem:[#allocation37_spill] sm:$0xff] %v7242_v41  ;;  %9261 = vst [vmem:[#allocation36_spill] sm:$0xff] %v7250_v56  ;;  %v1814_v3 = vsub.f32 %v7161_v49, %v9267_v44  ;;  %967 = vmatmul.mubr.f32.gmra.mrb[20].mxu0 %v6857_v5  ;;  %5464 = vmatpush3.bf16.msra.mxu1 %v9192_v6  ;;  %v7273_v7 = vpack.c.bf16 %v1913_v32, %v1906_v38  ;;  %v9269_v12 = vand.u32 4294901760, %v7191_v47 }
  0xe4   :  { %9263 = vst [vmem:[#allocation23_spill] sm:$0xff] %v7255_v11  ;;  %1171 = vmatprep.mubr.f32.mxu1 %v9268_v4  ;;  %5424 = vmatpush3.bf16.msra.mxu0 %v9270_v31  ;;  %v9271_v14 = vand.u32 4294901760, %v7200_v21  ;;  %v9272_v32 = vand.u32 4294901760, %v7215_v22  ;;  %v7295_v4 = vld [vmem:[%s8784_s1 + $0x1c0] sm:$0xff]  ;;  %v7300_v31 = vpack.c.bf16 %v1801_v2, %v1794_v39  ;;  %v9276_v38 = vand.u32 4294901760, %v7229_v51 }
  0xe5   :  { %v1933_v43 = vsub.f32 %v7191_v47, %v9269_v12  ;;  %973 = vmatprep.mubr.f32.mxu0 %v6862_v55  ;;  %v9274_v12 = vld [vmem:[#allocation44_spill] sm:$0xff]  ;;  %v9275_v55 = vand.u32 4294901760, %v6940_v16  ;;  %v1815_v6 = vand.u32 4294901760, %v1814_v3  ;;  %5466 = vmatprep.subr.bf16.mxu1 %v9198_v42  ;;  %v7310_v44 = vpack.c.bf16 %v1927_v26, %v1920_v13  ;;  %v7327_v42 = vld [vmem:[%s8784_s1 + $0x1c8] sm:$0xff]  ;;  %v7332_v26 = vld [vmem:[%s8784_s1 + $0x140] sm:$0xff] }
  0xe6   :  { %v1940_v5 = vsub.f32 %v7200_v21, %v9271_v14  ;;  %v7290_v62 = vsub.f32 %v7215_v22, %v9272_v32  ;;  %5426 = vmatprep.subr.bf16.mxu0 %v9274_v12  ;;  %v1808_v14 = vand.u32 4294901760, %v1807_v58  ;;  %v7305_v17 = vsub.f32 %v7229_v51, %v9276_v38  ;;  %v9288_v38 = vld [vmem:[#allocation46_spill] sm:$0xff] }
  0xe7   :  { %1175 = vmatmul.mubr.f32.gmra.mrb[26].mxu1 %v9275_v55  ;;  %v9278_v32 = vand.u32 4294901760, %v6954_v63  ;;  %v9279_v12 = vand.u32 4294901760, %v7002_v23  ;;  %v9280_v55 = vand.u32 4294901760, %v7010_v35  ;;  %v9281_v3 = vand.u32 4294901760, %v7016_v59  ;;  %976 = vmatmul.mubr.f32.gmra.mrb[22].mxu0 %v6883_v1  ;;  %v9285_v1 = vld [vmem:[#allocation45_spill] sm:$0xff] }
  0xe8   :  { %9273 = vst [vmem:[#allocation38_spill] sm:$0xff] %v7290_v62  ;;  %9277 = vst [vmem:[#allocation24_spill] sm:$0xff] %v7305_v17  ;;  %v9282_v58 = vand.u32 4294901760, %v7037_v15  ;;  %5468 = vmatpush3.bf16.msra.mxu1 %v9202_v27  ;;  %v1934_v23 = vand.u32 4294901760, %v1933_v43  ;;  %v9283_v35 = vand.u32 4294901760, %v7237_v46  ;;  %v9284_v15 = vand.u32 4294901760, %v7242_v41  ;;  %5428 = vmatpush3.bf16.msra.mxu0 %v9285_v1 }
  0xe9   :  { %1182 = vmatprep.mubr.f32.mxu1 %v9278_v32  ;;  %v7316_v39 = vpack.c.bf16 %v9280_v55, %v9279_v12  ;;  %v7346_v32 = vld [vmem:[%s8784_s1 + $0x148] sm:$0xff]  ;;  %v7351_v27 = vld [vmem:[%s8784_s1 + $0x1d0] sm:$0xff]  ;;  %982 = vmatprep.mubr.f32.mxu0 %v6904_v50  ;;  %v1941_v43 = vand.u32 4294901760, %v1940_v5  ;;  %v9286_v12 = vand.u32 4294901760, %v7250_v56  ;;  %v9289_v50 = vand.u32 4294901760, %v6965_v54 }
  0xea   :  { %v7322_v2 = vpack.c.bf16 %v9282_v58, %v9281_v3  ;;  %v1821_v59 = vsub.f32 %v7237_v46, %v9283_v35  ;;  %v1828_v13 = vsub.f32 %v7242_v41, %v9284_v15  ;;  %v9287_v3 = vand.u32 4294901760, %v7255_v11  ;;  %v7365_v15 = vld [vmem:[%s8784_s1 + $0x1d8] sm:$0xff]  ;;  %5430 = vmatprep.subr.bf16.mxu0 %v9288_v38  ;;  %5470 = vmatprep.subr.bf16.mxu1 %v6540_v20 }
  0xeb   :  { %v1947_v55 = vsub.f32 %v7250_v56, %v9286_v12  ;;  %1186 = vmatmul.mubr.f32.gmra.mrb[28].mxu1 %v9289_v50  ;;  %v7370_v5 = vpack.c.bf16 %v1815_v6, %v1808_v14  ;;  %v8952_v1 = vand.u32 4294901760, %v7305_v17  ;;  %v9290_v35 = vand.u32 4294901760, %v6976_v48  ;;  %985 = vmatmul.mubr.f32.gmra.mrb[24].mxu0 %v6914_v8 }
  0xec   :  { %v1954_v58 = vsub.f32 %v7255_v11, %v9287_v3  ;;  %v9291_v11 = vand.u32 4294901760, %v7046_v57  ;;  %v9292_v38 = vand.u32 4294901760, %v7051_v9  ;;  %v9293_v6 = vand.u32 4294901760, %v7080_v36  ;;  %5472 = vmatpush3.bf16.msra.mxu1 %v6542_v52  ;;  %991 = vmatprep.mubr.f32.mxu0 %v6928_v34 }
  0xed   :  { %1193 = vmatprep.mubr.f32.mxu1 %v9290_v35  ;;  %v9294_v14 = vand.u32 4294901760, %v7085_v30  ;;  %v8953_v12 = vand.u32 4294901760, %v7346_v32  ;;  %v8956_v3 = vand.u32 4294901760, %v7351_v27  ;;  %v1822_v20 = vand.u32 4294901760, %v1821_v59  ;;  %v7403_v30 = vld [vmem:[%s8784_s1 + $0x150] sm:$0xff]  ;;  %5474 = vmatprep.subr.bf16.mxu1 %v6547_v29 }
  0xee   :  { %v7382_v56 = vpack.c.bf16 %v9292_v38, %v9291_v11  ;;  %v1829_v57 = vand.u32 4294901760, %v1828_v13  ;;  %v9295_v9 = vand.u32 4294901760, %v7295_v4  ;;  %v9297_v35 = vld [vmem:[#allocation47_spill] sm:$0xff]  ;;  %v7407_v8 = vpack.c.bf16 %v1941_v43, %v1934_v23 }
  0xef   :  { %v7388_v50 = vpack.c.bf16 %v9294_v14, %v9293_v6  ;;  %5432 = vmatpush3.bf16.msra.mxu0 %v9297_v35  ;;  %v1948_v52 = vand.u32 4294901760, %v1947_v55  ;;  %v1955_v59 = vand.u32 4294901760, %v1954_v58  ;;  %v9298_v13 = vand.u32 4294901760, %v7290_v62  ;;  %v7415_v6 = vld [vmem:[%s8784_s1 + $0x158] sm:$0xff]  ;;  %v7436_v35 = vld [vmem:[%s8784_s1 + $0x1e0] sm:$0xff] }
  0xf0   :  { %v7397_v11 = vsub.f32 %v7295_v4, %v9295_v9  ;;  %v9299_v14 = vld [vmem:[#allocation48_spill] sm:$0xff]  ;;  %v9300_v9 = vand.u32 4294901760, %v6989_v53  ;;  %v1842_v34 = vsub.f32 %v7305_v17, %v8952_v1  ;;  %v9301_v23 = vand.u32 4294901760, %v7327_v42  ;;  %994 = vmatmul.mubr.f32.gmra.mrb[26].mxu0 %v6940_v16  ;;  %5476 = vmatpush3.bf16.msra.mxu1 %v6549_v60  ;;  %v9313_v17 = vld [vmem:[#allocation49_spill] sm:$0xff] }
  0xf1   :  { %v1835_v38 = vsub.f32 %v7290_v62, %v9298_v13  ;;  %5434 = vmatprep.subr.bf16.mxu0 %v9299_v14  ;;  %v9303_v55 = vand.u32 4294901760, %v7332_v26  ;;  %v7441_v13 = vld [vmem:[%s8784_s1 + $0x1e8] sm:$0xff]  ;;  %v9305_v14 = vld [vmem:[#allocation61_spill] sm:$0xff]  ;;  %v7454_v1 = vsub.f32 %v7346_v32, %v8953_v12  ;;  %v7459_v36 = vsub.f32 %v7351_v27, %v8956_v3  ;;  %1000 = vmatprep.mubr.f32.mxu0 %v6954_v63  ;;  %v7585_v62 = vld [vmem:[%s8784_s1 + $0x178] sm:$0xff] }
  0xf2   :  { %9296 = vst [vmem:[#allocation39_spill] sm:$0xff] %v7397_v11  ;;  %1197 = vmatmul.mubr.f32.gmra.mrb[30].mxu1 %v9300_v9  ;;  %v7426_v43 = vsub.f32 %v7327_v42, %v9301_v23  ;;  %v9306_v9 = vand.u32 4294901760, %v7099_v18  ;;  %v9307_v23 = vand.u32 4294901760, %v7114_v0  ;;  %v8957_v29 = vand.u32 4294901760, %v7403_v30  ;;  %5510 = vmatprep.subr.bf16.mxu1 %v7273_v7 }
  0xf3   :  { %v7431_v58 = vsub.f32 %v7332_v26, %v9303_v55  ;;  %1516 = vmatprep.mubr.f32.mxu1 %v9305_v14  ;;  %9309 = vst [vmem:[#allocation43_spill] sm:$0xff] %v7454_v1  ;;  %9310 = vst [vmem:[#allocation44_spill] sm:$0xff] %v7459_v36  ;;  %v7464_v18 = vpack.c.bf16 %v1829_v57, %v1822_v20  ;;  %v8958_v12 = vand.u32 4294901760, %v7415_v6  ;;  %5436 = vmatpush3.bf16.msra.mxu0 %v9313_v17  ;;  %v9317_v17 = vld [vmem:[#allocation50_spill] sm:$0xff] }
  0xf4   :  { %9302 = vst [vmem:[#allocation40_spill] sm:$0xff] %v7426_v43  ;;  %v7449_v55 = vpack.c.bf16 %v9307_v23, %v9306_v9  ;;  %v9311_v9 = vand.u32 4294901760, %v7365_v15  ;;  %v7475_v3 = vpack.c.bf16 %v1955_v59, %v1948_v52  ;;  %v9314_v16 = vand.u32 4294901760, %v7142_v33  ;;  %5438 = vmatprep.subr.bf16.mxu0 %v9317_v17  ;;  %v7497_v59 = vld [vmem:[%s8784_s1 + $0x168] sm:$0xff]  ;;  %1003 = vmatmul.mubr.f32.gmra.mrb[28].mxu0 %v6965_v54  ;;  %v7535_v54 = vld [vmem:[%s8784_s1 + $0x1f8] sm:$0xff] }
  0xf5   :  { %9304 = vst [vmem:[#allocation41_spill] sm:$0xff] %v7431_v58  ;;  %v9315_v60 = vand.u32 4294901760, %v7147_v40  ;;  %v8961_v57 = vand.u32 4294901760, %v7436_v35  ;;  %v1836_v63 = vand.u32 4294901760, %v1835_v38  ;;  %v1843_v52 = vand.u32 4294901760, %v1842_v34  ;;  %v7516_v40 = vld [vmem:[%s8784_s1 + $0x1f0] sm:$0xff]  ;;  %1009 = vmatprep.mubr.f32.mxu0 %v6976_v48 }
  0xf6   :  { %9308 = vst [vmem:[#allocation42_spill] sm:$0xff] %v7449_v55  ;;  %v7470_v23 = vsub.f32 %v7365_v15, %v9311_v9  ;;  %v7488_v9 = vld [vmem:[%s8784_s1 + $0x160] sm:$0xff]  ;;  %v9319_v0 = vand.u32 4294901760, %v7166_v24  ;;  %v9320_v17 = vand.u32 4294901760, %v7171_v61  ;;  %v7511_v34 = vsub.f32 %v7403_v30, %v8957_v29  ;;  %v9326_v38 = vld [vmem:[#allocation51_spill] sm:$0xff]  ;;  %v9333_v48 = vld [vmem:[#allocation52_spill] sm:$0xff] }
  0xf7   :  { %v7481_v20 = vpack.c.bf16 %v9315_v60, %v9314_v16  ;;  %v9318_v16 = vld [vmem:[#allocation62_spill] sm:$0xff]  ;;  %v9323_v60 = vld [vmem:[#allocation64_spill] sm:$0xff]  ;;  %v9324_v24 = vand.u32 4294901760, %v7397_v11  ;;  %5440 = vmatpush3.bf16.msra.mxu0 %v9326_v38  ;;  %v9331_v29 = vand.u32 4294901760, %v7441_v13 }
  0xf8   :  { %9312 = vst [vmem:[#allocation45_spill] sm:$0xff] %v7470_v23  ;;  %1518 = vmatmul.mubr.f32.vlgmr.msra.gmra.mrb[32].mxu1 %v9318_v16  ;;  %v7505_v7 = vpack.c.bf16 %v9320_v17, %v9319_v0  ;;  %9322 = vst [vmem:[#allocation48_spill] sm:$0xff] %v7511_v34  ;;  %v7529_v17 = vsub.f32 %v7415_v6, %v8958_v12  ;;  %v9328_v0 = vand.u32 4294901760, %v7229_v51  ;;  %5442 = vmatprep.subr.bf16.mxu0 %v9333_v48 }
  0xf9   :  { %9316 = vst [vmem:[#allocation46_spill] sm:$0xff] %v7481_v20  ;;  %1523 = vmatprep.mubr.f32.mxu1 %v9323_v60  ;;  %v7523_v61 = vsub.f32 %v7397_v11, %v9324_v24  ;;  %v9327_v24 = vand.u32 4294901760, %v7215_v22  ;;  %v7548_v12 = vsub.f32 %v7436_v35, %v8961_v57  ;;  %v7553_v11 = vsub.f32 %v7441_v13, %v9331_v29  ;;  %v7570_v29 = vld [vmem:[%s8784_s1 + $0x170] sm:$0xff] }
  0xfa   :  { %9321 = vst [vmem:[#allocation47_spill] sm:$0xff] %v7505_v7  ;;  %9325 = vst [vmem:[#allocation61_spill] sm:$0xff] %v7529_v17  ;;  %5512 = vmatpush3.bf16.msra.mxu1 %v7300_v31  ;;  %v7558_v22 = vpack.c.bf16 %v1843_v52, %v1836_v63  ;;  %v9334_v51 = vand.u32 4294901760, %v7426_v43  ;;  %v9336_v31 = vand.u32 4294901760, %v7454_v1  ;;  %v9337_v52 = vand.u32 4294901760, %v7459_v36  ;;  %1012 = vmatmul.mubr.f32.gmra.mrb[30].mxu0 %v6989_v53 }
  0xfb   :  { %v7543_v33 = vpack.c.bf16 %v9328_v0, %v9327_v24  ;;  %9330 = vst [vmem:[#allocation50_spill] sm:$0xff] %v7548_v12  ;;  %9332 = vst [vmem:[#allocation62_spill] sm:$0xff] %v7553_v11  ;;  %v9335_v24 = vand.u32 4294901760, %v7431_v58  ;;  %5514 = vmatprep.subr.bf16.mxu1 %v7310_v44  ;;  %v1962_v44 = vand.u32 4294901760, %v7523_v61  ;;  %1363 = vmatprep.mubr.f32.mxu0 %v9305_v14  ;;  %v9341_v61 = vand.u32 4294901760, %v7497_v59 }
  0xfc   :  { %v1968_v0 = vsub.f32 %v7426_v43, %v9334_v51  ;;  %1525 = vmatmul.mubr.f32.gmra.mrb[34].mxu1 %v6756_v37  ;;  %v1856_v63 = vsub.f32 %v7454_v1, %v9336_v31  ;;  %v1975_v48 = vsub.f32 %v7459_v36, %v9337_v52  ;;  %v9338_v31 = vand.u32 4294901760, %v7470_v23  ;;  %v9340_v36 = vld [vmem:[#allocation53_spill] sm:$0xff] }
  0xfd   :  { %9329 = vst [vmem:[#allocation49_spill] sm:$0xff] %v7543_v33  ;;  %v1849_v57 = vsub.f32 %v7431_v58, %v9335_v24  ;;  %1530 = vmatprep.mubr.f32.mxu1 %v6752_v45  ;;  %v9339_v51 = vand.u32 4294901760, %v7488_v9  ;;  %5444 = vmatpush3.bf16.msra.mxu0 %v9340_v36  ;;  %v7606_v58 = vsub.f32 %v7497_v59, %v9341_v61  ;;  %v9342_v36 = vand.u32 4294901760, %v7516_v40 }
  0xfe   :  { %v1982_v38 = vsub.f32 %v7470_v23, %v9338_v31  ;;  %5516 = vmatpush3.bf16.msra.mxu1 %v7370_v5  ;;  %5478 = vmatprep.subr.bf16.mxu0 %v7316_v39  ;;  %v1857_v61 = vand.u32 4294901760, %v1856_v63  ;;  %v1976_v53 = vand.u32 4294901760, %v1975_v48  ;;  %v9344_v31 = vand.u32 4294901760, %v7511_v34  ;;  %v9346_v23 = vld [vmem:[#allocation8_spill] sm:$0xff]  ;;  %v9352_v48 = vld [vmem:[#allocation7_spill] sm:$0xff] }
  0xff   :  { %v7597_v24 = vsub.f32 %v7488_v9, %v9339_v51  ;;  %v1969_v51 = vand.u32 4294901760, %v1968_v0  ;;  %v1850_v52 = vand.u32 4294901760, %v1849_v57  ;;  %v7614_v14 = vsub.f32 %v7516_v40, %v9342_v36  ;;  %5518 = vmatprep.subr.bf16.mxu1 %v7407_v8  ;;  %v9347_v36 = vld [vmem:[#allocation54_spill] sm:$0xff] }
 0x100   :  { %1532 = vmatmul.mubr.f32.gmra.mrb[36].mxu1 %v6788_v10  ;;  %v1863_v5 = vsub.f32 %v7511_v34, %v9344_v31  ;;  %v9345_v0 = vand.u32 4294901760, %v7535_v54  ;;  %v161_v43 = vmul.f32 %v9347_v36, %v9346_v23  ;;  %1365 = vmatmul.mubr.f32.vlgmr.msra.gmra.mrb[32].mxu0 %v9318_v16  ;;  %v1983_v1 = vand.u32 4294901760, %v1982_v38  ;;  %v9354_v38 = vld [vmem:[#allocation58_spill] sm:$0xff] }
 0x101   :  { %9343 = vst [vmem:[#allocation64_spill] sm:$0xff] %v7614_v14  ;;  %1537 = vmatprep.mubr.f32.mxu1 %v6811_v19  ;;  %v9348_v8 = vand.u32 4294901760, %v7529_v17  ;;  %5480 = vmatpush3.bf16.msra.mxu0 %v7322_v2  ;;  %v9349_v31 = vand.u32 4294901760, %v7548_v12  ;;  %v9350_v34 = vand.u32 4294901760, %v7553_v11  ;;  %v9351_v41 = vand.u32 4294901760, %v7570_v29 }
 0x102   :  { %v7625_v57 = vsub.f32 %v7535_v54, %v9345_v0  ;;  %1370 = vmatprep.mubr.f32.mxu0 %v9323_v60  ;;  %5520 = vmatpush3.bf16.msra.mxu1 %v7464_v18  ;;  %v5525_v60 = vpack.c.bf16 %v1969_v51, %v1962_v44  ;;  %v5849_v44 = vld [vmem:[%s8783_s0 + $0x18] sm:$0xff]  ;;  %v9357_v21 = vand.u32 4294901760, %v7597_v24 }
 0x103   :  { %v1870_v63 = vsub.f32 %v7529_v17, %v9348_v8  ;;  %v1989_v0 = vsub.f32 %v7548_v12, %v9349_v31  ;;  %v1996_v16 = vsub.f32 %v7553_v11, %v9350_v34  ;;  %v7647_v8 = vsub.f32 %v7570_v29, %v9351_v41  ;;  %5482 = vmatprep.subr.bf16.mxu0 %v7382_v56 }
 0x104   :  { %v160_v17 = vmul.f32 %v9347_v36, %v9352_v48  ;;  %v9353_v12 = vand.u32 4294901760, %v7585_v62  ;;  %v165_v11 = vmul.f32 %v9354_v38, %v9346_v23  ;;  %1539 = vmatmul.mubr.f32.gmra.mrb[38].mxu1 %v6854_v28  ;;  %5522 = vmatprep.subr.bf16.mxu1 %v7475_v3  ;;  %v5527_v41 = vpack.c.bf16 %v1857_v61, %v1850_v52 }
 0x105   :  { %v1864_v36 = vand.u32 4294901760, %v1863_v5  ;;  %v8990_v18 = vand.u32 4294901760, %v7625_v57  ;;  %v7667_v51 = vsub.f32 %v5849_v44, %v161_v43  ;;  %1372 = vmatmul.mubr.f32.gmra.mrb[34].mxu0 %v6756_v37  ;;  %v5529_v31 = vpack.c.bf16 %v1983_v1, %v1976_v53  ;;  %v5850_v1 = vld [vmem:[%s8783_s0 + $0x10] sm:$0xff] }
 0x106   :  { %v7657_v34 = vsub.f32 %v7585_v62, %v9353_v12  ;;  %v9356_v12 = vld [vmem:[#allocation26_spill] sm:$0xff]  ;;  %v1871_v46 = vand.u32 4294901760, %v1870_v63  ;;  %v1877_v3 = vsub.f32 %v7597_v24, %v9357_v21  ;;  %5484 = vmatpush3.bf16.msra.mxu0 %v7388_v50  ;;  %1377 = vmatprep.mubr.f32.mxu0 %v6752_v45  ;;  %v1990_v52 = vand.u32 4294901760, %v1989_v0 }
 0x107   :  { %9355 = vst [vmem:[#allocation51_spill] sm:$0xff] %v7667_v51  ;;  %1544 = vmatprep.mubr.f32.mxu1 %v9356_v12  ;;  %v1997_v61 = vand.u32 4294901760, %v1996_v16  ;;  %v9358_v5 = vand.u32 4294901760, %v7606_v58  ;;  %v7683_v53 = vsub.f32 %v5850_v1, %v160_v17  ;;  %v164_v21 = vmul.f32 %v9354_v38, %v9352_v48  ;;  %5524 = vmatpush3.bf16.msra.mxu1 %v7558_v22  ;;  %v9361_v16 = vld [vmem:[#allocation55_spill] sm:$0xff]  ;;  %v5851_v17 = vld [vmem:[%s8783_s0 + $0x38] sm:$0xff] }
 0x108   :  { %5486 = vmatprep.subr.bf16.mxu0 %v7449_v55  ;;  %v9360_v45 = vand.u32 4294901760, %v7614_v14  ;;  %v169_v44 = vmul.f32 %v9361_v16, %v9346_v23  ;;  %v9363_v38 = vld [vmem:[#allocation20_spill] sm:$0xff]  ;;  %5526 = vmatprep.subr.bf16.mxu1 %v5525_v60  ;;  %v2010_v22 = vsub.f32 %v7625_v57, %v8990_v18  ;;  %v9364_v1 = vld [vmem:[#allocation27_spill] sm:$0xff]  ;;  %v9365_v0 = vand.u32 4294901760, %v7295_v4 }
 0x109   :  { %v1884_v43 = vsub.f32 %v7606_v58, %v9358_v5  ;;  %9359 = vst [vmem:[#allocation52_spill] sm:$0xff] %v7683_v53  ;;  %v7698_v5 = vsub.f32 %v5851_v17, %v165_v11  ;;  %1546 = vmatmul.mubr.f32.gmra.mrb[40].mxu1 %v9363_v38  ;;  %1379 = vmatmul.mubr.f32.gmra.mrb[36].mxu0 %v6788_v10  ;;  %v9366_v37 = vand.u32 4294901760, %v7327_v42  ;;  %v1878_v11 = vand.u32 4294901760, %v1877_v3 }
 0x10a   :  { %v2003_v63 = vsub.f32 %v7614_v14, %v9360_v45  ;;  %1551 = vmatprep.mubr.f32.mxu1 %v9364_v1  ;;  %v5531_v45 = vpack.c.bf16 %v1871_v46, %v1864_v36  ;;  %v225_v17 = vmul.f32 %v7667_v51, %v7667_v51  ;;  %v168_v60 = vmul.f32 %v9361_v16, %v9352_v48  ;;  %v5852_v36 = vld [vmem:[%s8783_s0 + $0x30] sm:$0xff] }
 0x10b   :  { %9362 = vst [vmem:[#allocation53_spill] sm:$0xff] %v7698_v5  ;;  %v7710_v14 = vpack.c.bf16 %v9366_v37, %v9365_v0  ;;  %5488 = vmatpush3.bf16.msra.mxu0 %v7481_v20  ;;  %1384 = vmatprep.mubr.f32.mxu0 %v6811_v19  ;;  %v5533_v10 = vpack.c.bf16 %v1997_v61, %v1990_v52  ;;  %v1885_v18 = vand.u32 4294901760, %v1884_v43  ;;  %v9367_v46 = vand.u32 4294901760, %v7647_v8  ;;  %v5853_v61 = vld [vmem:[%s8783_s0 + $0x58] sm:$0xff] }
 0x10c   :  { %v224_v42 = vmul.f32 %v7683_v53, %v7683_v53  ;;  %v7726_v3 = vsub.f32 %v5852_v36, %v164_v21  ;;  %5528 = vmatpush3.bf16.msra.mxu1 %v5527_v41  ;;  %5490 = vmatprep.subr.bf16.mxu0 %v7505_v7  ;;  %v9369_v19 = vand.u32 4294901760, %v7657_v34  ;;  %v7735_v43 = vsub.f32 %v5853_v61, %v169_v44  ;;  %v9371_v37 = vld [vmem:[#allocation28_spill] sm:$0xff]  ;;  %v9372_v21 = vld [vmem:[#allocation59_spill] sm:$0xff]  ;;  %v9373_v36 = vld [vmem:[#allocation29_spill] sm:$0xff] }
 0x10d   :  { %v1891_v4 = vsub.f32 %v7647_v8, %v9367_v46  ;;  %1553 = vmatmul.mubr.f32.gmra.mrb[42].mxu1 %v9371_v37  ;;  %5530 = vmatprep.subr.bf16.mxu1 %v5529_v31  ;;  %v2004_v0 = vand.u32 4294901760, %v2003_v63  ;;  %v2011_v16 = vand.u32 4294901760, %v2010_v22  ;;  %v229_v41 = vmul.f32 %v7698_v5, %v7698_v5  ;;  %v5861_v53 = vld [vmem:[%s8783_s0 + $0xd8] sm:$0xff] }
 0x10e   :  { %9368 = vst [vmem:[#allocation8_spill] sm:$0xff] %v7726_v3  ;;  %v1898_v52 = vsub.f32 %v7657_v34, %v9369_v19  ;;  %9370 = vst [vmem:[#allocation54_spill] sm:$0xff] %v7735_v43  ;;  %v173_v46 = vmul.f32 %v9372_v21, %v9346_v23  ;;  %1386 = vmatmul.mubr.f32.gmra.mrb[38].mxu0 %v6854_v28  ;;  %1558 = vmatprep.mubr.f32.mxu1 %v9373_v36  ;;  %v9374_v19 = vand.u32 4294901760, %v7332_v26  ;;  %v5854_v28 = vld [vmem:[%s8783_s0 + $0x50] sm:$0xff] }
 0x10f   :  { %v9375_v44 = vand.u32 4294901760, %v7346_v32  ;;  %v9377_v31 = vand.u32 4294901760, %v7351_v27  ;;  %v9378_v63 = vand.u32 4294901760, %v7365_v15  ;;  %v7756_v5 = vand.u32 4294901760, %v225_v17  ;;  %5492 = vmatpush3.bf16.msra.mxu0 %v7543_v33  ;;  %1391 = vmatprep.mubr.f32.mxu0 %v9356_v12 }
 0x110   :  { %v7761_v51 = vsub.f32 %v5854_v28, %v168_v60  ;;  %v172_v26 = vmul.f32 %v9372_v21, %v9352_v48  ;;  %v5535_v32 = vpack.c.bf16 %v1885_v18, %v1878_v11  ;;  %5532 = vmatpush3.bf16.msra.mxu1 %v5531_v45  ;;  %5494 = vmatprep.subr.bf16.mxu0 %v7710_v14  ;;  %v1892_v27 = vand.u32 4294901760, %v1891_v4  ;;  %v9383_v60 = vld [vmem:[#allocation69_spill] sm:$0xff]  ;;  %v5855_v11 = vld [vmem:[%s8783_s0 + $0x78] sm:$0xff] }
 0x111   :  { %v7748_v61 = vpack.c.bf16 %v9375_v44, %v9374_v19  ;;  %v7754_v22 = vpack.c.bf16 %v9378_v63, %v9377_v31  ;;  %9380 = vst [vmem:[#allocation26_spill] sm:$0xff] %v7756_v5  ;;  %v1899_v15 = vand.u32 4294901760, %v1898_v52  ;;  %v7768_v19 = vand.u32 4294901760, %v224_v42  ;;  %1560 = vmatmul.mubr.f32.gmra.mrb[44].mxu1 %v9383_v60  ;;  %5534 = vmatprep.subr.bf16.mxu1 %v5533_v10  ;;  %v9389_v10 = vld [vmem:[#allocation63_spill] sm:$0xff] }
 0x112   :  { %9381 = vst [vmem:[#allocation55_spill] sm:$0xff] %v7761_v51  ;;  %v228_v44 = vmul.f32 %v7726_v3, %v7726_v3  ;;  %v9384_v21 = vand.u32 4294901760, %v7403_v30  ;;  %v9385_v31 = vand.u32 4294901760, %v7415_v6  ;;  %v5537_v18 = vpack.c.bf16 %v2011_v16, %v2004_v0  ;;  %1393 = vmatmul.mubr.f32.gmra.mrb[40].mxu0 %v9363_v38  ;;  %v9390_v30 = vld [vmem:[#allocation70_spill] sm:$0xff]  ;;  %v5856_v0 = vld [vmem:[%s8783_s0 + $0x70] sm:$0xff] }
 0x113   :  { %9376 = vst [vmem:[#allocation7_spill] sm:$0xff] %v7748_v61  ;;  %9379 = vst [vmem:[#allocation58_spill] sm:$0xff] %v7754_v22  ;;  %v7779_v12 = vand.u32 4294901760, %v229_v41  ;;  %v233_v45 = vmul.f32 %v7735_v43, %v7735_v43  ;;  %v7786_v4 = vsub.f32 %v5855_v11, %v173_v46  ;;  %v177_v52 = vmul.f32 %v9389_v10, %v9346_v23 }
 0x114   :  { %9382 = vst [vmem:[#allocation20_spill] sm:$0xff] %v7768_v19  ;;  %v7777_v63 = vpack.c.bf16 %v9385_v31, %v9384_v21  ;;  %1565 = vmatprep.mubr.f32.mxu1 %v9390_v30  ;;  %v7793_v6 = vsub.f32 %v225_v17, %v7756_v5  ;;  %v7798_v16 = vsub.f32 %v5856_v0, %v172_v26  ;;  %v9392_v46 = vand.u32 4294901760, %v7436_v35  ;;  %v9396_v35 = vld [vmem:[#allocation30_spill] sm:$0xff] }
 0x115   :  { %9387 = vst [vmem:[#allocation28_spill] sm:$0xff] %v7779_v12  ;;  %9388 = vst [vmem:[#allocation59_spill] sm:$0xff] %v7786_v4  ;;  %5496 = vmatpush3.bf16.msra.mxu0 %v7748_v61  ;;  %1398 = vmatprep.mubr.f32.mxu0 %v9364_v1  ;;  %v9393_v28 = vand.u32 4294901760, %v7441_v13  ;;  %v232_v17 = vmul.f32 %v7761_v51, %v7761_v51  ;;  %v176_v21 = vmul.f32 %v9389_v10, %v9352_v48 }
 0x116   :  { %9386 = vst [vmem:[#allocation27_spill] sm:$0xff] %v7777_v63  ;;  %9391 = vst [vmem:[#allocation29_spill] sm:$0xff] %v7798_v16  ;;  %5536 = vmatpush3.bf16.msra.mxu1 %v5535_v32  ;;  %5498 = vmatprep.subr.bf16.mxu0 %v7754_v22  ;;  %v5539_v26 = vpack.c.bf16 %v1899_v15, %v1892_v27  ;;  %v7813_v31 = vand.u32 4294901760, %v228_v44  ;;  %v7816_v1 = vsub.f32 %v224_v42, %v7768_v19  ;;  %v5857_v27 = vld [vmem:[%s8783_s0 + $0x98] sm:$0xff]  ;;  %v9401_v15 = vld [vmem:[#allocation65_spill] sm:$0xff] }
 0x117   :  { %v7806_v38 = vpack.c.bf16 %v9393_v28, %v9392_v46  ;;  %1567 = vmatmul.mubr.f32.gmra.mrb[46].mxu1 %v9396_v35  ;;  %5538 = vmatprep.subr.bf16.mxu1 %v5537_v18  ;;  %v9397_v13 = vand.u32 4294901760, %v7488_v9  ;;  %v9398_v11 = vand.u32 4294901760, %v7497_v59  ;;  %v7825_v46 = vand.u32 4294901760, %v233_v45 }
 0x118   :  { %9395 = vst [vmem:[#allocation63_spill] sm:$0xff] %v7813_v31  ;;  %v7828_v32 = vsub.f32 %v229_v41, %v7779_v12  ;;  %v7833_v42 = vsub.f32 %v5857_v27, %v177_v52  ;;  %v181_v18 = vmul.f32 %v9401_v15, %v9346_v23  ;;  %1400 = vmatmul.mubr.f32.gmra.mrb[42].mxu0 %v9371_v37  ;;  %v8996_v9 = vand.u32 4294901760, %v7793_v6 }
 0x119   :  { %9394 = vst [vmem:[#allocation69_spill] sm:$0xff] %v7806_v38  ;;  %v7823_v0 = vpack.c.bf16 %v9398_v11, %v9397_v13  ;;  %9399 = vst [vmem:[#allocation70_spill] sm:$0xff] %v7825_v46  ;;  %2014 = vmatprep.mubr.f32.mxu1 %v7756_v5  ;;  %v237_v59 = vmul.f32 %v7786_v4, %v7786_v4  ;;  %5500 = vmatpush3.bf16.msra.mxu0 %v7777_v63  ;;  %v9402_v41 = vand.u32 4294901760, %v7516_v40 }
 0x11a   :  { %9400 = vst [vmem:[#allocation30_spill] sm:$0xff] %v7833_v42  ;;  %1405 = vmatprep.mubr.f32.mxu0 %v9373_v36  ;;  %v9403_v10 = vand.u32 4294901760, %v7535_v54  ;;  %v9404_v28 = vand.u32 4294901760, %v7570_v29  ;;  %v9405_v37 = vand.u32 4294901760, %v7585_v62  ;;  %v7856_v11 = vand.u32 4294901760, %v232_v17  ;;  %v5858_v36 = vld [vmem:[%s8783_s0 + $0x90] sm:$0xff]  ;;  %5540 = vmatpush3.bf16.msra.mxu1 %v5539_v26 }
 0x11b   :  { %v236_v27 = vmul.f32 %v7798_v16, %v7798_v16  ;;  %v7863_v40 = vsub.f32 %v5858_v36, %v176_v21  ;;  %v180_v54 = vmul.f32 %v9401_v15, %v9352_v48  ;;  %5502 = vmatprep.subr.bf16.mxu0 %v7806_v38  ;;  %v7870_v29 = vsub.f32 %v228_v44, %v7813_v31  ;;  %v5859_v26 = vld [vmem:[%s8783_s0 + $0xb8] sm:$0xff] }
 0x11c   :  { %v7848_v52 = vpack.c.bf16 %v9403_v10, %v9402_v41  ;;  %v7854_v13 = vpack.c.bf16 %v9405_v37, %v9404_v28  ;;  %9406 = vst [vmem:[#allocation65_spill] sm:$0xff] %v7856_v11  ;;  %v9408_v41 = vld [vmem:[#allocation66_spill] sm:$0xff]  ;;  %5574 = vmatprep.subr.bf16.mxu1 %v7316_v39  ;;  %v9409_v28 = vld [vmem:[#allocation33_spill] sm:$0xff]  ;;  %v9410_v37 = vld [vmem:[#allocation32_spill] sm:$0xff]  ;;  %v7879_v15 = vsub.f32 %v233_v45, %v7825_v46  ;;  %v7890_v4 = vand.u32 4294901760, %v237_v59 }
 0x11d   :  { %9407 = vst [vmem:[#allocation71_spill] sm:$0xff] %v7863_v40  ;;  %v185_v10 = vmul.f32 %v9408_v41, %v9346_v23  ;;  %v5541_v21 = vpack.c.bf16 %v9410_v37, %v9409_v28  ;;  %v7884_v62 = vsub.f32 %v5859_v26, %v181_v18  ;;  %1407 = vmatmul.mubr.f32.gmra.mrb[44].mxu0 %v9383_v60  ;;  %v9413_v18 = vld [vmem:[#allocation31_spill] sm:$0xff]  ;;  %v7900_v60 = vand.u32 4294901760, %v236_v27 }
 0x11e   :  { %v1671_v44 = vsub.f32 %v7793_v6, %v8996_v9  ;;  %9412 = vst [vmem:[#allocation33_spill] sm:$0xff] %v7890_v4  ;;  %v241_v36 = vmul.f32 %v7833_v42, %v7833_v42  ;;  %v184_v45 = vmul.f32 %v9408_v41, %v9352_v48  ;;  %5504 = vmatpush3.bf16.msra.mxu0 %v7823_v0  ;;  %v9414_v26 = vld [vmem:[#allocation67_spill] sm:$0xff]  ;;  %v9417_v41 = vand.u32 4294901760, %v7816_v1 }
 0x11f   :  { %9411 = vst [vmem:[#allocation66_spill] sm:$0xff] %v7884_v62  ;;  %2016 = vmatmul.mubr.f32.vlgmr.msra.gmra.mrb[48].mxu1 %v7768_v19  ;;  %v5543_v16 = vpack.c.bf16 %v9414_v26, %v9413_v18  ;;  %9415 = vst [vmem:[#allocation32_spill] sm:$0xff] %v7900_v60  ;;  %v7903_v43 = vsub.f32 %v232_v17, %v7856_v11  ;;  %v5860_v9 = vld [vmem:[%s8783_s0 + $0xb0] sm:$0xff]  ;;  %1412 = vmatprep.mubr.f32.mxu0 %v9390_v30 }
 0x120   :  { %v7908_v42 = vsub.f32 %v5860_v9, %v180_v54  ;;  %2021 = vmatprep.mubr.f32.mxu1 %v7779_v12  ;;  %v1677_v51 = vsub.f32 %v7816_v1, %v9417_v41  ;;  %v240_v17 = vmul.f32 %v7863_v40, %v7863_v40  ;;  %v7921_v19 = vsub.f32 %v5861_v53, %v185_v10  ;;  %v9419_v9 = vld [vmem:[#allocation68_spill] sm:$0xff]  ;;  %v5862_v12 = vld [vmem:[%s8783_s0 + $0xd0] sm:$0xff] }
 0x121   :  { %v189_v30 = vmul.f32 %v9419_v9, %v9346_v23  ;;  %5576 = vmatpush3.bf16.msra.mxu1 %v7322_v2  ;;  %5506 = vmatprep.subr.bf16.mxu0 %v7848_v52  ;;  %v9420_v54 = vand.u32 4294901760, %v7828_v32  ;;  %v1672_v40 = vand.u32 4294901760, %v1671_v44  ;;  %v7933_v53 = vand.u32 4294901760, %v241_v36 }
 0x122   :  { %9416 = vst [vmem:[#allocation31_spill] sm:$0xff] %v7908_v42  ;;  %9418 = vst [vmem:[#allocation67_spill] sm:$0xff] %v7921_v19  ;;  %1414 = vmatmul.mubr.f32.gmra.mrb[46].mxu0 %v9396_v35  ;;  %5578 = vmatprep.subr.bf16.mxu1 %v7382_v56  ;;  %v7936_v10 = vsub.f32 %v237_v59, %v7890_v4  ;;  %v245_v23 = vmul.f32 %v7884_v62, %v7884_v62  ;;  %v1678_v3 = vand.u32 4294901760, %v1677_v51  ;;  %v9426_v51 = vld [vmem:[#allocation21_spill] sm:$0xff] }
 0x123   :  { %v1686_v41 = vsub.f32 %v7828_v32, %v9420_v54  ;;  %9421 = vst [vmem:[#allocation68_spill] sm:$0xff] %v7933_v53  ;;  %v7943_v54 = vsub.f32 %v5862_v12, %v184_v45  ;;  %v188_v35 = vmul.f32 %v9419_v9, %v9352_v48  ;;  %5508 = vmatpush3.bf16.msra.mxu0 %v7854_v13  ;;  %v9423_v62 = vand.u32 4294901760, %v7870_v29  ;;  %v5863_v9 = vld [vmem:[%s8783_s0 + $0xf8] sm:$0xff] }
 0x124   :  { %2023 = vmatmul.mubr.f32.gmra.mrb[50].mxu1 %v7813_v31  ;;  %v7951_v59 = vsub.f32 %v236_v27, %v7900_v60  ;;  %1673 = vmatprep.mubr.f32.mxu0 %v1672_v40  ;;  %v7957_v45 = vand.u32 4294901760, %v240_v17  ;;  %v244_v48 = vmul.f32 %v7908_v42, %v7908_v42  ;;  %v7964_v44 = vsub.f32 %v5863_v9, %v189_v30  ;;  %v9427_v40 = vld [vmem:[#allocation35_spill] sm:$0xff] }
 0x125   :  { %9422 = vst [vmem:[#allocation72_spill] sm:$0xff] %v7943_v54  ;;  %2028 = vmatprep.mubr.f32.mxu1 %v7825_v46  ;;  %v1692_v12 = vsub.f32 %v7870_v29, %v9423_v62  ;;  %5580 = vmatpush3.bf16.msra.mxu1 %v7388_v50  ;;  %v1687_v27 = vand.u32 4294901760, %v1686_v41  ;;  %v5545_v46 = vpack.c.bf16 %v9427_v40, %v9426_v51  ;;  %v9428_v62 = vand.u32 4294901760, %v7879_v15  ;;  %v5864_v41 = vld [vmem:[%s8783_s0 + $0xf0] sm:$0xff] }
 0x126   :  { %9424 = vst [vmem:[#allocation73_spill] sm:$0xff] %v7957_v45  ;;  %9425 = vst [vmem:[#allocation74_spill] sm:$0xff] %v7964_v44  ;;  %5542 = vmatprep.subr.bf16.mxu0 %v5541_v21  ;;  %1679 = vmatmul.mubr.f32.vlgmr.msra.gmra.mrb[48].mxu0 %v1678_v3  ;;  %v7974_v5 = vand.u32 4294901760, %v245_v23  ;;  %v7977_v30 = vsub.f32 %v241_v36, %v7933_v53  ;;  %v249_v21 = vmul.f32 %v7921_v19, %v7921_v19 }
 0x127   :  { %v1701_v31 = vsub.f32 %v7879_v15, %v9428_v62  ;;  %5582 = vmatprep.subr.bf16.mxu1 %v7449_v55  ;;  %v7984_v9 = vsub.f32 %v5864_v41, %v188_v35  ;;  %5544 = vmatpush3.bf16.msra.mxu0 %v5543_v16  ;;  %v5547_v3 = vpack.c.bf16 %v7161_v49, %v7156_v25  ;;  %v9431_v62 = vand.u32 4294901760, %v7903_v43 }
 0x128   :  { %9429 = vst [vmem:[#allocation21_spill] sm:$0xff] %v7974_v5  ;;  %2030 = vmatmul.mubr.f32.gmra.mrb[52].mxu1 %v7856_v11  ;;  %1688 = vmatprep.mubr.f32.mxu0 %v1687_v27  ;;  %v1693_v19 = vand.u32 4294901760, %v1692_v12  ;;  %v7994_v55 = vand.u32 4294901760, %v244_v48  ;;  %v7997_v35 = vsub.f32 %v240_v17, %v7957_v45  ;;  %v248_v16 = vmul.f32 %v7943_v54, %v7943_v54 }
 0x129   :  { %9430 = vst [vmem:[#allocation35_spill] sm:$0xff] %v7984_v9  ;;  %v1707_v36 = vsub.f32 %v7903_v43, %v9431_v62  ;;  %2035 = vmatprep.mubr.f32.mxu1 %v7890_v4  ;;  %5584 = vmatpush3.bf16.msra.mxu1 %v7481_v20  ;;  %v1702_v41 = vand.u32 4294901760, %v1701_v31  ;;  %v9434_v62 = vld [vmem:[#allocation34_spill] sm:$0xff]  ;;  %v253_v27 = vmul.f32 %v7964_v44, %v7964_v44  ;;  %v9435_v12 = vand.u32 4294901760, %v7936_v10  ;;  %v9438_v44 = vld [vmem:[#allocation37_spill] sm:$0xff] }
 0x12a   :  { %9432 = vst [vmem:[#allocation75_spill] sm:$0xff] %v7994_v55  ;;  %9433 = vst [vmem:[#allocation76_spill] sm:$0xff] %v7997_v35  ;;  %5546 = vmatprep.subr.bf16.mxu0 %v5545_v46  ;;  %v5549_v11 = vpack.c.bf16 %v9434_v62, %v7191_v47  ;;  %1694 = vmatmul.mubr.f32.gmra.mrb[50].mxu0 %v1693_v19  ;;  %v8011_v54 = vand.u32 4294901760, %v249_v21  ;;  %v8014_v46 = vsub.f32 %v245_v23, %v7974_v5  ;;  %v9437_v4 = vld [vmem:[#allocation22_spill] sm:$0xff] }
 0x12b   :  { %5586 = vmatprep.subr.bf16.mxu1 %v7505_v7  ;;  %v1716_v17 = vsub.f32 %v7936_v10, %v9435_v12  ;;  %5548 = vmatpush3.bf16.msra.mxu0 %v5547_v3  ;;  %v1708_v31 = vand.u32 4294901760, %v1707_v36  ;;  %v5551_v19 = vpack.c.bf16 %v9438_v44, %v9437_v4  ;;  %v9439_v7 = vand.u32 4294901760, %v7951_v59  ;;  %v9441_v36 = vld [vmem:[#allocation36_spill] sm:$0xff] }
 0x12c   :  { %9436 = vst [vmem:[#allocation34_spill] sm:$0xff] %v8011_v54  ;;  %2037 = vmatmul.mubr.f32.gmra.mrb[54].mxu1 %v7900_v60  ;;  %1703 = vmatprep.mubr.f32.mxu0 %v1702_v41  ;;  %v8024_v42 = vand.u32 4294901760, %v248_v16  ;;  %v8027_v23 = vsub.f32 %v244_v48, %v7994_v55  ;;  %v252_v3 = vmul.f32 %v7984_v9, %v7984_v9  ;;  %v9442_v60 = vld [vmem:[#allocation23_spill] sm:$0xff]  ;;  %v9444_v12 = vand.u32 4294901760, %v7977_v30 }
 0x12d   :  { %v1722_v20 = vsub.f32 %v7951_v59, %v9439_v7  ;;  %2042 = vmatprep.mubr.f32.mxu1 %v7933_v53  ;;  %5588 = vmatpush3.bf16.msra.mxu1 %v7543_v33  ;;  %v5553_v44 = vpack.c.bf16 %v9442_v60, %v9441_v36  ;;  %v8034_v7 = vand.u32 4294901760, %v253_v27  ;;  %v1717_v41 = vand.u32 4294901760, %v1716_v17  ;;  %v9445_v33 = vld [vmem:[#allocation38_spill] sm:$0xff]  ;;  %v9446_v60 = vld [vmem:[#allocation24_spill] sm:$0xff] }
 0x12e   :  { %9440 = vst [vmem:[#allocation22_spill] sm:$0xff] %v8024_v42  ;;  %5550 = vmatprep.subr.bf16.mxu0 %v5549_v11  ;;  %1709 = vmatmul.mubr.f32.gmra.mrb[52].mxu0 %v1708_v31  ;;  %v1731_v48 = vsub.f32 %v7977_v30, %v9444_v12  ;;  %v8042_v9 = vsub.f32 %v249_v21, %v8011_v54  ;;  %v9447_v17 = vand.u32 4294901760, %v7997_v35  ;;  %v8052_v53 = vand.u32 4294901760, %v252_v3 }
 0x12f   :  { %9443 = vst [vmem:[#allocation77_spill] sm:$0xff] %v8034_v7  ;;  %5590 = vmatprep.subr.bf16.mxu1 %v7710_v14  ;;  %5552 = vmatpush3.bf16.msra.mxu0 %v5551_v19  ;;  %v1723_v11 = vand.u32 4294901760, %v1722_v20  ;;  %v5555_v36 = vpack.c.bf16 %v9446_v60, %v9445_v33  ;;  %v8055_v21 = vsub.f32 %v248_v16, %v8024_v42  ;;  %v9449_v20 = vld [vmem:[#allocation39_spill] sm:$0xff]  ;;  %v9450_v19 = vld [vmem:[#allocation40_spill] sm:$0xff]  ;;  %v9451_v12 = vand.u32 4294901760, %v8014_v46  ;;  %v9456_v16 = vld [vmem:[#allocation45_spill] sm:$0xff] }
 0x130   :  { %2044 = vmatmul.mubr.f32.gmra.mrb[56].mxu1 %v7957_v45  ;;  %1718 = vmatprep.mubr.f32.mxu0 %v1717_v41  ;;  %v1737_v31 = vsub.f32 %v7997_v35, %v9447_v17  ;;  %9448 = vst [vmem:[#allocation38_spill] sm:$0xff] %v8052_v53  ;;  %v5557_v45 = vpack.c.bf16 %v9450_v19, %v9449_v20  ;;  %v1732_v17 = vand.u32 4294901760, %v1731_v48 }
 0x131   :  { %2049 = vmatprep.mubr.f32.mxu1 %v7974_v5  ;;  %5592 = vmatpush3.bf16.msra.mxu1 %v7748_v61  ;;  %v8061_v41 = vsub.f32 %v253_v27, %v8034_v7  ;;  %v1746_v5 = vsub.f32 %v8014_v46, %v9451_v12  ;;  %v9453_v61 = vld [vmem:[#allocation43_spill] sm:$0xff]  ;;  %v8077_v12 = vsub.f32 %v252_v3, %v8052_v53  ;;  %v9458_v3 = vld [vmem:[#allocation48_spill] sm:$0xff] }
 0x132   :  { %5554 = vmatprep.subr.bf16.mxu0 %v5553_v44  ;;  %1724 = vmatmul.mubr.f32.gmra.mrb[54].mxu0 %v1723_v11  ;;  %v9452_v44 = vld [vmem:[#allocation41_spill] sm:$0xff]  ;;  %v1738_v27 = vand.u32 4294901760, %v1737_v31  ;;  %v9454_v11 = vand.u32 4294901760, %v8027_v23 }
 0x133   :  { %5594 = vmatprep.subr.bf16.mxu1 %v7754_v22  ;;  %5556 = vmatpush3.bf16.msra.mxu0 %v5555_v36  ;;  %v5559_v35 = vpack.c.bf16 %v9453_v61, %v9452_v44  ;;  %v9455_v36 = vld [vmem:[#allocation44_spill] sm:$0xff]  ;;  %v1747_v31 = vand.u32 4294901760, %v1746_v5  ;;  %v9459_v22 = vld [vmem:[#allocation61_spill] sm:$0xff] }
 0x134   :  { %2051 = vmatmul.mubr.f32.gmra.mrb[58].mxu1 %v7994_v55  ;;  %1733 = vmatprep.mubr.f32.mxu0 %v1732_v17  ;;  %v1752_v48 = vsub.f32 %v8027_v23, %v9454_v11  ;;  %v5561_v55 = vpack.c.bf16 %v9456_v16, %v9455_v36  ;;  %v9460_v17 = vand.u32 4294901760, %v8055_v21  ;;  %v9465_v5 = vld [vmem:[#allocation64_spill] sm:$0xff] }
 0x135   :  { %2056 = vmatprep.mubr.f32.mxu1 %v8011_v54  ;;  %5596 = vmatpush3.bf16.msra.mxu1 %v7777_v63  ;;  %v9457_v54 = vand.u32 4294901760, %v8042_v9  ;;  %v5563_v63 = vpack.c.bf16 %v9459_v22, %v9458_v3 }
 0x136   :  { %5558 = vmatprep.subr.bf16.mxu0 %v5557_v45  ;;  %1739 = vmatmul.mubr.f32.gmra.mrb[56].mxu0 %v1738_v27  ;;  %v1753_v45 = vand.u32 4294901760, %v1752_v48  ;;  %v1767_v27 = vsub.f32 %v8055_v21, %v9460_v17  ;;  %v5567_v17 = vpack.c.bf16 %v7606_v58, %v7597_v24 }
 0x137   :  { %5598 = vmatprep.subr.bf16.mxu1 %v7806_v38  ;;  %v1761_v11 = vsub.f32 %v8042_v9, %v9457_v54  ;;  %5560 = vmatpush3.bf16.msra.mxu0 %v5559_v35  ;;  %v9461_v54 = vld [vmem:[#allocation50_spill] sm:$0xff]  ;;  %v9463_v35 = vand.u32 4294901760, %v8061_v41 }
 0x138   :  { %2058 = vmatmul.mubr.f32.gmra.mrb[60].mxu1 %v8024_v42  ;;  %1748 = vmatprep.mubr.f32.mxu0 %v1747_v31  ;;  %v9462_v38 = vld [vmem:[#allocation62_spill] sm:$0xff]  ;;  %v1768_v31 = vand.u32 4294901760, %v1767_v27  ;;  %v9467_v27 = vand.u32 4294901760, %v7816_v1 }
 0x139   :  { %2063 = vmatprep.mubr.f32.mxu1 %v8034_v7  ;;  %5600 = vmatpush3.bf16.msra.mxu1 %v7823_v0  ;;  %v5565_v42 = vpack.c.bf16 %v9462_v38, %v9461_v54  ;;  %v1776_v22 = vsub.f32 %v8061_v41, %v9463_v35  ;;  %v1762_v48 = vand.u32 4294901760, %v1761_v11  ;;  %v5569_v7 = vpack.c.bf16 %v7625_v57, %v9465_v5 }
 0x13a   :  { %5562 = vmatprep.subr.bf16.mxu0 %v5561_v55  ;;  %1754 = vmatmul.mubr.f32.gmra.mrb[58].mxu0 %v1753_v45  ;;  %v9464_v55 = vand.u32 4294901760, %v7793_v6  ;;  %v9466_v35 = vand.u32 4294901760, %v8077_v12 }
 0x13b   :  { %5602 = vmatprep.subr.bf16.mxu1 %v7848_v52  ;;  %5564 = vmatpush3.bf16.msra.mxu0 %v5563_v63  ;;  %v1777_v11 = vand.u32 4294901760, %v1776_v22  ;;  %v5571_v63 = vpack.c.bf16 %v7657_v34, %v7647_v8  ;;  %v9470_v22 = vand.u32 4294901760, %v7828_v32 }
 0x13c   :  { %2065 = vmatmul.mubr.f32.gmra.mrb[62].mxu1 %v8052_v53  ;;  %1763 = vmatprep.mubr.f32.mxu0 %v1762_v48  ;;  %v1782_v45 = vsub.f32 %v8077_v12, %v9466_v35  ;;  %v9469_v35 = vand.u32 4294901760, %v9410_v37  ;;  %v9474_v37 = vand.u32 4294901760, %v9426_v51  ;;  %v9481_v51 = vand.u32 4294901760, %v7191_v47 }
 0x13d   :  { %2370 = vmatprep.mubr.f32.mxu1 %v9464_v55  ;;  %5604 = vmatpush3.bf16.msra.mxu1 %v7854_v13  ;;  %v9468_v55 = vand.u32 4294901760, %v9409_v28  ;;  %v9473_v28 = vand.u32 4294901760, %v7870_v29 }
 0x13e   :  { %5566 = vmatprep.subr.bf16.mxu0 %v5565_v42  ;;  %1769 = vmatmul.mubr.f32.gmra.mrb[60].mxu0 %v1768_v31  ;;  %v1783_v48 = vand.u32 4294901760, %v1782_v45  ;;  %v9472_v42 = vand.u32 4294901760, %v9414_v26  ;;  %v9476_v31 = vand.u32 4294901760, %v7879_v15  ;;  %v9484_v45 = vld [vmem:[#allocation46_spill] sm:$0xff] }
 0x13f   :  { %5638 = vmatprep.subr.bf16.mxu1 %v7316_v39  ;;  %5568 = vmatpush3.bf16.msra.mxu0 %v5567_v17  ;;  %v5605_v53 = vpack.c.bf16 %v9469_v35, %v9468_v55  ;;  %v9471_v39 = vand.u32 4294901760, %v9413_v18  ;;  %v9475_v17 = vand.u32 4294901760, %v9427_v40  ;;  %v9479_v18 = vand.u32 4294901760, %v7161_v49 }
 0x140   :  { %1778 = vmatprep.mubr.f32.mxu0 %v1777_v11  ;;  %2374 = vmatmul.mubr.f32.vlgmr.msra.gmra.mrb[64].mxu1 %v9467_v27  ;;  %v9486_v49 = vand.u32 4294901760, %v9437_v4  ;;  %v9496_v4 = vand.u32 4294901760, %v9445_v33  ;;  %v9504_v33 = vld [vmem:[#allocation58_spill] sm:$0xff] }
 0x141   :  { %5570 = vmatprep.subr.bf16.mxu0 %v5569_v7  ;;  %2381 = vmatprep.mubr.f32.mxu1 %v9470_v22  ;;  %v5607_v7 = vpack.c.bf16 %v9472_v42, %v9471_v39  ;;  %v9495_v22 = vld [vmem:[#allocation49_spill] sm:$0xff]  ;;  %v9498_v42 = vld [vmem:[#allocation76_spill] sm:$0xff] }
 0x142   :  { %5640 = vmatpush3.bf16.msra.mxu1 %v7322_v2  ;;  %1784 = vmatmul.mubr.f32.gmra.mrb[62].mxu0 %v1783_v48  ;;  %v5609_v2 = vpack.c.bf16 %v9475_v17, %v9474_v37  ;;  %v9492_v48 = vld [vmem:[#allocation23_spill] sm:$0xff]  ;;  %v9501_v37 = vand.u32 4294901760, %v9450_v19  ;;  %v9507_v19 = vand.u32 4294901760, %v8027_v23 }
 0x143   :  { %5642 = vmatprep.subr.bf16.mxu1 %v7382_v56  ;;  %5572 = vmatpush3.bf16.msra.mxu0 %v5571_v63  ;;  %v9477_v56 = vld [vmem:[#allocation42_spill] sm:$0xff]  ;;  %v9490_v63 = vld [vmem:[#allocation36_spill] sm:$0xff]  ;;  %v9493_v55 = vand.u32 4294901760, %v9492_v48 }
 0x144   :  { %2200 = vmatprep.mubr.f32.mxu0 %v7793_v6  ;;  %2385 = vmatmul.mubr.f32.gmra.mrb[66].mxu1 %v9473_v28  ;;  %v9478_v6 = vand.u32 4294901760, %v7156_v25  ;;  %v9485_v25 = vld [vmem:[#allocation47_spill] sm:$0xff]  ;;  %v9491_v27 = vand.u32 4294901760, %v9490_v63  ;;  %v9500_v28 = vand.u32 4294901760, %v9449_v20 }
 0x145   :  { %5606 = vmatprep.subr.bf16.mxu0 %v5605_v53  ;;  %2392 = vmatprep.mubr.f32.mxu1 %v9476_v31  ;;  %v9480_v53 = vand.u32 4294901760, %v7903_v43  ;;  %v9509_v31 = vand.u32 4294901760, %v9456_v16  ;;  %v9516_v16 = vand.u32 4294901760, %v8055_v21 }
 0x146   :  { %5644 = vmatpush3.bf16.msra.mxu1 %v7388_v50  ;;  %2203 = vmatmul.mubr.f32.vlgmr.msra.gmra.mrb[64].mxu0 %v7816_v1  ;;  %v5611_v26 = vpack.c.bf16 %v9479_v18, %v9478_v6  ;;  %v9482_v50 = vand.u32 4294901760, %v9434_v62  ;;  %v9483_v1 = vand.u32 4294901760, %v7936_v10  ;;  %v9489_v62 = vand.u32 4294901760, %v7951_v59  ;;  %v9511_v6 = vld [vmem:[#allocation27_spill] sm:$0xff] }
 0x147   :  { %5646 = vmatprep.subr.bf16.mxu1 %v9477_v56  ;;  %5608 = vmatpush3.bf16.msra.mxu0 %v5607_v7  ;;  %v5617_v35 = vpack.c.bf16 %v9493_v55, %v9491_v27  ;;  %v9499_v7 = vand.u32 4294901760, %v9498_v42  ;;  %v5621_v17 = vpack.c.bf16 %v9501_v37, %v9500_v28 }
 0x148   :  { %2209 = vmatprep.mubr.f32.mxu0 %v7828_v32  ;;  %2396 = vmatmul.mubr.f32.gmra.mrb[68].mxu1 %v9480_v53  ;;  %v5613_v40 = vpack.c.bf16 %v9482_v50, %v9481_v51  ;;  %v9487_v32 = vld [vmem:[#allocation37_spill] sm:$0xff]  ;;  %v9518_v53 = vand.u32 4294901760, %v9462_v38  ;;  %v9519_v50 = vand.u32 4294901760, %v8061_v41  ;;  %v9522_v38 = vand.u32 4294901760, %v8077_v12 }
 0x149   :  { %5610 = vmatprep.subr.bf16.mxu0 %v5609_v2  ;;  %2403 = vmatprep.mubr.f32.mxu1 %v9483_v1  ;;  %v9488_v11 = vand.u32 4294901760, %v9487_v32  ;;  %v9508_v2 = vand.u32 4294901760, %v9455_v36  ;;  %v9540_v32 = vld [vmem:[#allocation22_spill] sm:$0xff] }
 0x14a   :  { %5648 = vmatpush3.bf16.msra.mxu1 %v9484_v45  ;;  %2212 = vmatmul.mubr.f32.gmra.mrb[66].mxu0 %v7870_v29  ;;  %v9494_v29 = vand.u32 4294901760, %v7977_v30  ;;  %v9537_v45 = vld [vmem:[#allocation21_spill] sm:$0xff] }
 0x14b   :  { %5650 = vmatprep.subr.bf16.mxu1 %v9485_v25  ;;  %5612 = vmatpush3.bf16.msra.mxu0 %v5611_v26  ;;  %v5615_v47 = vpack.c.bf16 %v9488_v11, %v9486_v49  ;;  %v5625_v56 = vpack.c.bf16 %v9509_v31, %v9508_v2  ;;  %v9517_v26 = vand.u32 4294901760, %v9461_v54  ;;  %v9538_v25 = vld [vmem:[#allocation75_spill] sm:$0xff]  ;;  %v9539_v49 = vld [vmem:[#allocation34_spill] sm:$0xff]  ;;  %v9541_v11 = vld [vmem:[#allocation77_spill] sm:$0xff] }
 0x14c   :  { %2218 = vmatprep.mubr.f32.mxu0 %v7879_v15  ;;  %2407 = vmatmul.mubr.f32.gmra.mrb[70].mxu1 %v9489_v62  ;;  %v9497_v15 = vand.u32 4294901760, %v9446_v60  ;;  %v9505_v60 = vand.u32 4294901760, %v9452_v44  ;;  %v9514_v44 = vld [vmem:[#allocation61_spill] sm:$0xff] }
 0x14d   :  { %5614 = vmatprep.subr.bf16.mxu0 %v5613_v40  ;;  %2414 = vmatprep.mubr.f32.mxu1 %v9494_v29  ;;  %v9515_v18 = vand.u32 4294901760, %v9514_v44  ;;  %v5629_v51 = vpack.c.bf16 %v9518_v53, %v9517_v26  ;;  %v9523_v40 = vand.u32 4294901760, %v9465_v5  ;;  %v9529_v5 = vld [vmem:[#allocation28_spill] sm:$0xff] }
 0x14e   :  { %5652 = vmatpush3.bf16.msra.mxu1 %v9495_v22  ;;  %2221 = vmatmul.mubr.f32.gmra.mrb[68].mxu0 %v7903_v43  ;;  %v5619_v39 = vpack.c.bf16 %v9497_v15, %v9496_v4  ;;  %v9502_v43 = vand.u32 4294901760, %v8014_v46 }
 0x14f   :  { %5654 = vmatprep.subr.bf16.mxu1 %v7710_v14  ;;  %5616 = vmatpush3.bf16.msra.mxu0 %v5615_v47  ;;  %v9503_v14 = vld [vmem:[#allocation7_spill] sm:$0xff]  ;;  %v9542_v47 = vld [vmem:[#allocation38_spill] sm:$0xff] }
 0x150   :  { %2227 = vmatprep.mubr.f32.mxu0 %v7936_v10  ;;  %2418 = vmatmul.mubr.f32.gmra.mrb[72].mxu1 %v9499_v7  ;;  %v9506_v10 = vand.u32 4294901760, %v9453_v61  ;;  %v9513_v61 = vand.u32 4294901760, %v9458_v3  ;;  %v9521_v3 = vand.u32 4294901760, %v7606_v58  ;;  %v9526_v58 = vand.u32 4294901760, %v7647_v8  ;;  %v9532_v8 = vld [vmem:[#allocation65_spill] sm:$0xff] }
 0x151   :  { %5618 = vmatprep.subr.bf16.mxu0 %v5617_v35  ;;  %2425 = vmatprep.mubr.f32.mxu1 %v9502_v43 }
 0x152   :  { %5656 = vmatpush3.bf16.msra.mxu1 %v9503_v14  ;;  %2230 = vmatmul.mubr.f32.gmra.mrb[70].mxu0 %v7951_v59  ;;  %v5623_v20 = vpack.c.bf16 %v9506_v10, %v9505_v60  ;;  %v9510_v59 = vand.u32 4294901760, %v8042_v9  ;;  %v5627_v36 = vpack.c.bf16 %v9515_v18, %v9513_v61 }
 0x153   :  { %5658 = vmatprep.subr.bf16.mxu1 %v9504_v33  ;;  %5620 = vmatpush3.bf16.msra.mxu0 %v5619_v39 }
 0x154   :  { %2236 = vmatprep.mubr.f32.mxu0 %v7977_v30  ;;  %2429 = vmatmul.mubr.f32.gmra.mrb[74].mxu1 %v9507_v19  ;;  %v9512_v30 = vld [vmem:[#allocation69_spill] sm:$0xff] }
 0x155   :  { %5622 = vmatprep.subr.bf16.mxu0 %v5621_v17  ;;  %2436 = vmatprep.mubr.f32.mxu1 %v9510_v59 }
 0x156   :  { %5660 = vmatpush3.bf16.msra.mxu1 %v9511_v6  ;;  %2239 = vmatmul.mubr.f32.gmra.mrb[72].mxu0 %v9498_v42 }
 0x157   :  { %5662 = vmatprep.subr.bf16.mxu1 %v9512_v30  ;;  %5624 = vmatpush3.bf16.msra.mxu0 %v5623_v20 }
 0x158   :  { %2245 = vmatprep.mubr.f32.mxu0 %v8014_v46  ;;  %2440 = vmatmul.mubr.f32.gmra.mrb[76].mxu1 %v9516_v16  ;;  %v9520_v46 = vand.u32 4294901760, %v7597_v24  ;;  %v9527_v24 = vand.u32 4294901760, %v7657_v34  ;;  %v9533_v34 = vld [vmem:[#allocation33_spill] sm:$0xff] }
 0x159   :  { %5626 = vmatprep.subr.bf16.mxu0 %v5625_v56  ;;  %2447 = vmatprep.mubr.f32.mxu1 %v9519_v50 }
 0x15a   :  { %5664 = vmatpush3.bf16.msra.mxu1 %v7823_v0  ;;  %2248 = vmatmul.mubr.f32.gmra.mrb[74].mxu0 %v8027_v23  ;;  %v5631_v54 = vpack.c.bf16 %v9521_v3, %v9520_v46  ;;  %v9524_v0 = vand.u32 4294901760, %v7625_v57  ;;  %v9528_v23 = vld [vmem:[#allocation20_spill] sm:$0xff]  ;;  %v9530_v57 = vld [vmem:[#allocation63_spill] sm:$0xff] }
 0x15b   :  { %5666 = vmatprep.subr.bf16.mxu1 %v7848_v52  ;;  %5628 = vmatpush3.bf16.msra.mxu0 %v5627_v36  ;;  %v9525_v52 = vld [vmem:[#allocation26_spill] sm:$0xff] }
 0x15c   :  { %2254 = vmatprep.mubr.f32.mxu0 %v8042_v9  ;;  %2451 = vmatmul.mubr.f32.gmra.mrb[78].mxu1 %v9522_v38  ;;  %v5633_v1 = vpack.c.bf16 %v9524_v0, %v9523_v40  ;;  %v5635_v9 = vpack.c.bf16 %v9527_v24, %v9526_v58 }
 0x15d   :  { %5630 = vmatprep.subr.bf16.mxu0 %v5629_v51  ;;  %2770 = vmatprep.mubr.f32.mxu1 %v9525_v52 }
 0x15e   :  { %5668 = vmatpush3.bf16.msra.mxu1 %v7854_v13  ;;  %2257 = vmatmul.mubr.f32.gmra.mrb[76].mxu0 %v8055_v21  ;;  %v9531_v13 = vld [vmem:[#allocation70_spill] sm:$0xff]  ;;  %v9534_v21 = vld [vmem:[#allocation32_spill] sm:$0xff] }
 0x15f   :  { %5632 = vmatpush3.bf16.msra.mxu0 %v5631_v54  ;;  %2263 = vmatprep.mubr.f32.mxu0 %v8061_v41  ;;  %v9535_v41 = vld [vmem:[#allocation68_spill] sm:$0xff] }
 0x160   :  { %5634 = vmatprep.subr.bf16.mxu0 %v5633_v1 }
 0x161   :  { %2772 = vmatmul.mubr.f32.vlgmr.msra.gmra.mrb[80].mxu1 %v9528_v23 }
 0x162   :  { %2777 = vmatprep.mubr.f32.mxu1 %v9529_v5  ;;  %2266 = vmatmul.mubr.f32.gmra.mrb[78].mxu0 %v8077_v12  ;;  %v9536_v12 = vld [vmem:[#allocation73_spill] sm:$0xff] }
 0x163   :  { %5636 = vmatpush3.bf16.msra.mxu0 %v5635_v9  ;;  %2617 = vmatprep.mubr.f32.mxu0 %v9525_v52 }
 0x165   :  { %2779 = vmatmul.mubr.f32.gmra.mrb[82].mxu1 %v9530_v57 }
 0x166   :  { %2784 = vmatprep.mubr.f32.mxu1 %v9531_v13  ;;  %2619 = vmatmul.mubr.f32.vlgmr.msra.gmra.mrb[80].mxu0 %v9528_v23 }
 0x167   :  { %2624 = vmatprep.mubr.f32.mxu0 %v9529_v5 }
 0x169   :  { %2786 = vmatmul.mubr.f32.gmra.mrb[84].mxu1 %v9532_v8 }
 0x16a   :  { %2791 = vmatprep.mubr.f32.mxu1 %v9533_v34  ;;  %2626 = vmatmul.mubr.f32.gmra.mrb[82].mxu0 %v9530_v57 }
 0x16b   :  { %2631 = vmatprep.mubr.f32.mxu0 %v9531_v13 }
 0x16d   :  { %2793 = vmatmul.mubr.f32.gmra.mrb[86].mxu1 %v9534_v21 }
 0x16e   :  { %2798 = vmatprep.mubr.f32.mxu1 %v9535_v41  ;;  %2633 = vmatmul.mubr.f32.gmra.mrb[84].mxu0 %v9532_v8 }
 0x16f   :  { %2638 = vmatprep.mubr.f32.mxu0 %v9533_v34 }
 0x171   :  { %2800 = vmatmul.mubr.f32.gmra.mrb[88].mxu1 %v9536_v12 }
 0x172   :  { %2805 = vmatprep.mubr.f32.mxu1 %v9537_v45  ;;  %2640 = vmatmul.mubr.f32.gmra.mrb[86].mxu0 %v9534_v21 }
 0x173   :  { %2645 = vmatprep.mubr.f32.mxu0 %v9535_v41 }
 0x175   :  { %2807 = vmatmul.mubr.f32.gmra.mrb[90].mxu1 %v9538_v25 }
 0x176   :  { %2812 = vmatprep.mubr.f32.mxu1 %v9539_v49  ;;  %2647 = vmatmul.mubr.f32.gmra.mrb[88].mxu0 %v9536_v12 }
 0x177   :  { %2652 = vmatprep.mubr.f32.mxu0 %v9537_v45 }
 0x179   :  { %2814 = vmatmul.mubr.f32.gmra.mrb[92].mxu1 %v9540_v32 }
 0x17a   :  { %2819 = vmatprep.mubr.f32.mxu1 %v9541_v11  ;;  %2654 = vmatmul.mubr.f32.gmra.mrb[90].mxu0 %v9538_v25 }
 0x17b   :  { %2659 = vmatprep.mubr.f32.mxu0 %v9539_v49 }
 0x17c   :  { %v4701_v62 = vpop.f32.mrb[0].mxu1 }
 0x17d   :  { %2821 = vmatmul.mubr.f32.gmra.mrb[94].mxu1 %v9542_v47  ;;  %v4702_v63 = vpop.f32.mrb[1].mxu1 }
 0x17e   :  { %2661 = vmatmul.mubr.f32.gmra.mrb[92].mxu0 %v9540_v32  ;;  %v4703_v27 = vadd.f32 %v4702_v63, %v4701_v62 }
 0x17f   :  { %2666 = vmatprep.mubr.f32.mxu0 %v9541_v11 }
 0x181   :  { %v4704_v48 = vpop.f32.mrb[2].mxu1 }
 0x182   :  { %2668 = vmatmul.mubr.f32.gmra.mrb[94].mxu0 %v9542_v47  ;;  %v4705_v55 = vpop.f32.mrb[3].mxu1 }
 0x183   :  { %v4706_v35 = vadd.f32 %v4705_v55, %v4704_v48 }
 0x185   :  { %v4707_v29 = vpop.f32.mrb[4].mxu1 }
 0x186   :  { %v4708_v22 = vpop.f32.mrb[5].mxu1 }
 0x187   :  { %v4709_v4 = vadd.f32 %v4708_v22, %v4707_v29 }
 0x188   :  { %v4645_v15 = vpop.f32.mrb[0].mxu0 }
 0x189   :  { %v4646_v39 = vpop.f32.mrb[1].mxu0 }
 0x18a   :  { %v4647_v42 = vadd.f32 %v4646_v39, %v4645_v15  ;;  %v8290_v15 = vld [vmem:[%s8785_s2 + $0x8] sm:$0xff]  ;;  %v8295_v39 = vld [vmem:[%s8785_s2 + $0x18] sm:$0xff] }
 0x18b   :  { %v4710_v7 = vpop.f32.mrb[6].mxu1 }
 0x18c   :  { %v427_v28 = vadd.f32 1e-05, %v4647_v42  ;;  %v4711_v37 = vpop.f32.mrb[7].mxu1  ;;  %v8300_v42 = vld [vmem:[%s8785_s2] sm:$0xff] }
 0x18d   :  { %v4712_v17 = vadd.f32 %v4711_v37, %v4710_v7  ;;  %v8306_v37 = vand.u32 4294901760, %v8295_v39 }
 0x18e   :  { %v8273_v43 = vadd.f32 %v4703_v27, %v427_v28  ;;  %v8303_v28 = vand.u32 4294901760, %v8290_v15 }
 0x18f   :  { %v4648_v14 = vpop.f32.mrb[2].mxu0  ;;  %3672 = vmatprep.subr.mxu1 %v8306_v37 }
 0x190   :  { %v4649_v33 = vpop.f32.mrb[3].mxu0  ;;  %v4713_v60 = vpop.f32.mrb[8].mxu1  ;;  %2864 = vmatprep.subr.mxu0 %v8303_v28 }
 0x191   :  { %v4650_v10 = vadd.f32 %v4649_v33, %v4648_v14  ;;  %v4714_v20 = vpop.f32.mrb[9].mxu1  ;;  %v8314_v14 = vld [vmem:[%s8785_s2 + $0x10] sm:$0xff] }
 0x192   :  { %v4715_v19 = vadd.f32 %v4714_v20, %v4713_v60  ;;  %v8319_v20 = vand.u32 4294901760, %v8314_v14 }
 0x193   :  { %v442_v2 = vadd.f32 1e-05, %v4650_v10 }
 0x194   :  { %v4651_v31 = vpop.f32.mrb[4].mxu0  ;;  %3674 = vmatpush1.msra.mxu1 %v8319_v20 }
 0x195   :  { %v4652_v56 = vpop.f32.mrb[5].mxu0  ;;  %v4716_v59 = vpop.f32.mrb[10].mxu1  ;;  %v8275_v6 = vadd.f32 %v4706_v35, %v442_v2 }
 0x196   :  { %v4653_v30 = vadd.f32 %v4652_v56, %v4651_v31  ;;  %v4717_v61 = vpop.f32.mrb[11].mxu1 }
 0x197   :  { %v4718_v44 = vadd.f32 %v4717_v61, %v4716_v59 }
 0x198   :  { %v457_v18 = vadd.f32 1e-05, %v4653_v30  ;;  %v4654_v36 = vpop.f32.mrb[6].mxu0 }
 0x199   :  { %v4655_v16 = vpop.f32.mrb[7].mxu0 }
 0x19a   :  { %v4719_v26 = vpop.f32.mrb[12].mxu1  ;;  %v8277_v53 = vadd.f32 %v4709_v4, %v457_v18  ;;  %v4656_v51 = vadd.f32 %v4655_v16, %v4654_v36 }
 0x19b   :  { %v4720_v50 = vpop.f32.mrb[13].mxu1 }
 0x19c   :  { %v4721_v46 = vadd.f32 %v4720_v50, %v4719_v26  ;;  %v472_v3 = vadd.f32 1e-05, %v4656_v51  ;;  %v4657_v54 = vpop.f32.mrb[8].mxu0 }
 0x19d   :  { %v4658_v38 = vpop.f32.mrb[9].mxu0 }
 0x19e   :  { %v4722_v40 = vpop.f32.mrb[14].mxu1  ;;  %v8279_v0 = vadd.f32 %v4712_v17, %v472_v3  ;;  %v4659_v1 = vadd.f32 %v4658_v38, %v4657_v54  ;;  %v8309_v17 = vand.u32 4294901760, %v8300_v42 }
 0x19f   :  { %v4723_v52 = vpop.f32.mrb[15].mxu1 }
 0x1a0   :  { %v4724_v58 = vadd.f32 %v4723_v52, %v4722_v40  ;;  %v487_v24 = vadd.f32 1e-05, %v4659_v1  ;;  %v4660_v9 = vpop.f32.mrb[10].mxu0  ;;  %2866 = vmatpush1.msra.mxu0 %v8309_v17 }
 0x1a1   :  { %v4661_v23 = vpop.f32.mrb[11].mxu0 }
 0x1a2   :  { %v8281_v5 = vadd.f32 %v4715_v19, %v487_v24  ;;  %v4662_v57 = vadd.f32 %v4661_v23, %v4660_v9 }
 0x1a3   :  { %v4813_v13 = vpop.f32.mrb[16].mxu1 }
 0x1a4   :  { %v4814_v8 = vpop.f32.mrb[17].mxu1  ;;  %v502_v34 = vadd.f32 1e-05, %v4662_v57 }
 0x1a5   :  { %v4663_v21 = vpop.f32.mrb[12].mxu0  ;;  %v4815_v41 = vadd.f32 %v4814_v8, %v4813_v13 }
 0x1a6   :  { %v4664_v12 = vpop.f32.mrb[13].mxu0  ;;  %v8283_v45 = vadd.f32 %v4718_v44, %v502_v34 }
 0x1a7   :  { %v4665_v25 = vadd.f32 %v4664_v12, %v4663_v21  ;;  %v4816_v49 = vpop.f32.mrb[18].mxu1 }
 0x1a8   :  { %v4817_v32 = vpop.f32.mrb[19].mxu1 }
 0x1a9   :  { %v517_v11 = vadd.f32 1e-05, %v4665_v25  ;;  %v4666_v47 = vpop.f32.mrb[14].mxu0  ;;  %v4818_v62 = vadd.f32 %v4817_v32, %v4816_v49 }
 0x1aa   :  { %v4667_v63 = vpop.f32.mrb[15].mxu0 }
 0x1ab   :  { %v8285_v27 = vadd.f32 %v4721_v46, %v517_v11  ;;  %v4668_v48 = vadd.f32 %v4667_v63, %v4666_v47  ;;  %v4819_v55 = vpop.f32.mrb[20].mxu1 }
 0x1ac   :  { %v4820_v35 = vpop.f32.mrb[21].mxu1 }
 0x1ad   :  { %v532_v29 = vadd.f32 1e-05, %v4668_v48  ;;  %v4757_v22 = vpop.f32.mrb[16].mxu0  ;;  %v4821_v4 = vadd.f32 %v4820_v35, %v4819_v55 }
 0x1ae   :  { %v4758_v7 = vpop.f32.mrb[17].mxu0 }
 0x1af   :  { %v8316_v33 = vadd.f32 %v4724_v58, %v532_v29  ;;  %v4759_v60 = vadd.f32 %v4758_v7, %v4757_v22 }
 0x1b1   :  { %v4822_v10 = vpop.f32.mrb[22].mxu1  ;;  %v951_v2 = vadd.f32 %v4759_v60, %v8273_v43  ;;  %v4760_v31 = vpop.f32.mrb[18].mxu0 }
 0x1b2   :  { %v4823_v19 = vpop.f32.mrb[23].mxu1  ;;  %v4761_v59 = vpop.f32.mrb[19].mxu0 }
 0x1b3   :  { %v4824_v56 = vadd.f32 %v4823_v19, %v4822_v10  ;;  %v4762_v30 = vadd.f32 %v4761_v59, %v4760_v31  ;;  %v1122_v44 = vadd.f32 %v4815_v41, %v951_v2 }
 0x1b5   :  { %v4825_v61 = vpop.f32.mrb[24].mxu1  ;;  %v960_v36 = vadd.f32 %v4762_v30, %v8275_v6 }
 0x1b6   :  { %v4826_v18 = vpop.f32.mrb[25].mxu1  ;;  %v4763_v16 = vpop.f32.mrb[20].mxu0 }
 0x1b7   :  { %v4827_v26 = vadd.f32 %v4826_v18, %v4825_v61  ;;  %v4764_v51 = vpop.f32.mrb[21].mxu0  ;;  %v8327_v3 = vadd.f32 %v4818_v62, %v960_v36 }
 0x1b8   :  { %v4765_v50 = vadd.f32 %v4764_v51, %v4763_v16 }
 0x1ba   :  { %v4828_v46 = vpop.f32.mrb[26].mxu1  ;;  %v969_v54 = vadd.f32 %v4765_v50, %v8277_v53  ;;  %v4766_v38 = vpop.f32.mrb[22].mxu0  ;;  %v8349_v50 = vsub.f32 %v8290_v15, %v8303_v28 }
 0x1bb   :  { %v4829_v43 = vpop.f32.mrb[27].mxu1  ;;  %v4767_v1 = vpop.f32.mrb[23].mxu0 }
 0x1bc   :  { %v4830_v40 = vadd.f32 %v4829_v43, %v4828_v46  ;;  %v4768_v52 = vadd.f32 %v4767_v1, %v4766_v38  ;;  %v8330_v24 = vadd.f32 %v4821_v4, %v969_v54  ;;  %v8353_v46 = vsub.f32 %v8295_v39, %v8306_v37 }
 0x1bd   :  { %v5889_v54 = vmov 0.0  }
 0x1be   :  { %v4831_v58 = vpop.f32.mrb[28].mxu1  ;;  %v978_v6 = vadd.f32 %v4768_v52, %v8279_v0  ;;  %v4769_v23 = vpop.f32.mrb[24].mxu0  ;;  %2929 = vmatprep.mubr.f32.mxu0 %v5889_v54  ;;  %3737 = vmatprep.mubr.f32.mxu1 %v5889_v54  ;;  %v3828_v1 = vand.u32 4294901760, %v8353_v46 }
 0x1bf   :  { %v4832_v9 = vpop.f32.mrb[29].mxu1  ;;  %v4770_v13 = vpop.f32.mrb[25].mxu0 }
 0x1c0   :  { %v4833_v57 = vadd.f32 %v4832_v9, %v4831_v58  ;;  %v4771_v8 = vadd.f32 %v4770_v13, %v4769_v23  ;;  %v8333_v21 = vadd.f32 %v4824_v56, %v978_v6  ;;  %v3829_v6 = vsub.f32 %v8353_v46, %v3828_v1 }
 0x1c2   :  { %v987_v53 = vadd.f32 %v4771_v8, %v8281_v5 }
 0x1c3   :  { %v4772_v12 = vpop.f32.mrb[26].mxu0 }
 0x1c4   :  { %v4773_v49 = vpop.f32.mrb[27].mxu0  ;;  %v8336_v11 = vadd.f32 %v4827_v26, %v987_v53 }
 0x1c5   :  { %v4834_v34 = vpop.f32.mrb[30].mxu1  ;;  %v4774_v32 = vadd.f32 %v4773_v49, %v4772_v12 }
 0x1c6   :  { %v4835_v41 = vpop.f32.mrb[31].mxu1 }
 0x1c7   :  { %v4836_v25 = vadd.f32 %v4835_v41, %v4834_v34  ;;  %v996_v62 = vadd.f32 %v4774_v32, %v8283_v45  ;;  %v4775_v0 = vpop.f32.mrb[28].mxu0  ;;  %v3830_v41 = vand.u32 4294901760, %v3829_v6 }
 0x1c8   :  { %v4776_v48 = vpop.f32.mrb[29].mxu0 }
 0x1c9   :  { %v4777_v35 = vadd.f32 %v4776_v48, %v4775_v0  ;;  %v8339_v29 = vadd.f32 %v4830_v40, %v996_v62  ;;  %3831 = vmatprep.subr.mxu1 %v3830_v41 }
 0x1cb   :  { %v4925_v47 = vpop.f32.mrb[32].mxu1  ;;  %v1005_v4 = vadd.f32 %v4777_v35, %v8285_v27 }
 0x1cc   :  { %v4926_v63 = vpop.f32.mrb[33].mxu1 }
 0x1cd   :  { %v4927_v55 = vadd.f32 %v4926_v63, %v4925_v47  ;;  %v4778_v5 = vpop.f32.mrb[30].mxu0  ;;  %v8342_v2 = vadd.f32 %v4833_v57, %v1005_v4 }
 0x1ce   :  { %v4779_v60 = vpop.f32.mrb[31].mxu0 }
 0x1cf   :  { %v4928_v22 = vpop.f32.mrb[34].mxu1  ;;  %v4780_v19 = vadd.f32 %v4779_v60, %v4778_v5 }
 0x1d0   :  { %v4929_v7 = vpop.f32.mrb[35].mxu1 }
 0x1d1   :  { %v4930_v10 = vadd.f32 %v4929_v7, %v4928_v22  ;;  %v1014_v45 = vadd.f32 %v4780_v19, %v8316_v33 }
 0x1d3   :  { %v4931_v31 = vpop.f32.mrb[36].mxu1  ;;  %v4869_v56 = vpop.f32.mrb[32].mxu0  ;;  %v8345_v36 = vadd.f32 %v4836_v25, %v1014_v45 }
 0x1d4   :  { %v4932_v59 = vpop.f32.mrb[37].mxu1  ;;  %v4870_v30 = vpop.f32.mrb[33].mxu0 }
 0x1d5   :  { %v4933_v61 = vadd.f32 %v4932_v59, %v4931_v31  ;;  %v4871_v18 = vadd.f32 %v4870_v30, %v4869_v56 }
 0x1d7   :  { %v4934_v16 = vpop.f32.mrb[38].mxu1  ;;  %v1367_v26 = vadd.f32 %v4871_v18, %v1122_v44  ;;  %v3020_v44 = vand.u32 4294901760, %v8349_v50 }
 0x1d8   :  { %v4872_v27 = vpop.f32.mrb[34].mxu0  ;;  %v4935_v51 = vpop.f32.mrb[39].mxu1 }
 0x1d9   :  { %v4873_v33 = vpop.f32.mrb[35].mxu0  ;;  %v4936_v43 = vadd.f32 %v4935_v51, %v4934_v16  ;;  %v8357_v40 = vadd.f32 %v4927_v55, %v1367_v26  ;;  %v3021_v9 = vsub.f32 %v8349_v50, %v3020_v44 }
 0x1da   :  { %v4874_v38 = vadd.f32 %v4873_v33, %v4872_v27 }
 0x1db   :  { %v3022_v34 = vand.u32 4294901760, %v3021_v9 }
 0x1dc   :  { %v4937_v15 = vpop.f32.mrb[40].mxu1  ;;  %v1374_v52 = vadd.f32 %v4874_v38, %v8327_v3  ;;  %v4875_v58 = vpop.f32.mrb[36].mxu0 }
 0x1dd   :  { %v4938_v39 = vpop.f32.mrb[41].mxu1  ;;  %v4876_v23 = vpop.f32.mrb[37].mxu0  ;;  %3023 = vmatprep.subr.mxu0 %v3022_v34 }
 0x1de   :  { %v4939_v57 = vadd.f32 %v4938_v39, %v4937_v15  ;;  %v4877_v13 = vadd.f32 %v4876_v23, %v4875_v58  ;;  %v1527_v8 = vadd.f32 %v4930_v10, %v1374_v52 }
 0x1e0   :  { %v4940_v53 = vpop.f32.mrb[42].mxu1  ;;  %v1381_v12 = vadd.f32 %v4877_v13, %v8330_v24 }
 0x1e1   :  { %v4878_v3 = vpop.f32.mrb[38].mxu0  ;;  %v4941_v25 = vpop.f32.mrb[43].mxu1 }
 0x1e2   :  { %v4879_v49 = vpop.f32.mrb[39].mxu0  ;;  %v4942_v32 = vadd.f32 %v4941_v25, %v4940_v53  ;;  %v1534_v62 = vadd.f32 %v4933_v61, %v1381_v12 }
 0x1e3   :  { %v4880_v47 = vadd.f32 %v4879_v49, %v4878_v3 }
 0x1e4   :  { %v4943_v0 = vpop.f32.mrb[44].mxu1 }
 0x1e5   :  { %v1388_v63 = vadd.f32 %v4880_v47, %v8333_v21  ;;  %v4881_v48 = vpop.f32.mrb[40].mxu0  ;;  %v4944_v55 = vpop.f32.mrb[45].mxu1 }
 0x1e6   :  { %v4882_v35 = vpop.f32.mrb[41].mxu0  ;;  %v4945_v22 = vadd.f32 %v4944_v55, %v4943_v0 }
 0x1e7   :  { %v4883_v4 = vadd.f32 %v4882_v35, %v4881_v48  ;;  %v1541_v5 = vadd.f32 %v4936_v43, %v1388_v63 }
 0x1e9   :  { %v1395_v24 = vadd.f32 %v4883_v4, %v8336_v11 }
 0x1ea   :  { %v4946_v7 = vpop.f32.mrb[46].mxu1 }
 0x1eb   :  { %v4884_v60 = vpop.f32.mrb[42].mxu0  ;;  %v4947_v10 = vpop.f32.mrb[47].mxu1  ;;  %v1548_v56 = vadd.f32 %v4939_v57, %v1395_v24 }
 0x1ec   :  { %v4885_v19 = vpop.f32.mrb[43].mxu0  ;;  %v4948_v31 = vadd.f32 %v4947_v10, %v4946_v7 }
 0x1ed   :  { %v4886_v45 = vadd.f32 %v4885_v19, %v4884_v60 }
 0x1ef   :  { %v1402_v59 = vadd.f32 %v4886_v45, %v8339_v29 }
 0x1f0   :  { %v4887_v30 = vpop.f32.mrb[44].mxu0 }
 0x1f1   :  { %v4888_v21 = vpop.f32.mrb[45].mxu0  ;;  %v1555_v26 = vadd.f32 %v4942_v32, %v1402_v59 }
 0x1f2   :  { %v5037_v61 = vpop.f32.mrb[48].mxu1  ;;  %v4889_v18 = vadd.f32 %v4888_v21, %v4887_v30 }
 0x1f3   :  { %v5038_v16 = vpop.f32.mrb[49].mxu1 }
 0x1f4   :  { %v5039_v27 = vadd.f32 %v5038_v16, %v5037_v61  ;;  %v1409_v51 = vadd.f32 %v4889_v18, %v8342_v2 }
 0x1f5   :  { %v4890_v33 = vpop.f32.mrb[46].mxu0 }
 0x1f6   :  { %v4891_v11 = vpop.f32.mrb[47].mxu0  ;;  %v1562_v52 = vadd.f32 %v4945_v22, %v1409_v51 }
 0x1f7   :  { %v5040_v43 = vpop.f32.mrb[50].mxu1  ;;  %v4892_v38 = vadd.f32 %v4891_v11, %v4890_v33 }
 0x1f8   :  { %v5041_v15 = vpop.f32.mrb[51].mxu1 }
 0x1f9   :  { %v5042_v58 = vadd.f32 %v5041_v15, %v5040_v43  ;;  %v1416_v39 = vadd.f32 %v4892_v38, %v8345_v36  ;;  %v4981_v9 = vpop.f32.mrb[48].mxu0 }
 0x1fa   :  { %v4982_v6 = vpop.f32.mrb[49].mxu0 }
 0x1fb   :  { %v5043_v29 = vpop.f32.mrb[52].mxu1  ;;  %v4983_v23 = vadd.f32 %v4982_v6, %v4981_v9  ;;  %v1569_v13 = vadd.f32 %v4948_v31, %v1416_v39 }
 0x1fc   :  { %v5044_v57 = vpop.f32.mrb[53].mxu1 }
 0x1fd   :  { %v5045_v34 = vadd.f32 %v5044_v57, %v5043_v29  ;;  %v1681_v41 = vadd.f32 %v4983_v23, %v8357_v40  ;;  %v4984_v53 = vpop.f32.mrb[50].mxu0 }
 0x1fe   :  { %v4985_v12 = vpop.f32.mrb[51].mxu0 }
 0x1ff   :  { %v5046_v2 = vpop.f32.mrb[54].mxu1  ;;  %v4986_v3 = vadd.f32 %v4985_v12, %v4984_v53  ;;  %v2018_v49 = vadd.f32 %v5039_v27, %v1681_v41 }
 0x200   :  { %v5047_v25 = vpop.f32.mrb[55].mxu1 }
 0x201   :  { %v5048_v32 = vadd.f32 %v5047_v25, %v5046_v2  ;;  %v1696_v47 = vadd.f32 %v4986_v3, %v1527_v8  ;;  %v4987_v0 = vpop.f32.mrb[52].mxu0 }
 0x202   :  { %v4988_v36 = vpop.f32.mrb[53].mxu0 }
 0x203   :  { %v5049_v63 = vpop.f32.mrb[56].mxu1  ;;  %v4989_v48 = vadd.f32 %v4988_v36, %v4987_v0  ;;  %v2025_v35 = vadd.f32 %v5042_v58, %v1696_v47 }
 0x204   :  { %v5050_v55 = vpop.f32.mrb[57].mxu1 }
 0x205   :  { %v5051_v22 = vadd.f32 %v5050_v55, %v5049_v63  ;;  %v1711_v4 = vadd.f32 %v4989_v48, %v1534_v62  ;;  %v4990_v7 = vpop.f32.mrb[54].mxu0 }
 0x206   :  { %v4991_v60 = vpop.f32.mrb[55].mxu0 }
 0x207   :  { %v5052_v24 = vpop.f32.mrb[58].mxu1  ;;  %v4992_v40 = vadd.f32 %v4991_v60, %v4990_v7  ;;  %v2032_v19 = vadd.f32 %v5045_v34, %v1711_v4 }
 0x208   :  { %v5053_v10 = vpop.f32.mrb[59].mxu1 }
 0x209   :  { %v5054_v31 = vadd.f32 %v5053_v10, %v5052_v24  ;;  %v1726_v45 = vadd.f32 %v4992_v40, %v1541_v5  ;;  %v4993_v59 = vpop.f32.mrb[56].mxu0 }
 0x20a   :  { %v4994_v61 = vpop.f32.mrb[57].mxu0 }
 0x20b   :  { %v5055_v30 = vpop.f32.mrb[60].mxu1  ;;  %v4995_v8 = vadd.f32 %v4994_v61, %v4993_v59  ;;  %v2039_v18 = vadd.f32 %v5048_v32, %v1726_v45 }
 0x20c   :  { %v5056_v21 = vpop.f32.mrb[61].mxu1 }
 0x20d   :  { %v5057_v16 = vadd.f32 %v5056_v21, %v5055_v30  ;;  %v1741_v27 = vadd.f32 %v4995_v8, %v1548_v56  ;;  %v4996_v51 = vpop.f32.mrb[58].mxu0 }
 0x20e   :  { %v4997_v43 = vpop.f32.mrb[59].mxu0 }
 0x20f   :  { %v5058_v33 = vpop.f32.mrb[62].mxu1  ;;  %v4998_v62 = vadd.f32 %v4997_v43, %v4996_v51  ;;  %v2046_v38 = vadd.f32 %v5051_v22, %v1741_v27 }
 0x210   :  { %v5059_v11 = vpop.f32.mrb[63].mxu1 }
 0x211   :  { %v5060_v15 = vadd.f32 %v5059_v11, %v5058_v33  ;;  %v1756_v58 = vadd.f32 %v4998_v62, %v1555_v26  ;;  %v4999_v39 = vpop.f32.mrb[60].mxu0 }
 0x212   :  { %v5000_v9 = vpop.f32.mrb[61].mxu0 }
 0x213   :  { %v5149_v29 = vpop.f32.mrb[64].mxu1  ;;  %v5001_v5 = vadd.f32 %v5000_v9, %v4999_v39  ;;  %v2053_v6 = vadd.f32 %v5054_v31, %v1756_v58 }
 0x214   :  { %v5150_v23 = vpop.f32.mrb[65].mxu1 }
 0x215   :  { %v1771_v57 = vadd.f32 %v5001_v5, %v1562_v52  ;;  %v5151_v34 = vadd.f32 %v5150_v23, %v5149_v29  ;;  %v5002_v41 = vpop.f32.mrb[62].mxu0 }
 0x216   :  { %v5003_v53 = vpop.f32.mrb[63].mxu0 }
 0x217   :  { %v5152_v2 = vpop.f32.mrb[66].mxu1  ;;  %v5004_v56 = vadd.f32 %v5003_v53, %v5002_v41  ;;  %v2060_v12 = vadd.f32 %v5057_v16, %v1771_v57 }
 0x218   :  { %v5153_v3 = vpop.f32.mrb[67].mxu1 }
 0x219   :  { %v1786_v25 = vadd.f32 %v5004_v56, %v1569_v13  ;;  %v5154_v32 = vadd.f32 %v5153_v3, %v5152_v2  ;;  %v5093_v47 = vpop.f32.mrb[64].mxu0 }
 0x21a   :  { %v5094_v0 = vpop.f32.mrb[65].mxu0 }
 0x21b   :  { %v5155_v63 = vpop.f32.mrb[68].mxu1  ;;  %v5095_v26 = vadd.f32 %v5094_v0, %v5093_v47  ;;  %v2067_v36 = vadd.f32 %v5060_v15, %v1786_v25 }
 0x21c   :  { %v5156_v48 = vpop.f32.mrb[69].mxu1 }
 0x21d   :  { %v2205_v55 = vadd.f32 %v5095_v26, %v2018_v49  ;;  %v5157_v22 = vadd.f32 %v5156_v48, %v5155_v63  ;;  %v5096_v4 = vpop.f32.mrb[66].mxu0 }
 0x21e   :  { %v5097_v7 = vpop.f32.mrb[67].mxu0 }
 0x21f   :  { %v5158_v52 = vpop.f32.mrb[70].mxu1  ;;  %v5098_v24 = vadd.f32 %v5097_v7, %v5096_v4  ;;  %v2376_v60 = vadd.f32 %v5151_v34, %v2205_v55 }
 0x220   :  { %v5159_v40 = vpop.f32.mrb[71].mxu1 }
 0x221   :  { %v2214_v10 = vadd.f32 %v5098_v24, %v2025_v35  ;;  %v5160_v31 = vadd.f32 %v5159_v40, %v5158_v52  ;;  %v5099_v45 = vpop.f32.mrb[68].mxu0 }
 0x222   :  { %v5100_v59 = vpop.f32.mrb[69].mxu0 }
 0x223   :  { %v5161_v13 = vpop.f32.mrb[72].mxu1  ;;  %v5101_v30 = vadd.f32 %v5100_v59, %v5099_v45  ;;  %v2387_v61 = vadd.f32 %v5154_v32, %v2214_v10 }
 0x224   :  { %v5162_v8 = vpop.f32.mrb[73].mxu1 }
 0x225   :  { %v2223_v21 = vadd.f32 %v5101_v30, %v2032_v19  ;;  %v5163_v16 = vadd.f32 %v5162_v8, %v5161_v13  ;;  %v5102_v27 = vpop.f32.mrb[70].mxu0 }
 0x226   :  { %v5103_v51 = vpop.f32.mrb[71].mxu0 }
 0x227   :  { %v5164_v49 = vpop.f32.mrb[74].mxu1  ;;  %v5104_v33 = vadd.f32 %v5103_v51, %v5102_v27  ;;  %v2398_v43 = vadd.f32 %v5157_v22, %v2223_v21 }
 0x228   :  { %v5165_v62 = vpop.f32.mrb[75].mxu1 }
 0x229   :  { %v2232_v11 = vadd.f32 %v5104_v33, %v2039_v18  ;;  %v5166_v15 = vadd.f32 %v5165_v62, %v5164_v49  ;;  %v5105_v58 = vpop.f32.mrb[72].mxu0 }
 0x22a   :  { %v5106_v39 = vpop.f32.mrb[73].mxu0 }
 0x22b   :  { %v5167_v35 = vpop.f32.mrb[76].mxu1  ;;  %v5107_v9 = vadd.f32 %v5106_v39, %v5105_v58  ;;  %v8375_v29 = vadd.f32 %v5160_v31, %v2232_v11 }
 0x22c   :  { %v5168_v5 = vpop.f32.mrb[77].mxu1 }
 0x22d   :  { %v2241_v23 = vadd.f32 %v5107_v9, %v2046_v38  ;;  %v5169_v57 = vadd.f32 %v5168_v5, %v5167_v35  ;;  %v5108_v34 = vpop.f32.mrb[74].mxu0 }
 0x22e   :  { %v5109_v19 = vpop.f32.mrb[75].mxu0 }
 0x22f   :  { %v5170_v41 = vpop.f32.mrb[78].mxu1  ;;  %v5110_v53 = vadd.f32 %v5109_v19, %v5108_v34  ;;  %v8377_v2 = vadd.f32 %v5163_v16, %v2241_v23 }
 0x230   :  { %v5171_v56 = vpop.f32.mrb[79].mxu1 }
 0x231   :  { %v2250_v3 = vadd.f32 %v5110_v53, %v2053_v6  ;;  %v5172_v25 = vadd.f32 %v5171_v56, %v5170_v41  ;;  %v5111_v18 = vpop.f32.mrb[76].mxu0  ;;  %v8387_v53 = vsub.f32 %v8300_v42, %v8309_v17 }
 0x232   :  { %v5112_v32 = vpop.f32.mrb[77].mxu0 }
 0x233   :  { %v5113_v0 = vadd.f32 %v5112_v32, %v5111_v18  ;;  %v8379_v63 = vadd.f32 %v5166_v15, %v2250_v3 }
 0x234   :  { %v5261_v47 = vpop.f32.mrb[80].mxu1 }
 0x235   :  { %v5262_v26 = vpop.f32.mrb[81].mxu1  ;;  %v2259_v48 = vadd.f32 %v5113_v0, %v2060_v12  ;;  %v5114_v38 = vpop.f32.mrb[78].mxu0 }
 0x236   :  { %v5263_v55 = vadd.f32 %v5262_v26, %v5261_v47  ;;  %v5115_v22 = vpop.f32.mrb[79].mxu0 }
 0x237   :  { %v5116_v7 = vadd.f32 %v5115_v22, %v5114_v38  ;;  %v8381_v52 = vadd.f32 %v5169_v57, %v2259_v48 }
 0x238   :  { %v5264_v4 = vpop.f32.mrb[82].mxu1 }
 0x239   :  { %v5265_v24 = vpop.f32.mrb[83].mxu1  ;;  %v2268_v40 = vadd.f32 %v5116_v7, %v2067_v36  ;;  %v5205_v6 = vpop.f32.mrb[80].mxu0 }
 0x23a   :  { %v5266_v10 = vadd.f32 %v5265_v24, %v5264_v4  ;;  %v5206_v31 = vpop.f32.mrb[81].mxu0 }
 0x23b   :  { %v5207_v59 = vadd.f32 %v5206_v31, %v5205_v6  ;;  %v8383_v13 = vadd.f32 %v5172_v25, %v2268_v40 }
 0x23c   :  { %v5267_v45 = vpop.f32.mrb[84].mxu1 }
 0x23d   :  { %v5268_v30 = vpop.f32.mrb[85].mxu1  ;;  %v2621_v8 = vadd.f32 %v5207_v59, %v2376_v60  ;;  %v5208_v12 = vpop.f32.mrb[82].mxu0 }
 0x23e   :  { %v5269_v21 = vadd.f32 %v5268_v30, %v5267_v45  ;;  %v5209_v16 = vpop.f32.mrb[83].mxu0 }
 0x23f   :  { %v2774_v27 = vadd.f32 %v5263_v55, %v2621_v8  ;;  %v5210_v49 = vadd.f32 %v5209_v16, %v5208_v12  ;;  %v3026_v55 = vand.u32 4294901760, %v8387_v53 }
 0x240   :  { %v5270_v51 = vpop.f32.mrb[86].mxu1 }
 0x241   :  { %v5271_v33 = vpop.f32.mrb[87].mxu1  ;;  %5833 = vrsqrt.f32 %v2774_v27  ;;  %v2628_v62 = vadd.f32 %v5210_v49, %v2387_v61  ;;  %v5211_v36 = vpop.f32.mrb[84].mxu0  ;;  %v8391_v61 = vsub.f32 %v8314_v14, %v8319_v20  ;;  %v3027_v59 = vsub.f32 %v8387_v53, %v3026_v55 }
 0x242   :  { %v5272_v11 = vadd.f32 %v5271_v33, %v5270_v51  ;;  %v5212_v15 = vpop.f32.mrb[85].mxu0 }
 0x243   :  { %v2781_v58 = vadd.f32 %v5266_v10, %v2628_v62  ;;  %v5213_v35 = vadd.f32 %v5212_v15, %v5211_v36  ;;  %v3834_v14 = vand.u32 4294901760, %v8391_v61  ;;  %v3028_v36 = vand.u32 4294901760, %v3027_v59 }
 0x244   :  { %v5273_v39 = vpop.f32.mrb[88].mxu1 }
 0x245   :  { %v5274_v9 = vpop.f32.mrb[89].mxu1  ;;  %5835 = vrsqrt.f32 %v2781_v58  ;;  %v2635_v5 = vadd.f32 %v5213_v35, %v2398_v43  ;;  %v5214_v60 = vpop.f32.mrb[86].mxu0  ;;  %v3835_v30 = vsub.f32 %v8391_v61, %v3834_v14 }
 0x246   :  { %v5275_v23 = vadd.f32 %v5274_v9, %v5273_v39  ;;  %v5215_v57 = vpop.f32.mrb[87].mxu0 }
 0x247   :  { %v2788_v34 = vadd.f32 %v5269_v21, %v2635_v5  ;;  %v5216_v41 = vadd.f32 %v5215_v57, %v5214_v60  ;;  %v3836_v15 = vand.u32 4294901760, %v3835_v30 }
 0x248   :  { %v5276_v19 = vpop.f32.mrb[90].mxu1 }
 0x249   :  { %v5277_v56 = vpop.f32.mrb[91].mxu1  ;;  %5837 = vrsqrt.f32 %v2788_v34  ;;  %v2642_v3 = vadd.f32 %v5216_v41, %v8375_v29  ;;  %v5217_v25 = vpop.f32.mrb[88].mxu0 }
 0x24a   :  { %v5278_v43 = vadd.f32 %v5277_v56, %v5276_v19  ;;  %v5218_v18 = vpop.f32.mrb[89].mxu0 }
 0x24b   :  { %v5834_v32 = vpop.eup %5833  ;;  %v2795_v47 = vadd.f32 %v5272_v11, %v2642_v3  ;;  %v5219_v26 = vadd.f32 %v5218_v18, %v5217_v25 }
 0x24c   :  { %v5279_v0 = vpop.f32.mrb[92].mxu1  ;;  %v2840_v48 = vsel %vm2838_vm0, %v5834_v32, 0 }
 0x24d   :  { %v5280_v42 = vpop.f32.mrb[93].mxu1  ;;  %v8397_v38 = vand.u32 4294901760, %v2840_v48  ;;  %5839 = vrsqrt.f32 %v2795_v47  ;;  %v2649_v22 = vadd.f32 %v5219_v26, %v8377_v2  ;;  %v5220_v4 = vpop.f32.mrb[90].mxu0 }
 0x24e   :  { %v5281_v29 = vadd.f32 %v5280_v42, %v5279_v0  ;;  %v5221_v7 = vpop.f32.mrb[91].mxu0 }
 0x24f   :  { %v5836_v24 = vpop.eup %5835  ;;  %v8401_v40 = vsub.f32 %v2840_v48, %v8397_v38  ;;  %v2802_v10 = vadd.f32 %v5275_v23, %v2649_v22  ;;  %v5222_v31 = vadd.f32 %v5221_v7, %v5220_v4 }
 0x250   :  { %v5282_v6 = vpop.f32.mrb[94].mxu1  ;;  %v2843_v2 = vsel %vm2838_vm0, %v5836_v24, 0 }
 0x251   :  { %v5283_v45 = vpop.f32.mrb[95].mxu1  ;;  %5841 = vrsqrt.f32 %v2802_v10  ;;  %v2656_v8 = vadd.f32 %v5222_v31, %v8379_v63  ;;  %v5223_v12 = vpop.f32.mrb[92].mxu0  ;;  %v8412_v16 = vand.u32 4294901760, %v8401_v40  ;;  %v8414_v51 = vand.u32 4294901760, %v2843_v2 }
 0x252   :  { %v5284_v21 = vadd.f32 %v5283_v45, %v5282_v6  ;;  %v5224_v27 = vpop.f32.mrb[93].mxu0 }
 0x253   :  { %v5838_v49 = vpop.eup %5837  ;;  %v2809_v33 = vadd.f32 %v5278_v43, %v2656_v8  ;;  %v5225_v62 = vadd.f32 %v5224_v27, %v5223_v12  ;;  %v2933_v11 = vsub.f32 %v8401_v40, %v8412_v16  ;;  %v8419_v58 = vsub.f32 %v2843_v2, %v8414_v51 }
 0x254   :  { %v2846_v63 = vsel %vm2838_vm0, %v5838_v49, 0 }
 0x255   :  { %5843 = vrsqrt.f32 %v2809_v33  ;;  %v2663_v39 = vadd.f32 %v5225_v62, %v8381_v52  ;;  %v5226_v35 = vpop.f32.mrb[94].mxu0  ;;  %v2934_v9 = vand.u32 4294901760, %v2933_v11  ;;  %v8423_v5 = vand.u32 4294901760, %v2846_v63 }
 0x256   :  { %v5227_v23 = vpop.f32.mrb[95].mxu0  ;;  %v8426_v60 = vand.u32 4294901760, %v8419_v58 }
 0x257   :  { %v5840_v57 = vpop.eup %5839  ;;  %v2816_v34 = vadd.f32 %v5281_v29, %v2663_v39  ;;  %v5228_v19 = vadd.f32 %v5227_v23, %v5226_v35  ;;  %2935 = vmatmul.mubr.f32.vlgmr.msra.gmra.mrb[96].mxu0 %v2934_v9  ;;  %3743 = vmatmul.mubr.f32.vlgmr.msra.gmra.mrb[96].mxu1 %v2934_v9  ;;  %v8429_v41 = vsub.f32 %v2846_v63, %v8423_v5 }
 0x258   :  { %3029 = vmatpush1.msra.mxu0 %v3028_v36  ;;  %3837 = vmatpush1.msra.mxu1 %v3836_v15  ;;  %v2944_v52 = vsub.f32 %v8419_v58, %v8426_v60  ;;  %v2849_v56 = vsel %vm2838_vm0, %v5840_v57, 0 }
 0x259   :  { %5845 = vrsqrt.f32 %v2816_v34  ;;  %v2670_v3 = vadd.f32 %v5228_v19, %v8383_v13  ;;  %2940 = vmatprep.mubr.f32.mxu0 %v5889_v54  ;;  %3748 = vmatprep.mubr.f32.mxu1 %v5889_v54  ;;  %v8438_v43 = vand.u32 4294901760, %v8429_v41  ;;  %v8440_v25 = vand.u32 4294901760, %v2849_v56  ;;  %v9551_v34 = vld [vmem:[#allocation51_spill] sm:$0xff] }
 0x25a   :  { %v2945_v18 = vand.u32 4294901760, %v2944_v52  ;;  %3151 = vmatprep.subr.mxu0 %v8349_v50  ;;  %3959 = vmatprep.subr.mxu1 %v8353_v46 }
 0x25b   :  { %v5842_v32 = vpop.eup %5841  ;;  %v2823_v47 = vadd.f32 %v5284_v21, %v2670_v3  ;;  %v2955_v0 = vsub.f32 %v8429_v41, %v8438_v43  ;;  %v8447_v13 = vsub.f32 %v2849_v56, %v8440_v25 }
 0x25c   :  { %2946 = vmatmul.mubr.f32.gmra.mrb[98].mxu0 %v2945_v18  ;;  %3754 = vmatmul.mubr.f32.gmra.mrb[98].mxu1 %v2945_v18  ;;  %v2852_v26 = vsel %vm2838_vm0, %v5842_v32, 0  ;;  %v9552_v18 = vld [vmem:[#allocation9_spill] sm:$0xff] }
 0x25d   :  { %5847 = vrsqrt.f32 %v2823_v47  ;;  %2951 = vmatprep.mubr.f32.mxu0 %v5889_v54  ;;  %3759 = vmatprep.mubr.f32.mxu1 %v5889_v54  ;;  %v2956_v48 = vand.u32 4294901760, %v2955_v0  ;;  %v8453_v42 = vand.u32 4294901760, %v8447_v13  ;;  %v8455_v22 = vand.u32 4294901760, %v2852_v26  ;;  %v9553_v47 = vld [vmem:[#allocation8_spill] sm:$0xff] }
 0x25f   :  { %v5844_v29 = vpop.eup %5843  ;;  %v2966_v4 = vsub.f32 %v8447_v13, %v8453_v42  ;;  %v8460_v7 = vsub.f32 %v2852_v26, %v8455_v22 }
 0x260   :  { %2957 = vmatmul.mubr.f32.gmra.mrb[100].mxu0 %v2956_v48  ;;  %3765 = vmatmul.mubr.f32.gmra.mrb[100].mxu1 %v2956_v48  ;;  %v2855_v24 = vsel %vm2838_vm0, %v5844_v29, 0  ;;  %v9554_v48 = vld [vmem:[#allocation10_spill] sm:$0xff] }
 0x261   :  { %2962 = vmatprep.mubr.f32.mxu0 %v5889_v54  ;;  %3770 = vmatprep.mubr.f32.mxu1 %v5889_v54  ;;  %v2967_v10 = vand.u32 4294901760, %v2966_v4  ;;  %v8466_v6 = vand.u32 4294901760, %v8460_v7  ;;  %v8468_v31 = vand.u32 4294901760, %v2855_v24 }
 0x263   :  { %v5846_v45 = vpop.eup %5845  ;;  %v2977_v59 = vsub.f32 %v8460_v7, %v8466_v6  ;;  %v8473_v30 = vsub.f32 %v2855_v24, %v8468_v31 }
 0x264   :  { %2968 = vmatmul.mubr.f32.gmra.mrb[102].mxu0 %v2967_v10  ;;  %3776 = vmatmul.mubr.f32.gmra.mrb[102].mxu1 %v2967_v10  ;;  %v2858_v2 = vsel %vm2838_vm0, %v5846_v45, 0  ;;  %v9556_v45 = vld [vmem:[#allocation6_spill] sm:$0xff] }
 0x265   :  { %2973 = vmatprep.mubr.f32.mxu0 %v5889_v54  ;;  %3781 = vmatprep.mubr.f32.mxu1 %v5889_v54  ;;  %v2978_v8 = vand.u32 4294901760, %v2977_v59  ;;  %v8479_v21 = vand.u32 4294901760, %v8473_v30  ;;  %v8481_v12 = vand.u32 4294901760, %v2858_v2 }
 0x267   :  { %v5848_v27 = vpop.eup %5847  ;;  %v2988_v49 = vsub.f32 %v8473_v30, %v8479_v21  ;;  %v8486_v33 = vsub.f32 %v2858_v2, %v8481_v12 }
 0x268   :  { %2979 = vmatmul.mubr.f32.gmra.mrb[104].mxu0 %v2978_v8  ;;  %3787 = vmatmul.mubr.f32.gmra.mrb[104].mxu1 %v2978_v8  ;;  %v2861_v62 = vsel %vm2838_vm0, %v5848_v27, 0 }
 0x269   :  { %2984 = vmatprep.mubr.f32.mxu0 %v5889_v54  ;;  %3792 = vmatprep.mubr.f32.mxu1 %v5889_v54  ;;  %v2989_v11 = vand.u32 4294901760, %v2988_v49  ;;  %v8492_v36 = vand.u32 4294901760, %v8486_v33  ;;  %v8494_v15 = vand.u32 4294901760, %v2861_v62  ;;  %v9559_v49 = vld [vmem:[#allocation54_spill] sm:$0xff] }
 0x26b   :  { %v2999_v63 = vsub.f32 %v8486_v33, %v8492_v36  ;;  %v8499_v39 = vsub.f32 %v2861_v62, %v8494_v15 }
 0x26c   :  { %2990 = vmatmul.mubr.f32.gmra.mrb[106].mxu0 %v2989_v11  ;;  %3798 = vmatmul.mubr.f32.gmra.mrb[106].mxu1 %v2989_v11 }
 0x26d   :  { %2995 = vmatprep.mubr.f32.mxu0 %v5889_v54  ;;  %3803 = vmatprep.mubr.f32.mxu1 %v5889_v54  ;;  %v3000_v35 = vand.u32 4294901760, %v2999_v63  ;;  %v8504_v9 = vand.u32 4294901760, %v8499_v39 }
 0x26f   :  { %v3010_v23 = vsub.f32 %v8499_v39, %v8504_v9 }
 0x270   :  { %3001 = vmatmul.mubr.f32.gmra.mrb[108].mxu0 %v3000_v35  ;;  %3809 = vmatmul.mubr.f32.gmra.mrb[108].mxu1 %v3000_v35  ;;  %v9560_v35 = vld [vmem:[#allocation11_spill] sm:$0xff] }
 0x271   :  { %3006 = vmatprep.mubr.f32.mxu0 %v5889_v54  ;;  %3814 = vmatprep.mubr.f32.mxu1 %v5889_v54  ;;  %v3011_v57 = vand.u32 4294901760, %v3010_v23  ;;  %v9561_v23 = vld [vmem:[#allocation29_spill] sm:$0xff] }
 0x274   :  { %3012 = vmatmul.mubr.f32.gmra.mrb[110].mxu0 %v3011_v57  ;;  %3820 = vmatmul.mubr.f32.gmra.mrb[110].mxu1 %v3011_v57 }
 0x275   :  { %3092 = vmatprep.mubr.f32.mxu0 %v5889_v54  ;;  %3900 = vmatprep.mubr.f32.mxu1 %v5889_v54 }
 0x278   :  { %3094 = vmatmul.mubr.f32.vlgmr.msra.gmra.mrb[96].mxu0 %v8397_v38  ;;  %3902 = vmatmul.mubr.f32.vlgmr.msra.gmra.mrb[96].mxu1 %v8397_v38 }
 0x279   :  { %3154 = vmatpush1.msra.mxu0 %v8387_v53  ;;  %3962 = vmatpush1.msra.mxu1 %v8391_v61 }
 0x27a   :  { %3099 = vmatprep.mubr.f32.mxu0 %v5889_v54  ;;  %3907 = vmatprep.mubr.f32.mxu1 %v5889_v54 }
 0x27b   :  { %3283 = vmatprep.subr.mxu0 %v8303_v28  ;;  %4091 = vmatprep.subr.mxu1 %v8306_v37 }
 0x27c   :  { %3101 = vmatmul.mubr.f32.gmra.mrb[98].mxu0 %v8414_v51  ;;  %3909 = vmatmul.mubr.f32.gmra.mrb[98].mxu1 %v8414_v51 }
 0x27d   :  { %3106 = vmatprep.mubr.f32.mxu0 %v5889_v54  ;;  %3914 = vmatprep.mubr.f32.mxu1 %v5889_v54 }
 0x280   :  { %3108 = vmatmul.mubr.f32.gmra.mrb[100].mxu0 %v8423_v5  ;;  %3916 = vmatmul.mubr.f32.gmra.mrb[100].mxu1 %v8423_v5 }
 0x281   :  { %3113 = vmatprep.mubr.f32.mxu0 %v5889_v54  ;;  %3921 = vmatprep.mubr.f32.mxu1 %v5889_v54 }
 0x284   :  { %3115 = vmatmul.mubr.f32.gmra.mrb[102].mxu0 %v8440_v25  ;;  %3923 = vmatmul.mubr.f32.gmra.mrb[102].mxu1 %v8440_v25 }
 0x285   :  { %3120 = vmatprep.mubr.f32.mxu0 %v5889_v54  ;;  %3928 = vmatprep.mubr.f32.mxu1 %v5889_v54 }
 0x288   :  { %3122 = vmatmul.mubr.f32.gmra.mrb[104].mxu0 %v8455_v22  ;;  %3930 = vmatmul.mubr.f32.gmra.mrb[104].mxu1 %v8455_v22 }
 0x289   :  { %3127 = vmatprep.mubr.f32.mxu0 %v5889_v54  ;;  %3935 = vmatprep.mubr.f32.mxu1 %v5889_v54 }
 0x28c   :  { %3129 = vmatmul.mubr.f32.gmra.mrb[106].mxu0 %v8468_v31  ;;  %3937 = vmatmul.mubr.f32.gmra.mrb[106].mxu1 %v8468_v31 }
 0x28d   :  { %3134 = vmatprep.mubr.f32.mxu0 %v5889_v54  ;;  %3942 = vmatprep.mubr.f32.mxu1 %v5889_v54 }
 0x290   :  { %3136 = vmatmul.mubr.f32.gmra.mrb[108].mxu0 %v8481_v12  ;;  %3944 = vmatmul.mubr.f32.gmra.mrb[108].mxu1 %v8481_v12 }
 0x291   :  { %3141 = vmatprep.mubr.f32.mxu0 %v5889_v54  ;;  %3949 = vmatprep.mubr.f32.mxu1 %v5889_v54 }
 0x294   :  { %3143 = vmatmul.mubr.f32.gmra.mrb[110].mxu0 %v8494_v15  ;;  %3951 = vmatmul.mubr.f32.gmra.mrb[110].mxu1 %v8494_v15 }
 0x295   :  { %3217 = vmatprep.mubr.f32.mxu0 %v5889_v54  ;;  %4025 = vmatprep.mubr.f32.mxu1 %v5889_v54 }
 0x298   :  { %3220 = vmatmul.mubr.f32.vlgmr.msra.gmra.mrb[96].mxu0 %v8401_v40  ;;  %4028 = vmatmul.mubr.f32.vlgmr.msra.gmra.mrb[96].mxu1 %v8401_v40  ;;  %v9549_v40 = vld [vmem:[#allocation52_spill] sm:$0xff] }
 0x299   :  { %3285 = vmatpush1.msra.mxu0 %v8309_v17  ;;  %4093 = vmatpush1.msra.mxu1 %v8319_v20 }
 0x29a   :  { %3225 = vmatprep.mubr.f32.mxu0 %v5889_v54  ;;  %4033 = vmatprep.mubr.f32.mxu1 %v5889_v54 }
 0x29b   :  { %3424 = vmatprep.subr.mxu0 %v3020_v44  ;;  %4232 = vmatprep.subr.mxu1 %v3828_v1 }
 0x29c   :  { %3228 = vmatmul.mubr.f32.gmra.mrb[98].mxu0 %v8419_v58  ;;  %4036 = vmatmul.mubr.f32.gmra.mrb[98].mxu1 %v8419_v58 }
 0x29d   :  { %3233 = vmatprep.mubr.f32.mxu0 %v5889_v54  ;;  %4041 = vmatprep.mubr.f32.mxu1 %v5889_v54 }
 0x2a0   :  { %3236 = vmatmul.mubr.f32.gmra.mrb[100].mxu0 %v8429_v41  ;;  %4044 = vmatmul.mubr.f32.gmra.mrb[100].mxu1 %v8429_v41 }
 0x2a1   :  { %3241 = vmatprep.mubr.f32.mxu0 %v5889_v54  ;;  %4049 = vmatprep.mubr.f32.mxu1 %v5889_v54 }
 0x2a4   :  { %3244 = vmatmul.mubr.f32.gmra.mrb[102].mxu0 %v8447_v13  ;;  %4052 = vmatmul.mubr.f32.gmra.mrb[102].mxu1 %v8447_v13 }
 0x2a5   :  { %3249 = vmatprep.mubr.f32.mxu0 %v5889_v54  ;;  %4057 = vmatprep.mubr.f32.mxu1 %v5889_v54 }
 0x2a8   :  { %3252 = vmatmul.mubr.f32.gmra.mrb[104].mxu0 %v8460_v7  ;;  %4060 = vmatmul.mubr.f32.gmra.mrb[104].mxu1 %v8460_v7 }
 0x2a9   :  { %3257 = vmatprep.mubr.f32.mxu0 %v5889_v54  ;;  %4065 = vmatprep.mubr.f32.mxu1 %v5889_v54 }
 0x2ac   :  { %3260 = vmatmul.mubr.f32.gmra.mrb[106].mxu0 %v8473_v30  ;;  %4068 = vmatmul.mubr.f32.gmra.mrb[106].mxu1 %v8473_v30  ;;  %v9557_v30 = vld [vmem:[#allocation55_spill] sm:$0xff] }
 0x2ad   :  { %3265 = vmatprep.mubr.f32.mxu0 %v5889_v54  ;;  %4073 = vmatprep.mubr.f32.mxu1 %v5889_v54 }
 0x2b0   :  { %3268 = vmatmul.mubr.f32.gmra.mrb[108].mxu0 %v8486_v33  ;;  %4076 = vmatmul.mubr.f32.gmra.mrb[108].mxu1 %v8486_v33 }
 0x2b1   :  { %3273 = vmatprep.mubr.f32.mxu0 %v5889_v54  ;;  %4081 = vmatprep.mubr.f32.mxu1 %v5889_v54 }
 0x2b4   :  { %3276 = vmatmul.mubr.f32.gmra.mrb[110].mxu0 %v8499_v39  ;;  %4084 = vmatmul.mubr.f32.gmra.mrb[110].mxu1 %v8499_v39 }
 0x2b5   :  { %3348 = vmatprep.mubr.f32.mxu0 %v5889_v54  ;;  %4156 = vmatprep.mubr.f32.mxu1 %v5889_v54 }
 0x2b8   :  { %3352 = vmatmul.mubr.f32.vlgmr.msra.gmra.mrb[96].mxu0 %v8412_v16  ;;  %4160 = vmatmul.mubr.f32.vlgmr.msra.gmra.mrb[96].mxu1 %v8412_v16 }
 0x2b9   :  { %3428 = vmatpush1.msra.mxu0 %v3026_v55  ;;  %4236 = vmatpush1.msra.mxu1 %v3834_v14  ;;  %v9548_v14 = vld [vmem:[#allocation56_spill] sm:$0xff] }
 0x2ba   :  { %3357 = vmatprep.mubr.f32.mxu0 %v5889_v54  ;;  %4165 = vmatprep.mubr.f32.mxu1 %v5889_v54 }
 0x2bb   :  { %3549 = vmatprep.subr.mxu0 %v8303_v28  ;;  %4357 = vmatprep.subr.mxu1 %v8306_v37  ;;  %v4511_v28 = vld [vmem:[%s8787_s4] sm:$0xf]  ;;  %s5890_s4 = smov [#allocation2]  }
 0x2bc   :  { %3361 = vmatmul.mubr.f32.gmra.mrb[98].mxu0 %v8426_v60  ;;  %4169 = vmatmul.mubr.f32.gmra.mrb[98].mxu1 %v8426_v60  ;;  %v9543_v37 = vld [vmem:[#allocation5_spill] sm:$0xff]  ;;  %s4602_s19 = sshll.u32 %s5890_s4, 4  ;;  %s4603_s19 = int_to_ptr.vmem [resolvable:$true] %s4602_s19 }
 0x2bd   :  { %3366 = vmatprep.mubr.f32.mxu0 %v5889_v54  ;;  %4174 = vmatprep.mubr.f32.mxu1 %v5889_v54  ;;  %v9545_v50 = vsub.s32 2, %v9543_v37  ;;  %v9547_v61 = vsub.s32 3, %v9543_v37  ;;  %s5865_s20 = scalar_lea.vmem %s4603_s19, 4096  ;;  %p5870_p1 = scmp.lt.s32.totalorder %s4603_s19, %s4603_s19 }
 0x2be   :  { %p5866_p0 = scmp.ne.s32.totalorder %s4603_s19, %s5865_s20  ;;  %p5871_p2 = scmp.lt.s32.totalorder %s5865_s20, %s5865_s20 }
 0x2bf   :  { %v8697_v46 = vrot.slane %v4511_v28, %v9545_v50  ;;  %v8705_v55 = vrot.slane %v4511_v28, %v9547_v61 }
 0x2c0   :  { %3370 = vmatmul.mubr.f32.gmra.mrb[100].mxu0 %v8438_v43  ;;  %4178 = vmatmul.mubr.f32.gmra.mrb[100].mxu1 %v8438_v43  ;;  %p5872_p3 = por %p5871_p2, %p5870_p1 }
 0x2c1   :  { %3375 = vmatprep.mubr.f32.mxu0 %v5889_v54  ;;  %4183 = vmatprep.mubr.f32.mxu1 %v5889_v54 }
 0x2c2   :  { %p5873_p4 = pnand %p5872_p3, %p5866_p0 }
 0x2c4   :  { %3379 = vmatmul.mubr.f32.gmra.mrb[102].mxu0 %v8453_v42  ;;  %4187 = vmatmul.mubr.f32.gmra.mrb[102].mxu1 %v8453_v42 }
 0x2c5   :  { %3384 = vmatprep.mubr.f32.mxu0 %v5889_v54  ;;  %4192 = vmatprep.mubr.f32.mxu1 %v5889_v54 }
 0x2c8   :  { %3388 = vmatmul.mubr.f32.gmra.mrb[104].mxu0 %v8466_v6  ;;  %4196 = vmatmul.mubr.f32.gmra.mrb[104].mxu1 %v8466_v6 }
 0x2c9   :  { %3393 = vmatprep.mubr.f32.mxu0 %v5889_v54  ;;  %4201 = vmatprep.mubr.f32.mxu1 %v5889_v54 }
 0x2cc   :  { %3397 = vmatmul.mubr.f32.gmra.mrb[106].mxu0 %v8479_v21  ;;  %4205 = vmatmul.mubr.f32.gmra.mrb[106].mxu1 %v8479_v21 }
 0x2cd   :  { %3402 = vmatprep.mubr.f32.mxu0 %v5889_v54  ;;  %4210 = vmatprep.mubr.f32.mxu1 %v5889_v54 }
 0x2d0   :  { %3406 = vmatmul.mubr.f32.gmra.mrb[108].mxu0 %v8492_v36  ;;  %4214 = vmatmul.mubr.f32.gmra.mrb[108].mxu1 %v8492_v36 }
 0x2d1   :  { %3411 = vmatprep.mubr.f32.mxu0 %v5889_v54  ;;  %4219 = vmatprep.mubr.f32.mxu1 %v5889_v54 }
 0x2d4   :  { %3415 = vmatmul.mubr.f32.gmra.mrb[110].mxu0 %v8504_v9  ;;  %4223 = vmatmul.mubr.f32.gmra.mrb[110].mxu1 %v8504_v9 }
 0x2d5   :  { %3491 = vmatprep.mubr.f32.mxu0 %v5889_v54  ;;  %4299 = vmatprep.mubr.f32.mxu1 %v5889_v54 }
 0x2d8   :  { %3493 = vmatmul.mubr.f32.vlgmr.msra.gmra.mrb[96].mxu0 %v8397_v38  ;;  %4301 = vmatmul.mubr.f32.vlgmr.msra.gmra.mrb[96].mxu1 %v8397_v38 }
 0x2d9   :  { %3551 = vmatpush1.msra.mxu0 %v8309_v17  ;;  %4359 = vmatpush1.msra.mxu1 %v8319_v20  ;;  %v9544_v17 = vsub.s32 0, %v9543_v37 }
 0x2da   :  { %3498 = vmatprep.mubr.f32.mxu0 %v5889_v54  ;;  %4306 = vmatprep.mubr.f32.mxu1 %v5889_v54 }
 0x2db   :  { %v8693_v20 = vrot.slane %v4511_v28, %v9544_v17  ;;  %v9562_v17 = vld [vmem:[#allocation12_spill] sm:$0xff] }
 0x2dc   :  { %3500 = vmatmul.mubr.f32.gmra.mrb[98].mxu0 %v8414_v51  ;;  %4308 = vmatmul.mubr.f32.gmra.mrb[98].mxu1 %v8414_v51 }
 0x2dd   :  { %3505 = vmatprep.mubr.f32.mxu0 %v5889_v54  ;;  %4313 = vmatprep.mubr.f32.mxu1 %v5889_v54 }
 0x2e0   :  { %3507 = vmatmul.mubr.f32.gmra.mrb[100].mxu0 %v8423_v5  ;;  %4315 = vmatmul.mubr.f32.gmra.mrb[100].mxu1 %v8423_v5 }
 0x2e1   :  { %3512 = vmatprep.mubr.f32.mxu0 %v5889_v54  ;;  %4320 = vmatprep.mubr.f32.mxu1 %v5889_v54 }
 0x2e4   :  { %3514 = vmatmul.mubr.f32.gmra.mrb[102].mxu0 %v8440_v25  ;;  %4322 = vmatmul.mubr.f32.gmra.mrb[102].mxu1 %v8440_v25 }
 0x2e5   :  { %3519 = vmatprep.mubr.f32.mxu0 %v5889_v54  ;;  %4327 = vmatprep.mubr.f32.mxu1 %v5889_v54 }
 0x2e8   :  { %3521 = vmatmul.mubr.f32.gmra.mrb[104].mxu0 %v8455_v22  ;;  %4329 = vmatmul.mubr.f32.gmra.mrb[104].mxu1 %v8455_v22 }
 0x2e9   :  { %3526 = vmatprep.mubr.f32.mxu0 %v5889_v54  ;;  %4334 = vmatprep.mubr.f32.mxu1 %v5889_v54 }
 0x2ec   :  { %3528 = vmatmul.mubr.f32.gmra.mrb[106].mxu0 %v8468_v31  ;;  %4336 = vmatmul.mubr.f32.gmra.mrb[106].mxu1 %v8468_v31 }
 0x2ed   :  { %3533 = vmatprep.mubr.f32.mxu0 %v5889_v54  ;;  %4341 = vmatprep.mubr.f32.mxu1 %v5889_v54 }
 0x2f0   :  { %3535 = vmatmul.mubr.f32.gmra.mrb[108].mxu0 %v8481_v12  ;;  %4343 = vmatmul.mubr.f32.gmra.mrb[108].mxu1 %v8481_v12 }
 0x2f1   :  { %3540 = vmatprep.mubr.f32.mxu0 %v5889_v54  ;;  %4348 = vmatprep.mubr.f32.mxu1 %v5889_v54 }
 0x2f4   :  { %3542 = vmatmul.mubr.f32.gmra.mrb[110].mxu0 %v8494_v15  ;;  %4350 = vmatmul.mubr.f32.gmra.mrb[110].mxu1 %v8494_v15 }
 0x2f5   :  { %3614 = vmatprep.mubr.f32.mxu0 %v5889_v54  ;;  %4422 = vmatprep.mubr.f32.mxu1 %v5889_v54 }
 0x2f8   :  { %3616 = vmatmul.mubr.f32.vlgmr.msra.gmra.mrb[96].mxu0 %v8397_v38  ;;  %4424 = vmatmul.mubr.f32.vlgmr.msra.gmra.mrb[96].mxu1 %v8397_v38 }
 0x2f9   :  { %3621 = vmatprep.mubr.f32.mxu0 %v5889_v54  ;;  %4429 = vmatprep.mubr.f32.mxu1 %v5889_v54 }
 0x2fc   :  { %3623 = vmatmul.mubr.f32.gmra.mrb[98].mxu0 %v8414_v51  ;;  %4431 = vmatmul.mubr.f32.gmra.mrb[98].mxu1 %v8414_v51 }
 0x2fd   :  { %3628 = vmatprep.mubr.f32.mxu0 %v5889_v54  ;;  %4436 = vmatprep.mubr.f32.mxu1 %v5889_v54 }
 0x300   :  { %3630 = vmatmul.mubr.f32.gmra.mrb[100].mxu0 %v8423_v5  ;;  %4438 = vmatmul.mubr.f32.gmra.mrb[100].mxu1 %v8423_v5  ;;  %v9550_v5 = vld [vmem:[#allocation57_spill] sm:$0xff] }
 0x301   :  { %3635 = vmatprep.mubr.f32.mxu0 %v5889_v54  ;;  %4443 = vmatprep.mubr.f32.mxu1 %v5889_v54 }
 0x304   :  { %3637 = vmatmul.mubr.f32.gmra.mrb[102].mxu0 %v8440_v25  ;;  %4445 = vmatmul.mubr.f32.gmra.mrb[102].mxu1 %v8440_v25 }
 0x305   :  { %3642 = vmatprep.mubr.f32.mxu0 %v5889_v54  ;;  %4450 = vmatprep.mubr.f32.mxu1 %v5889_v54 }
 0x308   :  { %3644 = vmatmul.mubr.f32.gmra.mrb[104].mxu0 %v8455_v22  ;;  %4452 = vmatmul.mubr.f32.gmra.mrb[104].mxu1 %v8455_v22  ;;  %v9555_v22 = vld [vmem:[#allocation53_spill] sm:$0xff] }
 0x309   :  { %3649 = vmatprep.mubr.f32.mxu0 %v5889_v54  ;;  %4457 = vmatprep.mubr.f32.mxu1 %v5889_v54 }
 0x30c   :  { %3651 = vmatmul.mubr.f32.gmra.mrb[106].mxu0 %v8468_v31  ;;  %4459 = vmatmul.mubr.f32.gmra.mrb[106].mxu1 %v8468_v31 }
 0x30d   :  { %3656 = vmatprep.mubr.f32.mxu0 %v5889_v54  ;;  %4464 = vmatprep.mubr.f32.mxu1 %v5889_v54 }
 0x310   :  { %3658 = vmatmul.mubr.f32.gmra.mrb[108].mxu0 %v8481_v12  ;;  %4466 = vmatmul.mubr.f32.gmra.mrb[108].mxu1 %v8481_v12  ;;  %v9558_v12 = vld [vmem:[#allocation60_spill] sm:$0xff] }
 0x311   :  { %3663 = vmatprep.mubr.f32.mxu0 %v5889_v54  ;;  %4471 = vmatprep.mubr.f32.mxu1 %v5889_v54  ;;  %v9546_v54 = vsub.s32 1, %v9543_v37 }
 0x313   :  { %v8701_v53 = vrot.slane %v4511_v28, %v9546_v54 }
 0x314   :  { %3665 = vmatmul.mubr.f32.gmra.mrb[110].mxu0 %v8494_v15  ;;  %4473 = vmatmul.mubr.f32.gmra.mrb[110].mxu1 %v8494_v15 }
 0x3cb   :  { %v3617_v44 = vpop.f32.mrb[96].mxu0  ;;  %v4425_v1 = vpop.f32.mrb[96].mxu1 }
 0x3cc   :  { %v4479_v38 = vmul.f32 %v3617_v44, %v9548_v14  ;;  %v4481_v16 = vmul.f32 %v4425_v1, %v9549_v40  ;;  %v3619_v51 = vpop.f32.mrb[97].mxu0  ;;  %v4427_v58 = vpop.f32.mrb[97].mxu1  ;;  %v9563_v44 = vld [vmem:[#allocation59_spill] sm:$0xff] }
 0x3cd   :  { %v4480_v60 = vmul.f32 %v3619_v51, %v9550_v5  ;;  %v4482_v19 = vmul.f32 %v4427_v58, %v9551_v34  ;;  %v9564_v51 = vld [vmem:[#allocation13_spill] sm:$0xff]  ;;  %v9565_v5 = vld [vmem:[#allocation71_spill] sm:$0xff] }
 0x3ce   :  { %v4533_v41 = vadd.f32 %v8693_v20, %v4479_v38  ;;  %v4535_v52 = vadd.f32 %v8697_v46, %v4481_v16 }
 0x3cf   :  { %v4534_v56 = vadd.f32 %v8701_v53, %v4480_v60  ;;  %v4536_v3 = vadd.f32 %v8705_v55, %v4482_v19  ;;  %v3624_v43 = vpop.f32.mrb[98].mxu0  ;;  %v4432_v25 = vpop.f32.mrb[98].mxu1 }
 0x3d0   :  { %4565 = vst [vmem:[#allocation2] sm:$0xff] %v4533_v41  ;;  %4567 = vst [vmem:[#allocation2 + $0x10] sm:$0xff] %v4535_v52  ;;  %v4483_v32 = vmul.f32 %v3624_v43, %v9552_v18  ;;  %v4485_v0 = vmul.f32 %v4432_v25, %v9553_v47  ;;  %v3626_v13 = vpop.f32.mrb[99].mxu0  ;;  %v4434_v26 = vpop.f32.mrb[99].mxu1  ;;  %v9566_v41 = vld [vmem:[#allocation14_spill] sm:$0xff] }
 0x3d1   :  { %4566 = vst [vmem:[#allocation2 + $0x8] sm:$0xff] %v4534_v56  ;;  %4568 = vst [vmem:[#allocation2 + $0x18] sm:$0xff] %v4536_v3  ;;  %v4484_v42 = vmul.f32 %v3626_v13, %v9554_v48  ;;  %v4486_v29 = vmul.f32 %v4434_v26, %v9555_v22  ;;  %v9567_v56 = vld [vmem:[#allocation30_spill] sm:$0xff]  ;;  %v9568_v13 = vld [vmem:[#allocation15_spill] sm:$0xff] }
 0x3d2   :  { %v4537_v4 = vadd.f32 %v8693_v20, %v4483_v32  ;;  %v4539_v7 = vadd.f32 %v8697_v46, %v4485_v0  ;;  %v9569_v48 = vld [vmem:[#allocation31_spill] sm:$0xff] }
 0x3d3   :  { %v4538_v24 = vadd.f32 %v8701_v53, %v4484_v42  ;;  %v4540_v10 = vadd.f32 %v8705_v55, %v4486_v29  ;;  %v3631_v6 = vpop.f32.mrb[100].mxu0  ;;  %v4439_v31 = vpop.f32.mrb[100].mxu1 }
 0x3d4   :  { %4569 = vst [vmem:[#allocation2 + $0x20] sm:$0xff] %v4537_v4  ;;  %4571 = vst [vmem:[#allocation2 + $0x30] sm:$0xff] %v4539_v7  ;;  %v4487_v59 = vmul.f32 %v3631_v6, %v9556_v45  ;;  %v4489_v2 = vmul.f32 %v4439_v31, %v9557_v30  ;;  %v3633_v8 = vpop.f32.mrb[101].mxu0  ;;  %v4441_v21 = vpop.f32.mrb[101].mxu1  ;;  %v9570_v4 = vld [vmem:[#allocation16_spill] sm:$0xff] }
 0x3d5   :  { %4570 = vst [vmem:[#allocation2 + $0x28] sm:$0xff] %v4538_v24  ;;  %4572 = vst [vmem:[#allocation2 + $0x38] sm:$0xff] %v4540_v10  ;;  %v4488_v27 = vmul.f32 %v3633_v8, %v9558_v12  ;;  %v4490_v33 = vmul.f32 %v4441_v21, %v9559_v49  ;;  %v9571_v24 = vld [vmem:[#allocation66_spill] sm:$0xff]  ;;  %v9572_v8 = vld [vmem:[#allocation17_spill] sm:$0xff] }
 0x3d6   :  { %v4541_v62 = vadd.f32 %v8693_v20, %v4487_v59  ;;  %v4543_v11 = vadd.f32 %v8697_v46, %v4489_v2  ;;  %v9573_v12 = vld [vmem:[#allocation72_spill] sm:$0xff] }
 0x3d7   :  { %v4542_v36 = vadd.f32 %v8701_v53, %v4488_v27  ;;  %v4544_v15 = vadd.f32 %v8705_v55, %v4490_v33  ;;  %v3638_v63 = vpop.f32.mrb[102].mxu0  ;;  %v4446_v39 = vpop.f32.mrb[102].mxu1 }
 0x3d8   :  { %4573 = vst [vmem:[#allocation2 + $0x40] sm:$0xff] %v4541_v62  ;;  %4575 = vst [vmem:[#allocation2 + $0x50] sm:$0xff] %v4543_v11  ;;  %v4491_v9 = vmul.f32 %v3638_v63, %v9560_v35  ;;  %v4493_v57 = vmul.f32 %v4446_v39, %v9561_v23  ;;  %v3640_v28 = vpop.f32.mrb[103].mxu0  ;;  %v4448_v37 = vpop.f32.mrb[103].mxu1  ;;  %v9574_v62 = vld [vmem:[#allocation25_spill] sm:$0xff] }
 0x3d9   :  { %4574 = vst [vmem:[#allocation2 + $0x48] sm:$0xff] %v4542_v36  ;;  %4576 = vst [vmem:[#allocation2 + $0x58] sm:$0xff] %v4544_v15  ;;  %v4492_v50 = vmul.f32 %v3640_v28, %v9562_v17  ;;  %v4494_v1 = vmul.f32 %v4448_v37, %v9563_v44  ;;  %v9575_v36 = vld [vmem:[#allocation67_spill] sm:$0xff]  ;;  %v9576_v28 = vld [vmem:[#allocation18_spill] sm:$0xff] }
 0x3da   :  { %v4545_v54 = vadd.f32 %v8693_v20, %v4491_v9  ;;  %v4547_v61 = vadd.f32 %v8697_v46, %v4493_v57  ;;  %v9577_v17 = vld [vmem:[#allocation35_spill] sm:$0xff] }
 0x3db   :  { %v4546_v14 = vadd.f32 %v8701_v53, %v4492_v50  ;;  %v4548_v38 = vadd.f32 %v8705_v55, %v4494_v1  ;;  %v3645_v40 = vpop.f32.mrb[104].mxu0  ;;  %v4453_v16 = vpop.f32.mrb[104].mxu1 }
 0x3dc   :  { %4577 = vst [vmem:[#allocation2 + $0x60] sm:$0xff] %v4545_v54  ;;  %4579 = vst [vmem:[#allocation2 + $0x70] sm:$0xff] %v4547_v61  ;;  %v4495_v58 = vmul.f32 %v3645_v40, %v9564_v51  ;;  %v4497_v60 = vmul.f32 %v4453_v16, %v9565_v5  ;;  %v3647_v34 = vpop.f32.mrb[105].mxu0  ;;  %v4455_v19 = vpop.f32.mrb[105].mxu1  ;;  %v9578_v54 = vld [vmem:[#allocation19_spill] sm:$0xff] }
 0x3dd   :  { %4578 = vst [vmem:[#allocation2 + $0x68] sm:$0xff] %v4546_v14  ;;  %4580 = vst [vmem:[#allocation2 + $0x78] sm:$0xff] %v4548_v38  ;;  %v4496_v52 = vmul.f32 %v3647_v34, %v9566_v41  ;;  %v4498_v3 = vmul.f32 %v4455_v19, %v9567_v56  ;;  %v9579_v14 = vld [vmem:[#allocation74_spill] sm:$0xff] }
 0x3de   :  { %v4549_v43 = vadd.f32 %v8693_v20, %v4495_v58  ;;  %v4551_v25 = vadd.f32 %v8697_v46, %v4497_v60 }
 0x3df   :  { %v4550_v18 = vadd.f32 %v8701_v53, %v4496_v52  ;;  %v4552_v32 = vadd.f32 %v8705_v55, %v4498_v3  ;;  %v3652_v47 = vpop.f32.mrb[106].mxu0  ;;  %v4460_v0 = vpop.f32.mrb[106].mxu1 }
 0x3e0   :  { %4581 = vst [vmem:[#allocation2 + $0x80] sm:$0xff] %v4549_v43  ;;  %4583 = vst [vmem:[#allocation2 + $0x90] sm:$0xff] %v4551_v25  ;;  %v4499_v26 = vmul.f32 %v3652_v47, %v9568_v13  ;;  %v4501_v42 = vmul.f32 %v4460_v0, %v9569_v48  ;;  %v3654_v22 = vpop.f32.mrb[107].mxu0  ;;  %v4462_v29 = vpop.f32.mrb[107].mxu1 }
 0x3e1   :  { %4582 = vst [vmem:[#allocation2 + $0x88] sm:$0xff] %v4550_v18  ;;  %4584 = vst [vmem:[#allocation2 + $0x98] sm:$0xff] %v4552_v32  ;;  %v4500_v7 = vmul.f32 %v3654_v22, %v9570_v4  ;;  %v4502_v10 = vmul.f32 %v4462_v29, %v9571_v24 }
 0x3e2   :  { %v4553_v6 = vadd.f32 %v8693_v20, %v4499_v26  ;;  %v4555_v31 = vadd.f32 %v8697_v46, %v4501_v42 }
 0x3e3   :  { %v4554_v45 = vadd.f32 %v8701_v53, %v4500_v7  ;;  %v4556_v59 = vadd.f32 %v8705_v55, %v4502_v10  ;;  %v3659_v30 = vpop.f32.mrb[108].mxu0  ;;  %v4467_v2 = vpop.f32.mrb[108].mxu1 }
 0x3e4   :  { %4585 = vst [vmem:[#allocation2 + $0xa0] sm:$0xff] %v4553_v6  ;;  %4587 = vst [vmem:[#allocation2 + $0xb0] sm:$0xff] %v4555_v31  ;;  %v4503_v21 = vmul.f32 %v3659_v30, %v9572_v8  ;;  %v4505_v27 = vmul.f32 %v4467_v2, %v9573_v12  ;;  %v3661_v49 = vpop.f32.mrb[109].mxu0  ;;  %v4469_v33 = vpop.f32.mrb[109].mxu1 }
 0x3e5   :  { %4586 = vst [vmem:[#allocation2 + $0xa8] sm:$0xff] %v4554_v45  ;;  %4588 = vst [vmem:[#allocation2 + $0xb8] sm:$0xff] %v4556_v59  ;;  %v4504_v11 = vmul.f32 %v3661_v49, %v9574_v62  ;;  %v4506_v15 = vmul.f32 %v4469_v33, %v9575_v36 }
 0x3e6   :  { %v4557_v63 = vadd.f32 %v8693_v20, %v4503_v21  ;;  %v4559_v39 = vadd.f32 %v8697_v46, %v4505_v27 }
 0x3e7   :  { %v4558_v35 = vadd.f32 %v8701_v53, %v4504_v11  ;;  %v4560_v9 = vadd.f32 %v8705_v55, %v4506_v15  ;;  %v3666_v23 = vpop.f32.mrb[110].mxu0  ;;  %v4474_v57 = vpop.f32.mrb[110].mxu1 }
 0x3e8   :  { %4589 = vst [vmem:[#allocation2 + $0xc0] sm:$0xff] %v4557_v63  ;;  %4591 = vst [vmem:[#allocation2 + $0xd0] sm:$0xff] %v4559_v39  ;;  %v4507_v37 = vmul.f32 %v3666_v23, %v9576_v28  ;;  %v4509_v50 = vmul.f32 %v4474_v57, %v9577_v17  ;;  %v3668_v44 = vpop.f32.mrb[111].mxu0  ;;  %v4476_v1 = vpop.f32.mrb[111].mxu1 }
 0x3e9   :  { %4590 = vst [vmem:[#allocation2 + $0xc8] sm:$0xff] %v4558_v35  ;;  %4592 = vst [vmem:[#allocation2 + $0xd8] sm:$0xff] %v4560_v9  ;;  %v4508_v61 = vmul.f32 %v3668_v44, %v9578_v54  ;;  %v4510_v38 = vmul.f32 %v4476_v1, %v9579_v14 }
 0x3ea   :  { %v4561_v40 = vadd.f32 %v8693_v20, %v4507_v37  ;;  %v4563_v16 = vadd.f32 %v8697_v46, %v4509_v50 }
 0x3eb   :  { %v4562_v51 = vadd.f32 %v8701_v53, %v4508_v61  ;;  %v4564_v58 = vadd.f32 %v8705_v55, %v4510_v38 }
 0x3ec   :  { %4593 = vst [vmem:[#allocation2 + $0xe0] sm:$0xff] %v4561_v40  ;;  %4595 = vst [vmem:[#allocation2 + $0xf0] sm:$0xff] %v4563_v16 }
 0x3ed   :  { %4594 = vst [vmem:[#allocation2 + $0xe8] sm:$0xff] %v4562_v51  ;;  %4596 = vst [vmem:[#allocation2 + $0xf8] sm:$0xff] %v4564_v58 }
 0x3ee   :  { %5876 = shalt.err (!%p5873_p4)
}
 0x3ef   :  { %s5877_s23 = scalar_lea.hbm %s8789_s6, 4096 }
 0x3f0   :  { %p5878_p5 = scmp.ne.s32.totalorder %s8789_s6, %s5877_s23  ;;  %p5881_p6 = scmp.lt.u32.totalorder %s5877_s23, %s8789_s6 }
 0x3f2   :  { %p5883_p7 = pnand %p5881_p6, %p5878_p5 }
 0x3f4   :  { %5886 = shalt.err (!%p5883_p7)
}
 0x3f5   :  { %s5891_s3 = smov 512   ;;  %s5892_s27 = smov 32  }
 0x3f6   :  { %4608 = dma.vmem_to_hbm [thread:$0]  %s4603_s19, 4096, %s8789_s6, [#allocation3], %s5891_s3, %s5891_s3, %s5892_s27  }
 0x3f7   :  { %5887 = dma.done.wait [#allocation3], 4096  }
 0x3f8   :  { %5888 = vsyncadd [#allocation3], 4294963200 }
 0x3f9   :  { %4612 = vsyncpa [#allocation3], 1 }

</bundles_post_ra>
